<compile_context>
chip_gen: v6e
topology: v6e:2x2x1
jax: 0.10.0
libtpu: 0.0.40
codegen_flags: <defaults>
</compile_context>

<pallas_src>
import math
import numpy as np
import jax
import jax.numpy as jnp
from jax import lax
from jax.experimental import pallas as pl
from jax.experimental.pallas import tpu as pltpu

# --- small config consistent with the module (scaled down from 768/12/1024) ---
N_EMBED = 128
N_HEADS = 4
HEAD_DIM = N_EMBED // N_HEADS
SEQ = 128
BATCH = 2
LN_EPS = 1e-5


def _layernorm(z, g, b):
    # one-pass stats: two independent cross-lane reductions, no (z-mu)**2 temp
    mu = jnp.mean(z, axis=-1, keepdims=True)
    ms = jnp.mean(z * z, axis=-1, keepdims=True)
    var = ms - mu * mu
    return (z - mu) * lax.rsqrt(var + LN_EPS) * g + b


def _gelu_tanh(x):
    # PyTorch nn.GELU(approximate='tanh')
    c = math.sqrt(2.0 / math.pi)
    return 0.5 * x * (1.0 + jnp.tanh(c * (x + 0.044715 * x * x * x)))


def block_kernel(x_ref,
                 g1_ref, b1_ref,
                 wqkv_ref, bqkv_ref,
                 wproj_ref, bproj_ref,
                 g2_ref, b2_ref,
                 wfc_ref, bfc_ref,
                 wp2_ref, bp2_ref,
                 o_ref):
    x = x_ref[0]                      # (T, C) f32
    T, C = x.shape
    H = N_HEADS
    D = C // H
    bf16 = jnp.bfloat16

    # ---- ln_1 + qkv projection (bf16 MXU inputs, f32 accumulation) ----
    xn = _layernorm(x, g1_ref[0], b1_ref[0])
    qkv = jnp.dot(xn.astype(bf16), wqkv_ref[...],
                  preferred_element_type=jnp.float32) + bqkv_ref[0]     # (T,3C)

    scale = 1.0 / math.sqrt(D)
    q_all = (qkv[:, 0 * C:1 * C] * scale).astype(bf16)   # softmax scale folded into q
    k_all = qkv[:, 1 * C:2 * C].astype(bf16)
    v_all = qkv[:, 2 * C:3 * C].astype(bf16)

    # additive causal bias, built once and reused by every head
    rows = lax.broadcasted_iota(jnp.int32, (T, T), 0)
    cols = lax.broadcasted_iota(jnp.int32, (T, T), 1)
    mask_bias = jnp.where(rows >= cols, 0.0, -1e30).astype(jnp.float32)

    # Per-head attention, no head-axis transposes. Output projection is
    # accumulated per head:  y @ Wproj == sum_h y_h @ Wproj[h*D:(h+1)*D, :].
    # Seed the accumulator with the residual input + projection bias so the
    # final residual add is free.
    acc = x + bproj_ref[0]                               # (T, C) f32
    for h in range(H):                                   # static unrolled, H=4
        q_h = q_all[:, h * D:(h + 1) * D]                # (T,D) bf16
        k_h = k_all[:, h * D:(h + 1) * D]
        v_h = v_all[:, h * D:(h + 1) * D]

        s = lax.dot_general(q_h, k_h, (((1,), (1,)), ((), ())),
                            preferred_element_type=jnp.float32)         # (T,T)
        s = s + mask_bias
        m = jnp.max(s, axis=-1, keepdims=True)
        p = jnp.exp(s - m)
        p = p * pl.reciprocal(jnp.sum(p, axis=-1, keepdims=True), approx=True)

        y_h = jnp.dot(p.astype(bf16), v_h,
                      preferred_element_type=jnp.float32)                # (T,D)
        acc = acc + jnp.dot(y_h.astype(bf16), wproj_ref[h * D:(h + 1) * D, :],
                            preferred_element_type=jnp.float32)          # (T,C)

    x1 = acc                                             # x + attn(ln_1(x))

    # ---- ln_2 + MLP (fc -> gelu(tanh) -> proj) ----
    x1n = _layernorm(x1, g2_ref[0], b2_ref[0])
    hfc = jnp.dot(x1n.astype(bf16), wfc_ref[...],
                  preferred_element_type=jnp.float32) + bfc_ref[0]
    hfc = _gelu_tanh(hfc)                                # f32 on VPU/EUP
    mlp = jnp.dot(hfc.astype(bf16), wp2_ref[...],
                  preferred_element_type=jnp.float32) + bp2_ref[0]

    o_ref[0] = x1 + mlp


def transformer_block(x, params):
    B, T, C = x.shape
    full = lambda shape: pl.BlockSpec(shape, lambda b: tuple(0 for _ in shape))
    in_specs = [
        pl.BlockSpec((1, T, C), lambda b: (b, 0, 0)),          # x
        full((1, C)), full((1, C)),                            # ln1 gamma/beta (f32)
        full((C, 3 * C)), full((1, 3 * C)),                    # c_attn W (bf16), b (f32)
        full((C, C)), full((1, C)),                            # attn c_proj W (bf16), b
        full((1, C)), full((1, C)),                            # ln2 gamma/beta
        full((C, 4 * C)), full((1, 4 * C)),                    # mlp c_fc W (bf16), b
        full((4 * C, C)), full((1, C)),                        # mlp c_proj W (bf16), b
    ]
    # TODO(synk): for production shapes (C>=768, T>=1024) add K-tiling for the
    # MLP matmuls and a flash-attention style KV loop instead of full (T,T) scores.
    return pl.pallas_call(
        block_kernel,
        out_shape=jax.ShapeDtypeStruct((B, T, C), jnp.float32),
        grid_spec=pltpu.PrefetchScalarGridSpec(
            num_scalar_prefetch=0,
            grid=(B,),
            in_specs=in_specs,
            out_specs=pl.BlockSpec((1, T, C), lambda b: (b, 0, 0)),
        ),
        compiler_params=pltpu.CompilerParams(
            dimension_semantics=("parallel",),
            vmem_limit_bytes=32 * 1024 * 1024),
    )(x, *params)


def reference_block(x, params):
    (g1, b1, wqkv, bqkv, wproj, bproj, g2, b2, wfc, bfc, wp2, bp2) = params
    f32 = jnp.float32
    wqkv, wproj, wfc, wp2 = (w.astype(f32) for w in (wqkv, wproj, wfc, wp2))
    B, T, C = x.shape
    H, D = N_HEADS, HEAD_DIM
    xn = _layernorm(x, g1[0], b1[0])
    qkv = xn @ wqkv + bqkv[0]
    q, k, v = jnp.split(qkv, 3, axis=-1)
    q = q.reshape(B, T, H, D).transpose(0, 2, 1, 3)
    k = k.reshape(B, T, H, D).transpose(0, 2, 1, 3)
    v = v.reshape(B, T, H, D).transpose(0, 2, 1, 3)
    s = jnp.einsum('bhtd,bhsd->bhts', q, k) / math.sqrt(D)
    mask = jnp.tril(jnp.ones((T, T), bool))
    s = jnp.where(mask[None, None], s, -1e30)
    p = jax.nn.softmax(s, axis=-1)
    y = jnp.einsum('bhts,bhsd->bhtd', p, v).transpose(0, 2, 1, 3).reshape(B, T, C)
    x1 = x + (y @ wproj + bproj[0])
    x1n = _layernorm(x1, g2[0], b2[0])
    h = _gelu_tanh(x1n @ wfc + bfc[0])
    return x1 + (h @ wp2 + bp2[0])


def init_params(key, C):
    ks = jax.random.split(key, 6)
    std = 0.02
    bf16 = jnp.bfloat16
    g1 = jnp.ones((1, C), jnp.float32)
    b1 = jnp.zeros((1, C), jnp.float32)
    wqkv = (std * jax.random.normal(ks[0], (C, 3 * C), jnp.float32)).astype(bf16)
    bqkv = std * jax.random.normal(ks[1], (1, 3 * C), jnp.float32)
    wproj = (std * jax.random.normal(ks[2], (C, C), jnp.float32)).astype(bf16)
    bproj = jnp.zeros((1, C), jnp.float32)
    g2 = jnp.ones((1, C), jnp.float32)
    b2 = jnp.zeros((1, C), jnp.float32)
    wfc = (std * jax.random.normal(ks[3], (C, 4 * C), jnp.float32)).astype(bf16)
    bfc = std * jax.random.normal(ks[4], (1, 4 * C), jnp.float32)
    wp2 = (std * jax.random.normal(ks[5], (4 * C, C), jnp.float32)).astype(bf16)
    bp2 = jnp.zeros((1, C), jnp.float32)
    return (g1, b1, wqkv, bqkv, wproj, bproj, g2, b2, wfc, bfc, wp2, bp2)


if __name__ == "__main__":
    key = jax.random.PRNGKey(0)
    kx, kp = jax.random.split(key)
    x = jax.random.normal(kx, (BATCH, SEQ, N_EMBED), jnp.float32)
    params = init_params(kp, N_EMBED)

    out = transformer_block(x, params)
    out = jax.block_until_ready(out)

    # f32 reference (same bf16 weight values upcast); tolerance accounts for
    # bf16 matmul operands + approx softmax reciprocal in the kernel.
    ref = jax.block_until_ready(reference_block(x, params))
    assert np.allclose(np.asarray(out), np.asarray(ref), atol=2e-2, rtol=2e-2), \
        "Pallas output mismatch vs JAX reference"
    print("KERNEL_OK")
</pallas_src>

<mosaic_0001>
module attributes {stable_mosaic.version = 11 : i64} {
  func.func @block_kernel(%arg0: i32, %arg1: memref<1x128x128xf32, #tpu.memory_space<vmem>>, %arg2: memref<1x128xf32, #tpu.memory_space<vmem>>, %arg3: memref<1x128xf32, #tpu.memory_space<vmem>>, %arg4: memref<128x384xbf16, #tpu.memory_space<vmem>>, %arg5: memref<1x384xf32, #tpu.memory_space<vmem>>, %arg6: memref<128x128xbf16, #tpu.memory_space<vmem>>, %arg7: memref<1x128xf32, #tpu.memory_space<vmem>>, %arg8: memref<1x128xf32, #tpu.memory_space<vmem>>, %arg9: memref<1x128xf32, #tpu.memory_space<vmem>>, %arg10: memref<128x512xbf16, #tpu.memory_space<vmem>>, %arg11: memref<1x512xf32, #tpu.memory_space<vmem>>, %arg12: memref<512x128xbf16, #tpu.memory_space<vmem>>, %arg13: memref<1x128xf32, #tpu.memory_space<vmem>>, %arg14: memref<1x128x128xf32, #tpu.memory_space<vmem>>) attributes {dimension_semantics = [#tpu.dimension_semantics<parallel>], iteration_bounds = array<i64: 2>, scalar_prefetch = 0 : i64, scratch_operands = 0 : i64, tpu.core_type = #tpu.core_type<tc>, window_params = [{transform_indices = @transform_0, window_bounds = array<i64: 1, 128, 128>}, {pipeline_mode = #tpu.pipeline_mode<synchronous>, transform_indices = @transform_1, window_bounds = array<i64: 1, 128>}, {pipeline_mode = #tpu.pipeline_mode<synchronous>, transform_indices = @transform_2, window_bounds = array<i64: 1, 128>}, {pipeline_mode = #tpu.pipeline_mode<synchronous>, transform_indices = @transform_3, window_bounds = array<i64: 128, 384>}, {pipeline_mode = #tpu.pipeline_mode<synchronous>, transform_indices = @transform_4, window_bounds = array<i64: 1, 384>}, {pipeline_mode = #tpu.pipeline_mode<synchronous>, transform_indices = @transform_5, window_bounds = array<i64: 128, 128>}, {pipeline_mode = #tpu.pipeline_mode<synchronous>, transform_indices = @transform_6, window_bounds = array<i64: 1, 128>}, {pipeline_mode = #tpu.pipeline_mode<synchronous>, transform_indices = @transform_7, window_bounds = array<i64: 1, 128>}, {pipeline_mode = #tpu.pipeline_mode<synchronous>, transform_indices = @transform_8, window_bounds = array<i64: 1, 128>}, {pipeline_mode = #tpu.pipeline_mode<synchronous>, transform_indices = @transform_9, window_bounds = array<i64: 128, 512>}, {pipeline_mode = #tpu.pipeline_mode<synchronous>, transform_indices = @transform_10, window_bounds = array<i64: 1, 512>}, {pipeline_mode = #tpu.pipeline_mode<synchronous>, transform_indices = @transform_11, window_bounds = array<i64: 512, 128>}, {pipeline_mode = #tpu.pipeline_mode<synchronous>, transform_indices = @transform_12, window_bounds = array<i64: 1, 128>}, {transform_indices = @transform_13, window_bounds = array<i64: 1, 128, 128>}]} {
    %c0 = arith.constant 0 : index
    %c0_0 = arith.constant 0 : index
    %c0_1 = arith.constant 0 : index
    %0 = vector.load %arg1[%c0, %c0_0, %c0_1] : memref<1x128x128xf32, #tpu.memory_space<vmem>>, vector<1x128x128xf32>
    %1 = vector.shape_cast %0 : vector<1x128x128xf32> to vector<128x128xf32>
    %c0_2 = arith.constant 0 : index
    %c0_3 = arith.constant 0 : index
    %2 = vector.load %arg2[%c0_2, %c0_3] : memref<1x128xf32, #tpu.memory_space<vmem>>, vector<1x128xf32>
    %3 = vector.shape_cast %2 : vector<1x128xf32> to vector<128xf32>
    %c0_4 = arith.constant 0 : index
    %c0_5 = arith.constant 0 : index
    %4 = vector.load %arg3[%c0_4, %c0_5] : memref<1x128xf32, #tpu.memory_space<vmem>>, vector<1x128xf32>
    %5 = vector.shape_cast %4 : vector<1x128xf32> to vector<128xf32>
    %cst = arith.constant dense<0.000000e+00> : vector<128xf32>
    %6 = vector.multi_reduction <add>, %1, %cst [1] : vector<128x128xf32> to vector<128xf32>
    %7 = vector.shape_cast %6 : vector<128xf32> to vector<128x1xf32>
    %cst_6 = arith.constant 1.280000e+02 : f32
    %8 = vector.broadcast %cst_6 : f32 to vector<128x1xf32>
    %9 = arith.divf %7, %8 : vector<128x1xf32>
    %10 = arith.mulf %1, %1 : vector<128x128xf32>
    %cst_7 = arith.constant dense<0.000000e+00> : vector<128xf32>
    %11 = vector.multi_reduction <add>, %10, %cst_7 [1] : vector<128x128xf32> to vector<128xf32>
    %12 = vector.shape_cast %11 : vector<128xf32> to vector<128x1xf32>
    %cst_8 = arith.constant 1.280000e+02 : f32
    %13 = vector.broadcast %cst_8 : f32 to vector<128x1xf32>
    %14 = arith.divf %12, %13 : vector<128x1xf32>
    %15 = arith.mulf %9, %9 : vector<128x1xf32>
    %16 = arith.subf %14, %15 : vector<128x1xf32>
    %17 = vector.broadcast %9 : vector<128x1xf32> to vector<128x128xf32>
    %18 = arith.subf %1, %17 : vector<128x128xf32>
    %cst_9 = arith.constant 9.99999974E-6 : f32
    %19 = vector.broadcast %cst_9 : f32 to vector<128x1xf32>
    %20 = arith.addf %16, %19 : vector<128x1xf32>
    %21 = math.rsqrt %20 : vector<128x1xf32>
    %22 = vector.broadcast %21 : vector<128x1xf32> to vector<128x128xf32>
    %23 = arith.mulf %18, %22 : vector<128x128xf32>
    %24 = vector.shape_cast %3 : vector<128xf32> to vector<1x128xf32>
    %25 = vector.broadcast %24 : vector<1x128xf32> to vector<128x128xf32>
    %26 = arith.mulf %23, %25 : vector<128x128xf32>
    %27 = vector.shape_cast %5 : vector<128xf32> to vector<1x128xf32>
    %28 = vector.broadcast %27 : vector<1x128xf32> to vector<128x128xf32>
    %29 = arith.addf %26, %28 : vector<128x128xf32>
    %30 = arith.truncf %29 : vector<128x128xf32> to vector<128x128xbf16>
    %c0_10 = arith.constant 0 : index
    %c0_11 = arith.constant 0 : index
    %31 = vector.load %arg4[%c0_10, %c0_11] : memref<128x384xbf16, #tpu.memory_space<vmem>>, vector<128x384xbf16>
    %cst_12 = arith.constant dense<0.000000e+00> : vector<128x384xf32>
    %32 = tpu.matmul %30, %31, %cst_12 {dimension_numbers = #tpu.dot_dimension_numbers<[1], [0], [0], [1], [0, 0, 1, 1], [], []>} : vector<128x128xbf16>, vector<128x384xbf16>, vector<128x384xf32> -> vector<128x384xf32>
    %c0_13 = arith.constant 0 : index
    %c0_14 = arith.constant 0 : index
    %33 = vector.load %arg5[%c0_13, %c0_14] : memref<1x384xf32, #tpu.memory_space<vmem>>, vector<1x384xf32>
    %34 = vector.shape_cast %33 : vector<1x384xf32> to vector<384xf32>
    %35 = vector.shape_cast %34 : vector<384xf32> to vector<1x384xf32>
    %36 = vector.broadcast %35 : vector<1x384xf32> to vector<128x384xf32>
    %37 = arith.addf %32, %36 : vector<128x384xf32>
    %38 = vector.extract_strided_slice %37 {offsets = [0, 0], sizes = [128, 128], strides = [1, 1]} : vector<128x384xf32> to vector<128x128xf32>
    %cst_15 = arith.constant 0.176776692 : f32
    %39 = vector.broadcast %cst_15 : f32 to vector<128x128xf32>
    %40 = arith.mulf %38, %39 : vector<128x128xf32>
    %41 = arith.truncf %40 : vector<128x128xf32> to vector<128x128xbf16>
    %42 = vector.extract_strided_slice %37 {offsets = [0, 128], sizes = [128, 128], strides = [1, 1]} : vector<128x384xf32> to vector<128x128xf32>
    %43 = arith.truncf %42 : vector<128x128xf32> to vector<128x128xbf16>
    %44 = vector.extract_strided_slice %37 {offsets = [0, 256], sizes = [128, 128], strides = [1, 1]} : vector<128x384xf32> to vector<128x128xf32>
    %45 = arith.truncf %44 : vector<128x128xf32> to vector<128x128xbf16>
    %46 = tpu.iota {dimensions = array<i32: 0>} : vector<128x128xi32>
    %47 = tpu.iota {dimensions = array<i32: 1>} : vector<128x128xi32>
    %48 = arith.cmpi sge, %46, %47 : vector<128x128xi32>
    %cst_16 = arith.constant 0.000000e+00 : f32
    %cst_17 = arith.constant -1.000000e+30 : f32
    %49 = vector.broadcast %cst_16 : f32 to vector<128x128xf32>
    %50 = vector.broadcast %cst_17 : f32 to vector<128x128xf32>
    %51 = arith.select %48, %49, %50 : vector<128x128xi1>, vector<128x128xf32>
    %c0_18 = arith.constant 0 : index
    %c0_19 = arith.constant 0 : index
    %52 = vector.load %arg7[%c0_18, %c0_19] : memref<1x128xf32, #tpu.memory_space<vmem>>, vector<1x128xf32>
    %53 = vector.shape_cast %52 : vector<1x128xf32> to vector<128xf32>
    %54 = vector.shape_cast %53 : vector<128xf32> to vector<1x128xf32>
    %55 = vector.broadcast %54 : vector<1x128xf32> to vector<128x128xf32>
    %56 = arith.addf %1, %55 : vector<128x128xf32>
    %57 = vector.extract_strided_slice %41 {offsets = [0, 0], sizes = [128, 32], strides = [1, 1]} : vector<128x128xbf16> to vector<128x32xbf16>
    %58 = vector.extract_strided_slice %43 {offsets = [0, 0], sizes = [128, 32], strides = [1, 1]} : vector<128x128xbf16> to vector<128x32xbf16>
    %59 = vector.extract_strided_slice %45 {offsets = [0, 0], sizes = [128, 32], strides = [1, 1]} : vector<128x128xbf16> to vector<128x32xbf16>
    %cst_20 = arith.constant dense<0.000000e+00> : vector<128x128xf32>
    %60 = tpu.matmul %57, %58, %cst_20 {dimension_numbers = #tpu.dot_dimension_numbers<[1], [1], [0], [0], [0, 0, 1, 0], [], []>} : vector<128x32xbf16>, vector<128x32xbf16>, vector<128x128xf32> -> vector<128x128xf32>
    %61 = arith.addf %60, %51 : vector<128x128xf32>
    %cst_21 = arith.constant dense<0xFF800000> : vector<128xf32>
    %62 = vector.multi_reduction <maximumf>, %61, %cst_21 [1] : vector<128x128xf32> to vector<128xf32>
    %63 = vector.shape_cast %62 : vector<128xf32> to vector<128x1xf32>
    %64 = vector.broadcast %63 : vector<128x1xf32> to vector<128x128xf32>
    %65 = arith.subf %61, %64 : vector<128x128xf32>
    %66 = math.exp %65 : vector<128x128xf32>
    %cst_22 = arith.constant dense<0.000000e+00> : vector<128xf32>
    %67 = vector.multi_reduction <add>, %66, %cst_22 [1] : vector<128x128xf32> to vector<128xf32>
    %68 = vector.shape_cast %67 : vector<128xf32> to vector<128x1xf32>
    %69 = tpu.reciprocal %68 {approx = true} : vector<128x1xf32> -> vector<128x1xf32>
    %70 = vector.broadcast %69 : vector<128x1xf32> to vector<128x128xf32>
    %71 = arith.mulf %66, %70 : vector<128x128xf32>
    %72 = arith.truncf %71 : vector<128x128xf32> to vector<128x128xbf16>
    %cst_23 = arith.constant dense<0.000000e+00> : vector<128x32xf32>
    %73 = tpu.matmul %72, %59, %cst_23 {dimension_numbers = #tpu.dot_dimension_numbers<[1], [0], [0], [1], [0, 0, 1, 1], [], []>} : vector<128x128xbf16>, vector<128x32xbf16>, vector<128x32xf32> -> vector<128x32xf32>
    %74 = arith.truncf %73 : vector<128x32xf32> to vector<128x32xbf16>
    %c0_24 = arith.constant 0 : index
    %c0_25 = arith.constant 0 : index
    %75 = vector.load %arg6[%c0_24, %c0_25] : memref<128x128xbf16, #tpu.memory_space<vmem>>, vector<32x128xbf16>
    %cst_26 = arith.constant dense<0.000000e+00> : vector<128x128xf32>
    %76 = tpu.matmul %74, %75, %cst_26 {dimension_numbers = #tpu.dot_dimension_numbers<[1], [0], [0], [1], [0, 0, 1, 1], [], []>} : vector<128x32xbf16>, vector<32x128xbf16>, vector<128x128xf32> -> vector<128x128xf32>
    %77 = arith.addf %56, %76 : vector<128x128xf32>
    %78 = vector.extract_strided_slice %41 {offsets = [0, 32], sizes = [128, 32], strides = [1, 1]} : vector<128x128xbf16> to vector<128x32xbf16>
    %79 = vector.extract_strided_slice %43 {offsets = [0, 32], sizes = [128, 32], strides = [1, 1]} : vector<128x128xbf16> to vector<128x32xbf16>
    %80 = vector.extract_strided_slice %45 {offsets = [0, 32], sizes = [128, 32], strides = [1, 1]} : vector<128x128xbf16> to vector<128x32xbf16>
    %cst_27 = arith.constant dense<0.000000e+00> : vector<128x128xf32>
    %81 = tpu.matmul %78, %79, %cst_27 {dimension_numbers = #tpu.dot_dimension_numbers<[1], [1], [0], [0], [0, 0, 1, 0], [], []>} : vector<128x32xbf16>, vector<128x32xbf16>, vector<128x128xf32> -> vector<128x128xf32>
    %82 = arith.addf %81, %51 : vector<128x128xf32>
    %cst_28 = arith.constant dense<0xFF800000> : vector<128xf32>
    %83 = vector.multi_reduction <maximumf>, %82, %cst_28 [1] : vector<128x128xf32> to vector<128xf32>
    %84 = vector.shape_cast %83 : vector<128xf32> to vector<128x1xf32>
    %85 = vector.broadcast %84 : vector<128x1xf32> to vector<128x128xf32>
    %86 = arith.subf %82, %85 : vector<128x128xf32>
    %87 = math.exp %86 : vector<128x128xf32>
    %cst_29 = arith.constant dense<0.000000e+00> : vector<128xf32>
    %88 = vector.multi_reduction <add>, %87, %cst_29 [1] : vector<128x128xf32> to vector<128xf32>
    %89 = vector.shape_cast %88 : vector<128xf32> to vector<128x1xf32>
    %90 = tpu.reciprocal %89 {approx = true} : vector<128x1xf32> -> vector<128x1xf32>
    %91 = vector.broadcast %90 : vector<128x1xf32> to vector<128x128xf32>
    %92 = arith.mulf %87, %91 : vector<128x128xf32>
    %93 = arith.truncf %92 : vector<128x128xf32> to vector<128x128xbf16>
    %cst_30 = arith.constant dense<0.000000e+00> : vector<128x32xf32>
    %94 = tpu.matmul %93, %80, %cst_30 {dimension_numbers = #tpu.dot_dimension_numbers<[1], [0], [0], [1], [0, 0, 1, 1], [], []>} : vector<128x128xbf16>, vector<128x32xbf16>, vector<128x32xf32> -> vector<128x32xf32>
    %95 = arith.truncf %94 : vector<128x32xf32> to vector<128x32xbf16>
    %c32 = arith.constant 32 : index
    %c0_31 = arith.constant 0 : index
    %96 = vector.load %arg6[%c32, %c0_31] : memref<128x128xbf16, #tpu.memory_space<vmem>>, vector<32x128xbf16>
    %cst_32 = arith.constant dense<0.000000e+00> : vector<128x128xf32>
    %97 = tpu.matmul %95, %96, %cst_32 {dimension_numbers = #tpu.dot_dimension_numbers<[1], [0], [0], [1], [0, 0, 1, 1], [], []>} : vector<128x32xbf16>, vector<32x128xbf16>, vector<128x128xf32> -> vector<128x128xf32>
    %98 = arith.addf %77, %97 : vector<128x128xf32>
    %99 = vector.extract_strided_slice %41 {offsets = [0, 64], sizes = [128, 32], strides = [1, 1]} : vector<128x128xbf16> to vector<128x32xbf16>
    %100 = vector.extract_strided_slice %43 {offsets = [0, 64], sizes = [128, 32], strides = [1, 1]} : vector<128x128xbf16> to vector<128x32xbf16>
    %101 = vector.extract_strided_slice %45 {offsets = [0, 64], sizes = [128, 32], strides = [1, 1]} : vector<128x128xbf16> to vector<128x32xbf16>
    %cst_33 = arith.constant dense<0.000000e+00> : vector<128x128xf32>
    %102 = tpu.matmul %99, %100, %cst_33 {dimension_numbers = #tpu.dot_dimension_numbers<[1], [1], [0], [0], [0, 0, 1, 0], [], []>} : vector<128x32xbf16>, vector<128x32xbf16>, vector<128x128xf32> -> vector<128x128xf32>
    %103 = arith.addf %102, %51 : vector<128x128xf32>
    %cst_34 = arith.constant dense<0xFF800000> : vector<128xf32>
    %104 = vector.multi_reduction <maximumf>, %103, %cst_34 [1] : vector<128x128xf32> to vector<128xf32>
    %105 = vector.shape_cast %104 : vector<128xf32> to vector<128x1xf32>
    %106 = vector.broadcast %105 : vector<128x1xf32> to vector<128x128xf32>
    %107 = arith.subf %103, %106 : vector<128x128xf32>
    %108 = math.exp %107 : vector<128x128xf32>
    %cst_35 = arith.constant dense<0.000000e+00> : vector<128xf32>
    %109 = vector.multi_reduction <add>, %108, %cst_35 [1] : vector<128x128xf32> to vector<128xf32>
    %110 = vector.shape_cast %109 : vector<128xf32> to vector<128x1xf32>
    %111 = tpu.reciprocal %110 {approx = true} : vector<128x1xf32> -> vector<128x1xf32>
    %112 = vector.broadcast %111 : vector<128x1xf32> to vector<128x128xf32>
    %113 = arith.mulf %108, %112 : vector<128x128xf32>
    %114 = arith.truncf %113 : vector<128x128xf32> to vector<128x128xbf16>
    %cst_36 = arith.constant dense<0.000000e+00> : vector<128x32xf32>
    %115 = tpu.matmul %114, %101, %cst_36 {dimension_numbers = #tpu.dot_dimension_numbers<[1], [0], [0], [1], [0, 0, 1, 1], [], []>} : vector<128x128xbf16>, vector<128x32xbf16>, vector<128x32xf32> -> vector<128x32xf32>
    %116 = arith.truncf %115 : vector<128x32xf32> to vector<128x32xbf16>
    %c64 = arith.constant 64 : index
    %c0_37 = arith.constant 0 : index
    %117 = vector.load %arg6[%c64, %c0_37] : memref<128x128xbf16, #tpu.memory_space<vmem>>, vector<32x128xbf16>
    %cst_38 = arith.constant dense<0.000000e+00> : vector<128x128xf32>
    %118 = tpu.matmul %116, %117, %cst_38 {dimension_numbers = #tpu.dot_dimension_numbers<[1], [0], [0], [1], [0, 0, 1, 1], [], []>} : vector<128x32xbf16>, vector<32x128xbf16>, vector<128x128xf32> -> vector<128x128xf32>
    %119 = arith.addf %98, %118 : vector<128x128xf32>
    %120 = vector.extract_strided_slice %41 {offsets = [0, 96], sizes = [128, 32], strides = [1, 1]} : vector<128x128xbf16> to vector<128x32xbf16>
    %121 = vector.extract_strided_slice %43 {offsets = [0, 96], sizes = [128, 32], strides = [1, 1]} : vector<128x128xbf16> to vector<128x32xbf16>
    %122 = vector.extract_strided_slice %45 {offsets = [0, 96], sizes = [128, 32], strides = [1, 1]} : vector<128x128xbf16> to vector<128x32xbf16>
    %cst_39 = arith.constant dense<0.000000e+00> : vector<128x128xf32>
    %123 = tpu.matmul %120, %121, %cst_39 {dimension_numbers = #tpu.dot_dimension_numbers<[1], [1], [0], [0], [0, 0, 1, 0], [], []>} : vector<128x32xbf16>, vector<128x32xbf16>, vector<128x128xf32> -> vector<128x128xf32>
    %124 = arith.addf %123, %51 : vector<128x128xf32>
    %cst_40 = arith.constant dense<0xFF800000> : vector<128xf32>
    %125 = vector.multi_reduction <maximumf>, %124, %cst_40 [1] : vector<128x128xf32> to vector<128xf32>
    %126 = vector.shape_cast %125 : vector<128xf32> to vector<128x1xf32>
    %127 = vector.broadcast %126 : vector<128x1xf32> to vector<128x128xf32>
    %128 = arith.subf %124, %127 : vector<128x128xf32>
    %129 = math.exp %128 : vector<128x128xf32>
    %cst_41 = arith.constant dense<0.000000e+00> : vector<128xf32>
    %130 = vector.multi_reduction <add>, %129, %cst_41 [1] : vector<128x128xf32> to vector<128xf32>
    %131 = vector.shape_cast %130 : vector<128xf32> to vector<128x1xf32>
    %132 = tpu.reciprocal %131 {approx = true} : vector<128x1xf32> -> vector<128x1xf32>
    %133 = vector.broadcast %132 : vector<128x1xf32> to vector<128x128xf32>
    %134 = arith.mulf %129, %133 : vector<128x128xf32>
    %135 = arith.truncf %134 : vector<128x128xf32> to vector<128x128xbf16>
    %cst_42 = arith.constant dense<0.000000e+00> : vector<128x32xf32>
    %136 = tpu.matmul %135, %122, %cst_42 {dimension_numbers = #tpu.dot_dimension_numbers<[1], [0], [0], [1], [0, 0, 1, 1], [], []>} : vector<128x128xbf16>, vector<128x32xbf16>, vector<128x32xf32> -> vector<128x32xf32>
    %137 = arith.truncf %136 : vector<128x32xf32> to vector<128x32xbf16>
    %c96 = arith.constant 96 : index
    %c0_43 = arith.constant 0 : index
    %138 = vector.load %arg6[%c96, %c0_43] : memref<128x128xbf16, #tpu.memory_space<vmem>>, vector<32x128xbf16>
    %cst_44 = arith.constant dense<0.000000e+00> : vector<128x128xf32>
    %139 = tpu.matmul %137, %138, %cst_44 {dimension_numbers = #tpu.dot_dimension_numbers<[1], [0], [0], [1], [0, 0, 1, 1], [], []>} : vector<128x32xbf16>, vector<32x128xbf16>, vector<128x128xf32> -> vector<128x128xf32>
    %140 = arith.addf %119, %139 : vector<128x128xf32>
    %c0_45 = arith.constant 0 : index
    %c0_46 = arith.constant 0 : index
    %141 = vector.load %arg8[%c0_45, %c0_46] : memref<1x128xf32, #tpu.memory_space<vmem>>, vector<1x128xf32>
    %142 = vector.shape_cast %141 : vector<1x128xf32> to vector<128xf32>
    %c0_47 = arith.constant 0 : index
    %c0_48 = arith.constant 0 : index
    %143 = vector.load %arg9[%c0_47, %c0_48] : memref<1x128xf32, #tpu.memory_space<vmem>>, vector<1x128xf32>
    %144 = vector.shape_cast %143 : vector<1x128xf32> to vector<128xf32>
    %cst_49 = arith.constant dense<0.000000e+00> : vector<128xf32>
    %145 = vector.multi_reduction <add>, %140, %cst_49 [1] : vector<128x128xf32> to vector<128xf32>
    %146 = vector.shape_cast %145 : vector<128xf32> to vector<128x1xf32>
    %cst_50 = arith.constant 1.280000e+02 : f32
    %147 = vector.broadcast %cst_50 : f32 to vector<128x1xf32>
    %148 = arith.divf %146, %147 : vector<128x1xf32>
    %149 = arith.mulf %140, %140 : vector<128x128xf32>
    %cst_51 = arith.constant dense<0.000000e+00> : vector<128xf32>
    %150 = vector.multi_reduction <add>, %149, %cst_51 [1] : vector<128x128xf32> to vector<128xf32>
    %151 = vector.shape_cast %150 : vector<128xf32> to vector<128x1xf32>
    %cst_52 = arith.constant 1.280000e+02 : f32
    %152 = vector.broadcast %cst_52 : f32 to vector<128x1xf32>
    %153 = arith.divf %151, %152 : vector<128x1xf32>
    %154 = arith.mulf %148, %148 : vector<128x1xf32>
    %155 = arith.subf %153, %154 : vector<128x1xf32>
    %156 = vector.broadcast %148 : vector<128x1xf32> to vector<128x128xf32>
    %157 = arith.subf %140, %156 : vector<128x128xf32>
    %cst_53 = arith.constant 9.99999974E-6 : f32
    %158 = vector.broadcast %cst_53 : f32 to vector<128x1xf32>
    %159 = arith.addf %155, %158 : vector<128x1xf32>
    %160 = math.rsqrt %159 : vector<128x1xf32>
    %161 = vector.broadcast %160 : vector<128x1xf32> to vector<128x128xf32>
    %162 = arith.mulf %157, %161 : vector<128x128xf32>
    %163 = vector.shape_cast %142 : vector<128xf32> to vector<1x128xf32>
    %164 = vector.broadcast %163 : vector<1x128xf32> to vector<128x128xf32>
    %165 = arith.mulf %162, %164 : vector<128x128xf32>
    %166 = vector.shape_cast %144 : vector<128xf32> to vector<1x128xf32>
    %167 = vector.broadcast %166 : vector<1x128xf32> to vector<128x128xf32>
    %168 = arith.addf %165, %167 : vector<128x128xf32>
    %169 = arith.truncf %168 : vector<128x128xf32> to vector<128x128xbf16>
    %c0_54 = arith.constant 0 : index
    %c0_55 = arith.constant 0 : index
    %170 = vector.load %arg10[%c0_54, %c0_55] : memref<128x512xbf16, #tpu.memory_space<vmem>>, vector<128x512xbf16>
    %cst_56 = arith.constant dense<0.000000e+00> : vector<128x512xf32>
    %171 = tpu.matmul %169, %170, %cst_56 {dimension_numbers = #tpu.dot_dimension_numbers<[1], [0], [0], [1], [0, 0, 1, 1], [], []>} : vector<128x128xbf16>, vector<128x512xbf16>, vector<128x512xf32> -> vector<128x512xf32>
    %c0_57 = arith.constant 0 : index
    %c0_58 = arith.constant 0 : index
    %172 = vector.load %arg11[%c0_57, %c0_58] : memref<1x512xf32, #tpu.memory_space<vmem>>, vector<1x512xf32>
    %173 = vector.shape_cast %172 : vector<1x512xf32> to vector<512xf32>
    %174 = vector.shape_cast %173 : vector<512xf32> to vector<1x512xf32>
    %175 = vector.broadcast %174 : vector<1x512xf32> to vector<128x512xf32>
    %176 = arith.addf %171, %175 : vector<128x512xf32>
    %cst_59 = arith.constant 5.000000e-01 : f32
    %177 = vector.broadcast %cst_59 : f32 to vector<128x512xf32>
    %178 = arith.mulf %177, %176 : vector<128x512xf32>
    %cst_60 = arith.constant 4.471500e-02 : f32
    %179 = vector.broadcast %cst_60 : f32 to vector<128x512xf32>
    %180 = arith.mulf %179, %176 : vector<128x512xf32>
    %181 = arith.mulf %180, %176 : vector<128x512xf32>
    %182 = arith.mulf %181, %176 : vector<128x512xf32>
    %183 = arith.addf %176, %182 : vector<128x512xf32>
    %cst_61 = arith.constant 0.797884583 : f32
    %184 = vector.broadcast %cst_61 : f32 to vector<128x512xf32>
    %185 = arith.mulf %184, %183 : vector<128x512xf32>
    %186 = math.tanh %185 : vector<128x512xf32>
    %cst_62 = arith.constant 1.000000e+00 : f32
    %187 = vector.broadcast %cst_62 : f32 to vector<128x512xf32>
    %188 = arith.addf %187, %186 : vector<128x512xf32>
    %189 = arith.mulf %178, %188 : vector<128x512xf32>
    %190 = arith.truncf %189 : vector<128x512xf32> to vector<128x512xbf16>
    %c0_63 = arith.constant 0 : index
    %c0_64 = arith.constant 0 : index
    %191 = vector.load %arg12[%c0_63, %c0_64] : memref<512x128xbf16, #tpu.memory_space<vmem>>, vector<512x128xbf16>
    %cst_65 = arith.constant dense<0.000000e+00> : vector<128x128xf32>
    %192 = tpu.matmul %190, %191, %cst_65 {dimension_numbers = #tpu.dot_dimension_numbers<[1], [0], [0], [1], [0, 0, 1, 1], [], []>} : vector<128x512xbf16>, vector<512x128xbf16>, vector<128x128xf32> -> vector<128x128xf32>
    %c0_66 = arith.constant 0 : index
    %c0_67 = arith.constant 0 : index
    %193 = vector.load %arg13[%c0_66, %c0_67] : memref<1x128xf32, #tpu.memory_space<vmem>>, vector<1x128xf32>
    %194 = vector.shape_cast %193 : vector<1x128xf32> to vector<128xf32>
    %195 = vector.shape_cast %194 : vector<128xf32> to vector<1x128xf32>
    %196 = vector.broadcast %195 : vector<1x128xf32> to vector<128x128xf32>
    %197 = arith.addf %192, %196 : vector<128x128xf32>
    %198 = arith.addf %140, %197 : vector<128x128xf32>
    %c0_68 = arith.constant 0 : index
    %c0_69 = arith.constant 0 : index
    %c0_70 = arith.constant 0 : index
    %199 = vector.load %arg14[%c0_68, %c0_69, %c0_70] : memref<1x128x128xf32, #tpu.memory_space<vmem>>, vector<1x128x128xf32>
    %200 = vector.shape_cast %199 : vector<1x128x128xf32> to vector<128x128xf32>
    %201 = vector.shape_cast %198 : vector<128x128xf32> to vector<1x128x128xf32>
    tpu.vector_store %arg14[%c0_68, %c0_69, %c0_70], %201 {strides = array<i32>} : memref<1x128x128xf32, #tpu.memory_space<vmem>>, vector<1x128x128xf32>,
    return
  }
  func.func @transform_0(%arg0: i32) -> (i32, i32, i32) {
    %c0_i32 = arith.constant 0 : i32
    %c0_i32_0 = arith.constant 0 : i32
    %c0_i32_1 = arith.constant 0 : i32
    return %arg0, %c0_i32, %c0_i32_0 : i32, i32, i32
  }
  func.func @transform_1(%arg0: i32) -> (i32, i32) {
    %c0_i32 = arith.constant 0 : i32
    %c0_i32_0 = arith.constant 0 : i32
    %c0_i32_1 = arith.constant 0 : i32
    return %c0_i32, %c0_i32_0 : i32, i32
  }
  func.func @transform_2(%arg0: i32) -> (i32, i32) {
    %c0_i32 = arith.constant 0 : i32
    %c0_i32_0 = arith.constant 0 : i32
    %c0_i32_1 = arith.constant 0 : i32
    return %c0_i32, %c0_i32_0 : i32, i32
  }
  func.func @transform_3(%arg0: i32) -> (i32, i32) {
    %c0_i32 = arith.constant 0 : i32
    %c0_i32_0 = arith.constant 0 : i32
    %c0_i32_1 = arith.constant 0 : i32
    return %c0_i32, %c0_i32_0 : i32, i32
  }
  func.func @transform_4(%arg0: i32) -> (i32, i32) {
    %c0_i32 = arith.constant 0 : i32
    %c0_i32_0 = arith.constant 0 : i32
    %c0_i32_1 = arith.constant 0 : i32
    return %c0_i32, %c0_i32_0 : i32, i32
  }
  func.func @transform_5(%arg0: i32) -> (i32, i32) {
    %c0_i32 = arith.constant 0 : i32
    %c0_i32_0 = arith.constant 0 : i32
    %c0_i32_1 = arith.constant 0 : i32
    return %c0_i32, %c0_i32_0 : i32, i32
  }
  func.func @transform_6(%arg0: i32) -> (i32, i32) {
    %c0_i32 = arith.constant 0 : i32
    %c0_i32_0 = arith.constant 0 : i32
    %c0_i32_1 = arith.constant 0 : i32
    return %c0_i32, %c0_i32_0 : i32, i32
  }
  func.func @transform_7(%arg0: i32) -> (i32, i32) {
    %c0_i32 = arith.constant 0 : i32
    %c0_i32_0 = arith.constant 0 : i32
    %c0_i32_1 = arith.constant 0 : i32
    return %c0_i32, %c0_i32_0 : i32, i32
  }
  func.func @transform_8(%arg0: i32) -> (i32, i32) {
    %c0_i32 = arith.constant 0 : i32
    %c0_i32_0 = arith.constant 0 : i32
    %c0_i32_1 = arith.constant 0 : i32
    return %c0_i32, %c0_i32_0 : i32, i32
  }
  func.func @transform_9(%arg0: i32) -> (i32, i32) {
    %c0_i32 = arith.constant 0 : i32
    %c0_i32_0 = arith.constant 0 : i32
    %c0_i32_1 = arith.constant 0 : i32
    return %c0_i32, %c0_i32_0 : i32, i32
  }
  func.func @transform_10(%arg0: i32) -> (i32, i32) {
    %c0_i32 = arith.constant 0 : i32
    %c0_i32_0 = arith.constant 0 : i32
    %c0_i32_1 = arith.constant 0 : i32
    return %c0_i32, %c0_i32_0 : i32, i32
  }
  func.func @transform_11(%arg0: i32) -> (i32, i32) {
    %c0_i32 = arith.constant 0 : i32
    %c0_i32_0 = arith.constant 0 : i32
    %c0_i32_1 = arith.constant 0 : i32
    return %c0_i32, %c0_i32_0 : i32, i32
  }
  func.func @transform_12(%arg0: i32) -> (i32, i32) {
    %c0_i32 = arith.constant 0 : i32
    %c0_i32_0 = arith.constant 0 : i32
    %c0_i32_1 = arith.constant 0 : i32
    return %c0_i32, %c0_i32_0 : i32, i32
  }
  func.func @transform_13(%arg0: i32) -> (i32, i32, i32) {
    %c0_i32 = arith.constant 0 : i32
    %c0_i32_0 = arith.constant 0 : i32
    %c0_i32_1 = arith.constant 0 : i32
    return %arg0, %c0_i32, %c0_i32_0 : i32, i32, i32
  }
}

</mosaic_0001>

<bundles_post_ra>
// kernel: tpu_custom_call.1
= control target key start
LH: loop header
LB: loop body
LE: loop exit
PB: predicated region body
PF: predicated region fallthrough
CT: control target
= control target key end

     0   :  { %s10613_s0 = inlined_call_operand.hbm [shape: f32[2,128,128], index: 0, kind: input, shape index: {}]   ;;  %s10614_s1 = inlined_call_operand.hbm [shape: f32[1,128], index: 1, kind: input, shape index: {}]   ;;  %s10615_s2 = inlined_call_operand.hbm [shape: f32[1,128], index: 2, kind: input, shape index: {}]   ;;  %s10616_s3 = inlined_call_operand.hbm [shape: bf16[128,384], index: 3, kind: input, shape index: {}]   ;;  %s10617_s4 = inlined_call_operand.vmem [shape: f32[1,384], index: 4, kind: input, shape index: {}]   ;;  %s10618_s5 = inlined_call_operand.hbm [shape: bf16[128,128], index: 5, kind: input, shape index: {}]   ;;  %s10619_s6 = inlined_call_operand.vmem [shape: f32[1,128], index: 6, kind: input, shape index: {}]   ;;  %s10620_s7 = inlined_call_operand.vmem [shape: f32[1,128], index: 7, kind: input, shape index: {}]   ;;  %s10621_s8 = inlined_call_operand.vmem [shape: f32[1,128], index: 8, kind: input, shape index: {}]   ;;  %s10622_s9 = inlined_call_operand.hbm [shape: bf16[128,512], index: 9, kind: input, shape index: {}]   ;;  %s10623_s10 = inlined_call_operand.vmem [shape: f32[1,512], index: 10, kind: input, shape index: {}]   ;;  %s10624_s11 = inlined_call_operand.hbm [shape: bf16[512,128], index: 11, kind: input, shape index: {}]   ;;  %s10625_s12 = inlined_call_operand.vmem [shape: f32[1,128], index: 12, kind: input, shape index: {}]   ;;  %s10626_s13 = inlined_call_operand.hbm [shape: f32[2,128,128], index: 13, kind: output, shape index: {}]  }
   0x1   :  { %10719 = sst [smem:[#allocation58_spill]] %s10614_s1 }
   0x2   :  { %10720 = sst [smem:[#allocation59_spill]] %s10615_s2 }
   0x3   :  { %10721 = sst [smem:[#allocation60_spill]] %s10616_s3 }
   0x4   :  { %10722 = sst [smem:[#allocation61_spill]] %s10618_s5 }
   0x5   :  { %10723 = sst [smem:[#allocation62_spill]] %s10622_s9 }
   0x6   :  { %10724 = sst [smem:[#allocation63_spill]] %s10624_s11 }
   0x7   :  { %18 = vsyncpa [#allocation3], 0 }
   0x8   :  { %20 = vsyncpa [#allocation3 + $0x1], 0 }
   0x9   :  { %21 = vsyncpa [#allocation6], 0 }
   0xa   :  { %22 = vsyncpa [#allocation9], 0 }
   0xb   :  { %23 = vsyncpa [#allocation12], 0 }
   0xc   :  { %24 = vsyncpa [#allocation4], 0 }
   0xd   :  { %26 = vsyncpa [#allocation4 + $0x1], 0  ;;  %s7647_s25 = smov 0   ;;  %s7649_s26 = smov 0  }
   0xe   :  { %s7651_s27 = smov 0   ;;  %s7653_s28 = smov 0  }
   0xf LB: > { %s7554_s29 = smov [#allocation5]   ;;  %s7668_s14 = sadd.s32 4294967295, %s7552_s28   ;;  %s7552_s28 = sphi %s7653_s28, %s10938_s28   ;;  %s7548_s27 = sphi %s7651_s27, %s10937_s27   ;;  %s7544_s26 = sphi %s7649_s26, %s10936_s26   ;;  %s7540_s25 = sphi %s7647_s25, %s10935_s25  }
  0x10   : > { %s354_s30 = sshll.u32 %s7554_s29, 4  ;;  %p5680_p0 = scmp.ge.s32.totalorder %s7552_s28, 1  ;;  %s355_s30 = int_to_ptr.vmem [resolvable:$true] %s354_s30 }
  0x11   : > { %p10627_p1 = scmp.eq.s32.totalorder %s7668_s14, 0  ;;  %p341_p2 = scmp.lt.s32.totalorder %s7552_s28, 3 }
  0x12   : > { %s7555_s16 = smov [#allocation8]   ;;  %s7556_s19 = smov [#allocation11]  }
  0x13   : > { %p7673_p3 = pnand %p5680_p0, %p341_p2  ;;  %s375_s17 = sshll.u32 %s7555_s16, 4  ;;  %s7680_s17 = int_to_ptr.vmem [resolvable:$true] %s375_s17 }
  0x14   : > { %s413_s20 = sshll.u32 %s7556_s19, 4  ;;  %s7303_s22 = scalar_lea.vmem %s355_s30, 16  ;;  %s7688_s20 = int_to_ptr.vmem [resolvable:$true] %s413_s20 }
  0x15   : > { %s10725_s15 = scalar_select %p7673_p3, 1, 0 }
  0x16   : > { %p6613_p5 = pneg %p7673_p3  ;;  %p7304_p8 = scmp.ne.s32.totalorder %s355_s30, %s7303_s22 }
  0x17   : > { %s7310_s23 = scalar_lea.vmem %s355_s30, 32  ;;  %p7311_p11 = scmp.lt.s32.totalorder %s355_s30, %s355_s30 }
  0x18   : > { %p7684_p6 = pnand %p6613_p5, %p10627_p1  ;;  %p7312_p12 = scmp.lt.s32.totalorder %s7310_s23, %s7303_s22 }
  0x1a   : > { %p7692_p7 = pneg %p7684_p6  ;;  %p7313_p13 = por %p7312_p12, %p7311_p11 }
  0x1c   : > { %p7306_p9 = pnand %p7304_p8, %p7692_p7 }
  0x1e   : > { %p7307_p10 = pneg %p7306_p9 }
  0x20   : > { %p7314_p0 = pnand %p7313_p13, %p7307_p10 }
  0x22   : > { %7317 = shalt.err (!%p7314_p0)
}
  0x23   : > { %s10728_s1 = sld [smem:[#allocation58_spill]]  ;;  %s7329_s16 = scalar_lea.vmem %s7680_s17, 3072 }
  0x24   : > { %p7330_p2 = scmp.ne.s32.totalorder %s7680_s17, %s7329_s16  ;;  %p7337_p9 = scmp.lt.s32.totalorder %s7680_s17, %s7680_s17 }
  0x25   : > { %p7338_p11 = scmp.lt.s32.totalorder %s7329_s16, %s7329_s16 }
  0x26   : > { %p7332_p5 = pnand %p7330_p2, %p7692_p7 }
  0x27   : > { %p7339_p10 = por %p7338_p11, %p7337_p9 }
  0x28   : > { %p7333_p8 = pneg %p7332_p5 }
  0x29   : > { %6616 = dma.hbm_to_vmem [thread:$0]  (!%p7684_p6), %s10728_s1, 16, %s355_s30, [#allocation6]  }
  0x2a   : > { %p7340_p12 = pnand %p7339_p10, %p7333_p8 }
  0x2c   : > { %7343 = shalt.err (!%p7340_p12)
}
  0x2d   : > { %s7557_s19 = smov 192   ;;  %s7558_s22 = smov 12  }
  0x2e   : > { %s10729_s3 = sld [smem:[#allocation60_spill]]  ;;  %s7355_s24 = scalar_lea.vmem %s7688_s20, 4096 }
  0x2f   : > { %p7356_p13 = scmp.ne.s32.totalorder %s7688_s20, %s7355_s24  ;;  %p7363_p5 = scmp.lt.s32.totalorder %s7688_s20, %s7688_s20 }
  0x30   : > { %p7364_p8 = scmp.lt.s32.totalorder %s7355_s24, %s7355_s24 }
  0x31   : > { %p7358_p0 = pnand %p7356_p13, %p7692_p7 }
  0x32   : > { %p7365_p9 = por %p7364_p8, %p7363_p5 }
  0x33   : > { %p7359_p2 = pneg %p7358_p0 }
  0x34   : > { %6622 = dma.hbm_to_vmem [thread:$0]  (!%p7684_p6), %s10729_s3, 3072, %s7680_s17, [#allocation9], %s7557_s19, %s7557_s19, %s7558_s22  }
  0x35   : > { %p7366_p11 = pnand %p7365_p9, %p7359_p2 }
  0x37   : > { %7369 = shalt.err (!%p7366_p11)
}
  0x38   : > { %s7559_s29 = smov 256   ;;  %s7560_s16 = smov 16  }
  0x39   : > { %s10730_s9 = sld [smem:[#allocation62_spill]]  ;;  %s7561_s17 = smov [#allocation7]  }
  0x3a   : > { %s365_s19 = sshll.u32 %s7561_s17, 4  ;;  %s7562_s22 = smov [#allocation10]   ;;  %s366_s19 = int_to_ptr.vmem [resolvable:$true] %s365_s19 }
  0x3b   : > { %s391_s23 = sshll.u32 %s7562_s22, 4  ;;  %s7381_s3 = scalar_lea.vmem %s366_s19, 16  ;;  %s392_s23 = int_to_ptr.vmem [resolvable:$true] %s391_s23 }
  0x3c   : > { %p7382_p10 = scmp.ne.s32.totalorder %s366_s19, %s7381_s3  ;;  %s7388_s24 = scalar_lea.vmem %s366_s19, 32 }
  0x3d   : > { %p7389_p0 = scmp.lt.s32.totalorder %s366_s19, %s366_s19  ;;  %p7390_p2 = scmp.lt.s32.totalorder %s7388_s24, %s7381_s3 }
  0x3e   : > { %p7384_p12 = pnand %p7382_p10, %p7692_p7 }
  0x3f   : > { %6628 = dma.hbm_to_vmem [thread:$0]  (!%p7684_p6), %s10730_s9, 4096, %s7688_s20, [#allocation12], %s7559_s29, %s7559_s29, %s7560_s16  }
  0x40   : > { %p7385_p13 = pneg %p7384_p12  ;;  %p7391_p5 = por %p7390_p2, %p7389_p0 }
  0x42   : > { %p7392_p8 = pnand %p7391_p5, %p7385_p13 }
  0x44   : > { %7395 = shalt.err (!%p7392_p8)
}
  0x45   : > { %s10731_s2 = sld [smem:[#allocation59_spill]]  ;;  %s7407_s29 = scalar_lea.vmem %s392_s23, 1024 }
  0x46   : > { %p7408_p9 = scmp.ne.s32.totalorder %s392_s23, %s7407_s29  ;;  %p7415_p12 = scmp.lt.s32.totalorder %s392_s23, %s392_s23 }
  0x47   : > { %p7416_p4 = scmp.lt.s32.totalorder %s7407_s29, %s7407_s29 }
  0x48   : > { %p7410_p11 = pnand %p7408_p9, %p7692_p7 }
  0x49   : > { %p7417_p1 = por %p7416_p4, %p7415_p12 }
  0x4a   : > { %p7411_p10 = pneg %p7410_p11 }
  0x4b   : > { %6619 = dma.hbm_to_vmem [thread:$0]  (!%p7684_p6), %s10731_s2, 16, %s366_s19, [#allocation6]  }
  0x4c   : > { %p7418_p3 = pnand %p7417_p1, %p7411_p10 }
  0x4e   : > { %7421 = shalt.err (!%p7418_p3)
}
  0x4f   : > { %s7563_s3 = smov 64   ;;  %s7564_s16 = smov 4  }
  0x50   : > { %s10732_s5 = sld [smem:[#allocation61_spill]]  ;;  %s7565_s19 = smov [#allocation13]  }
  0x51   : > { %s429_s22 = sshll.u32 %s7565_s19, 4  ;;  %s430_s22 = int_to_ptr.vmem [resolvable:$true] %s429_s22 }
  0x52   : > { %s7433_s24 = scalar_lea.vmem %s430_s22, 4096  ;;  %p7441_p4 = scmp.lt.s32.totalorder %s430_s22, %s430_s22 }
  0x53   : > { %p7434_p13 = scmp.ne.s32.totalorder %s430_s22, %s7433_s24  ;;  %p7442_p1 = scmp.lt.s32.totalorder %s7433_s24, %s7433_s24 }
  0x55   : > { %p7436_p0 = pnand %p7434_p13, %p7692_p7  ;;  %p7443_p3 = por %p7442_p1, %p7441_p4 }
  0x56   : > { %6625 = dma.hbm_to_vmem [thread:$0]  (!%p7684_p6), %s10732_s5, 1024, %s392_s23, [#allocation9], %s7563_s3, %s7563_s3, %s7564_s16  }
  0x57   : > { %p7437_p2 = pneg %p7436_p0 }
  0x59   : > { %p7444_p5 = pnand %p7443_p3, %p7437_p2 }
  0x5b   : > { %7447 = shalt.err (!%p7444_p5)
}
  0x5c   : > { %s10733_s11 = sld [smem:[#allocation63_spill]]  ;;  %s5679_s21 = sadd.s32 4294967294, %s7552_s28  }
  0x5d   : > { %s7750_s18 = sadd.s32 1, %s7552_s28   ;;  %s39_s29 = sadd.s32 1, %s7548_s27 }
  0x5e   : > { %s36_s23 = ssub.s32 %s7552_s28, %s7750_s18  ;;  %p46_p8 = scmp.ne.s32.totalorder %s7548_s27, %s7544_s26 }
  0x5f   : > { %p37_p7 = scmp.eq.s32.totalorder %s36_s23, 0  ;;  %p47_p9 = scmp.eq.s32.totalorder %s7552_s28, 0 }
  0x60   : > { %p52_p11 = scmp.ne.s32.totalorder %s7544_s26, %s7540_s25  ;;  %p10736_p12 = scmp.eq.s32.totalorder %s7668_s14, 0 }
  0x61   : > { %s7761_s30 = scalar_select %p37_p7, %s7548_s27, %s39_s29  }
  0x62   : > { %6631 = dma.hbm_to_vmem [thread:$0]  (!%p7684_p6), %s10733_s11, 4096, %s430_s22, [#allocation12], %s7563_s3, %s7563_s3, %s7564_s16  }
  0x63   : > { %10734 = sst [smem:[#allocation20_spill]] %s7761_s30  ;;  %p7763_p10 = por %p47_p9, %p46_p8 }
  0x64   : > { %p7769_p6 = por %p10736_p12, %p52_p11  ;;  %p328_p13 = scmp.eq.s32.totalorder %s7668_s14, 1 }
  0x65   : > { %p334_p0 = scmp.eq.s32.totalorder %s5679_s21, 1  ;;  %p6646_p2 = scmp.lt.s32.totalorder %s7552_s28, 2 }
  0x66   : > { %s10737_s3 = scalar_select %p7769_p6, 1, 0 }
  0x67   : > { %s446_s16 = sand.u32 1, %s7548_s27   ;;  %p7776_p4 = por %p328_p13, %p46_p8 }
  0x68   : > { %p7780_p1 = por %p334_p0, %p52_p11  ;;  %s5688_s24 = sshll.u32 %s446_s16, 7 }
  0x69   : > { %s10738_s19 = scalar_select %p7776_p4, 1, 0 }
  0x6a   : > { %s10739_s22 = scalar_select %p7780_p1, 1, 0 }
  0x6b   : > { %s5871_s1 = sshll.u32 %s7552_s28, 11  ;;  %s450_s21 = scalar_lea.vmem [#allocation2], %s5688_s24 }
  0x6c   : > { %s7788_s29 = scalar_lea.hbm %s10613_s0, %s5871_s1  ;;  %s457_s2 = sshll.u32 %s450_s21, 4  ;;  %s7790_s2 = int_to_ptr.vmem [resolvable:$true] %s457_s2 }
  0x6d   : > { %p7794_p3 = pnand %p6646_p2, %p7763_p10  ;;  %s7798_s9 = scalar_lea.sflag [#allocation3], %s446_s16 }
  0x6e   : > { %s7448_s11 = scalar_lea.hbm %s7788_s29, 2048  ;;  %s7453_s24 = scalar_lea.hbm %s10613_s0, 4096 }
  0x6f   : > { %p7449_p5 = scmp.ne.s32.totalorder %s7788_s29, %s7448_s11  ;;  %p7450_p7 = pneg %p7794_p3 }
  0x70   : > { %p7454_p11 = scmp.lt.s32.totalorder %s7788_s29, %s10613_s0  ;;  %p7455_p10 = scmp.lt.s32.totalorder %s7453_s24, %s7448_s11 }
  0x71   : > { %p7451_p8 = pnand %p7450_p7, %p7449_p5 }
  0x72   : > { %p7456_p12 = por %p7455_p10, %p7454_p11 }
  0x73   : > { %p7452_p9 = pneg %p7451_p8 }
  0x75   : > { %p7457_p13 = pnand %p7456_p12, %p7452_p9 }
  0x77   : > { %7460 = shalt.err (!%p7457_p13)
}
  0x78   : > { %s7461_s17 = scalar_lea.vmem %s7790_s2, 2048  ;;  %s7566_s16 = smov [#allocation2]  }
  0x79   : > { %p7462_p0 = scmp.ne.s32.totalorder %s7790_s2, %s7461_s17  ;;  %s7466_s30 = sshll.u32 %s7566_s16, 4  ;;  %s7467_s30 = int_to_ptr.vmem [resolvable:$false] %s7466_s30 }
  0x7a   : > { %s7468_s1 = scalar_lea.vmem %s7467_s30, 4096  ;;  %p7469_p8 = scmp.lt.s32.totalorder %s7790_s2, %s7467_s30 }
  0x7b   : > { %p7464_p2 = pnand %p7462_p0, %p7450_p7  ;;  %p7470_p1 = scmp.lt.s32.totalorder %s7468_s1, %s7461_s17 }
  0x7d   : > { %p7465_p5 = pneg %p7464_p2  ;;  %p7471_p4 = por %p7470_p1, %p7469_p8 }
  0x7f   : > { %p7472_p6 = pnand %p7471_p4, %p7465_p5 }
  0x81   : > { %7475 = shalt.err (!%p7472_p6)
}
  0x82   : > { %s7567_s11 = smov 128   ;;  %s7568_s20 = smov 8  }
  0x83   : > { %6635 = dma.hbm_to_vmem [thread:$0]  (!%p7794_p3), %s7788_s29, 2048, %s7790_s2, %s7798_s9, %s7567_s11, %s7567_s11, %s7568_s20  }
  0x84   : > { %p10741_p7 = scmp.ne.s32.totalorder %s10725_s15, 0 }
  0x86   : > { %469 = sbr.rel (%p10741_p7) target bundleno = 3287 (0xcd7), region = 72 }
  0x8b   : > { %s7822_s24 = sand.u32 1, %s7544_s26   ;;  %p10742_p6 = scmp.ne.s32.totalorder %s10737_s3, 0 }
  0x8c   : > { %s5692_s30 = sshll.u32 %s7822_s24, 7  ;;  %s472_s23 = scalar_lea.sflag [#allocation3], %s7822_s24 }
  0x8d   : > { %s7828_s21 = scalar_lea.vmem [#allocation2], %s5692_s30 }
  0x8e   : > { %7519 = dma.done.wait (%p10742_p6), %s472_s23, 2048  }
  0x8f   : > { %7521 = vsyncadd (%p10742_p6), %s472_s23, 4294965248  ;;  %p10743_p4 = scmp.eq.s32.totalorder %s7668_s14, 0 }
  0x91   : > { %7523 = dma.done.wait (%p10743_p4), [#allocation6], 32   ;;  %p10744_p1 = pmov %p10743_p4 }
  0x93   : > { %7525 = vsyncadd (%p10744_p1), [#allocation6], 4294967264  ;;  %p10745_p3 = pmov %p10744_p1 }
  0x94   : > { %p10746_p9 = pmov %p10744_p1 }
  0x95   : > { %7527 = dma.done.wait (%p10745_p3), [#allocation9], 4096  }
  0x96   : > { %7529 = vsyncadd (%p10746_p9), [#allocation9], 4294963200  ;;  %p10747_p11 = pmov %p10744_p1 }
  0x97   : > { %p10748_p10 = pmov %p10744_p1 }
  0x98   : > { %7531 = dma.done.wait (%p10747_p11), [#allocation12], 8192  }
  0x99   : > { %7533 = vsyncadd (%p10748_p10), [#allocation12], 4294959104  ;;  %v7847_v0 = vld [vmem:[%s7828_s21] sm:$0xff]  ;;  %v7850_v1 = vld [vmem:[%s7828_s21 + $0x8] sm:$0xff]  ;;  %v10634_v48 = vmov 0   ;;  %vm1323_vm0 = vcmask 261120  }
  0x9a   : > { %561 = vadd.xlane.f32.xlu0 %v7847_v0  ;;  %v610_v2 = vmul.f32 %v7847_v0, %v7847_v0  ;;  %v611_v3 = vmul.f32 %v7850_v1, %v7850_v1  ;;  %v7859_v4 = vld [vmem:[%s7828_s21 + $0x10] sm:$0xff]  ;;  %v7862_v5 = vld [vmem:[%s7828_s21 + $0x18] sm:$0xff]  ;;  %v7871_v9 = vld [vmem:[%s7828_s21 + $0x20] sm:$0xff]  ;;  %1031 = vmatprep.mubr.bf16.mxu0 %v10634_v48  ;;  %s7570_s9 = smov 96   ;;  %s7572_s15 = smov 64  }
  0x9b   : > { %v612_v6 = vmul.f32 %v7859_v4, %v7859_v4  ;;  %v613_v7 = vmul.f32 %v7862_v5, %v7862_v5  ;;  %v6707_v8 = vld [vmem:[#allocation8 + $0xac] ss:$12 sps:$4 sm:$0xff]   ;;  %v6709_v10 = vld [vmem:[#allocation8 + $0xa8] ss:$12 sps:$4 sm:$0xff]   ;;  %v6712_v13 = vld [vmem:[#allocation8 + $0x90] ss:$12 sps:$4 sm:$0xff]   ;;  %v614_v14 = vmul.f32 %v7871_v9, %v7871_v9 }
  0x9c   : > { %626 = vadd.xlane.f32.xlu1 %v610_v2  ;;  %999 = vmatprep.subr.bf16.mxu0 %v6707_v8  ;;  %v7874_v11 = vld [vmem:[%s7828_s21 + $0x28] sm:$0xff]  ;;  %v6710_v12 = vld [vmem:[#allocation8 + $0x94] ss:$12 sps:$4 sm:$0xff]   ;;  %v6715_v17 = vld [vmem:[#allocation8 + $0xb0] ss:$12 sps:$4 sm:$0xff]   ;;  %s7573_s3 = smov 32  }
  0x9d   : > { %1000 = vmatpush1.bf16.msra.mxu0 %v6709_v10  ;;  %v615_v15 = vmul.f32 %v7874_v11, %v7874_v11  ;;  %v6713_v16 = vld [vmem:[#allocation8 + $0x7c] ss:$12 sps:$4 sm:$0xff]   ;;  %v7883_v18 = vld [vmem:[%s7828_s21 + $0x30] sm:$0xff]  ;;  %v6716_v19 = vld [vmem:[#allocation8 + $0x78] ss:$12 sps:$4 sm:$0xff]   ;;  %6185 = vmatprep.subr.bf16.mxu1 %v6715_v17  ;;  %s5536_s11 = scalar_lea.sflag [#allocation4], %s7822_s24 }
  0x9e   : > { %563 = vadd.xlane.f32.xlu0 %v7850_v1  ;;  %1001 = vmatprep.subr.bf16.mxu0 %v6710_v12  ;;  %v7886_v20 = vld [vmem:[%s7828_s21 + $0x38] sm:$0xff]  ;;  %v6717_v21 = vld [vmem:[#allocation8 + $0x64] ss:$12 sps:$4 sm:$0xff]   ;;  %v6720_v23 = vld [vmem:[#allocation8 + $0x60] ss:$12 sps:$4 sm:$0xff]   ;;  %v616_v24 = vmul.f32 %v7883_v18, %v7883_v18  ;;  %p10931_p13 = scmp.ne.s32.totalorder %s10738_s19, 0 }
  0x9f   : > { %6186 = vmatpush3.bf16.msra.mxu1 %v6715_v17  ;;  %v6719_v22 = vld [vmem:[#allocation8 + $0x98] ss:$12 sps:$4 sm:$0xff]   ;;  %v617_v25 = vmul.f32 %v7886_v20, %v7886_v20  ;;  %v7895_v26 = vld [vmem:[%s7828_s21 + $0x40] sm:$0xff]  ;;  %v6724_v29 = vld [vmem:[#allocation8 + $0x48] ss:$12 sps:$4 sm:$0xff]  }
  0xa0   : > { %628 = vadd.xlane.f32.xlu1 %v611_v3  ;;  %6187 = vmatprep.subr.bf16.mxu1 %v6719_v22  ;;  %v6721_v27 = vld [vmem:[#allocation8 + $0x4c] ss:$12 sps:$4 sm:$0xff]   ;;  %v7898_v30 = vld [vmem:[%s7828_s21 + $0x48] sm:$0xff]  ;;  %v6725_v31 = vld [vmem:[#allocation8 + $0x34] ss:$12 sps:$4 sm:$0xff]   ;;  %v618_v33 = vmul.f32 %v7895_v26, %v7895_v26 }
  0xa1   : > { %1002 = vmatpush1.bf16.msra.mxu0 %v6712_v13  ;;  %v6723_v28 = vld [vmem:[#allocation8 + $0x80] ss:$12 sps:$4 sm:$0xff]   ;;  %v6727_v32 = vld [vmem:[#allocation8 + $0x68] ss:$12 sps:$4 sm:$0xff]   ;;  %v6728_v34 = vld [vmem:[#allocation8 + $0x30] ss:$12 sps:$4 sm:$0xff]   ;;  %v619_v35 = vmul.f32 %v7898_v30, %v7898_v30 }
  0xa2   : > { %565 = vadd.xlane.f32.xlu0 %v7859_v4  ;;  %1003 = vmatprep.subr.bf16.mxu0 %v6713_v16  ;;  %v6729_v36 = vld [vmem:[#allocation8 + $0x1c] ss:$12 sps:$4 sm:$0xff]   ;;  %v7907_v38 = vld [vmem:[%s7828_s21 + $0x50] sm:$0xff]  ;;  %v6732_v39 = vld [vmem:[#allocation8 + $0x18] ss:$12 sps:$4 sm:$0xff]  }
  0xa3   : > { %6188 = vmatpush3.bf16.msra.mxu1 %v6719_v22  ;;  %v6731_v37 = vld [vmem:[#allocation8 + $0x50] ss:$12 sps:$4 sm:$0xff]   ;;  %v7910_v40 = vld [vmem:[%s7828_s21 + $0x58] sm:$0xff]  ;;  %v620_v43 = vmul.f32 %v7907_v38, %v7907_v38  ;;  %v6736_v44 = vld [vmem:[#allocation8] ss:$12 sps:$4 sm:$0xff]  }
  0xa4   : > { %567 = vadd.xlane.f32.xlu1 %v7862_v5  ;;  %6189 = vmatprep.subr.bf16.mxu1 %v6723_v28  ;;  %v6733_v41 = vld [vmem:[#allocation8 + $0x4] ss:$12 sps:$4 sm:$0xff]   ;;  %v621_v45 = vmul.f32 %v7910_v40, %v7910_v40  ;;  %v7919_v46 = vld [vmem:[%s7828_s21 + $0x60] sm:$0xff]  ;;  %v6738_v50 = vld [vmem:[#allocation8 + $0x8] ss:$12 sps:$4 sm:$0xff]  }
  0xa5   : > { %1004 = vmatpush1.bf16.msra.mxu0 %v6716_v19  ;;  %v6735_v42 = vld [vmem:[#allocation8 + $0x38] ss:$12 sps:$4 sm:$0xff]   ;;  %v6737_v47 = vld [vmem:[#allocation8 + $0x20] ss:$12 sps:$4 sm:$0xff]   ;;  %v622_v51 = vmul.f32 %v7919_v46, %v7919_v46 }
  0xa6   : > { %630 = vadd.xlane.f32.xlu0 %v612_v6  ;;  %1005 = vmatprep.subr.bf16.mxu0 %v6717_v21  ;;  %v7923_v49 = vld [vmem:[%s7828_s21 + $0x68] sm:$0xff]  ;;  %v7932_v53 = vld [vmem:[%s7828_s21 + $0x70] sm:$0xff]  ;;  %v7935_v54 = vld [vmem:[%s7828_s21 + $0x78] sm:$0xff] }
  0xa7   : > { %6190 = vmatpush3.bf16.msra.mxu1 %v6723_v28  ;;  %v623_v52 = vmul.f32 %v7923_v49, %v7923_v49  ;;  %v624_v55 = vmul.f32 %v7932_v53, %v7932_v53  ;;  %v625_v56 = vmul.f32 %v7935_v54, %v7935_v54 }
  0xa8   : > { %632 = vadd.xlane.f32.xlu1 %v613_v7  ;;  %6191 = vmatprep.subr.bf16.mxu1 %v6727_v32 }
  0xa9   : > { %1006 = vmatpush1.bf16.msra.mxu0 %v6720_v23 }
  0xaa   : > { %569 = vadd.xlane.f32.xlu0 %v7871_v9  ;;  %1007 = vmatprep.subr.bf16.mxu0 %v6721_v27 }
  0xab   : > { %6192 = vmatpush3.bf16.msra.mxu1 %v6727_v32 }
  0xac   : > { %571 = vadd.xlane.f32.xlu1 %v7874_v11  ;;  %6193 = vmatprep.subr.bf16.mxu1 %v6731_v37 }
  0xad   : > { %1008 = vmatpush1.bf16.msra.mxu0 %v6724_v29 }
  0xae   : > { %634 = vadd.xlane.f32.xlu0 %v614_v14  ;;  %1009 = vmatprep.subr.bf16.mxu0 %v6725_v31 }
  0xaf   : > { %6194 = vmatpush3.bf16.msra.mxu1 %v6731_v37 }
  0xb0   : > { %636 = vadd.xlane.f32.xlu1 %v615_v15  ;;  %6195 = vmatprep.subr.bf16.mxu1 %v6735_v42 }
  0xb1   : > { %1010 = vmatpush1.bf16.msra.mxu0 %v6728_v34 }
  0xb2   : > { %573 = vadd.xlane.f32.xlu0 %v7883_v18  ;;  %1011 = vmatprep.subr.bf16.mxu0 %v6729_v36 }
  0xb3   : > { %6196 = vmatpush3.bf16.msra.mxu1 %v6735_v42 }
  0xb4   : > { %575 = vadd.xlane.f32.xlu1 %v7886_v20  ;;  %6197 = vmatprep.subr.bf16.mxu1 %v6737_v47 }
  0xb5   : > { %1012 = vmatpush1.bf16.msra.mxu0 %v6732_v39 }
  0xb6   : > { %638 = vadd.xlane.f32.xlu0 %v616_v24  ;;  %1013 = vmatprep.subr.bf16.mxu0 %v6733_v41 }
  0xb7   : > { %6198 = vmatpush3.bf16.msra.mxu1 %v6737_v47 }
  0xb8   : > { %640 = vadd.xlane.f32.xlu1 %v617_v25  ;;  %6199 = vmatprep.subr.bf16.mxu1 %v6738_v50 }
  0xb9   : > { %1014 = vmatpush1.bf16.msra.mxu0 %v6736_v44 }
  0xba   : > { %577 = vadd.xlane.f32.xlu0 %v7895_v26 }
  0xbb   : > { %6200 = vmatpush3.bf16.msra.mxu1 %v6738_v50 }
  0xbc   : > { %579 = vadd.xlane.f32.xlu1 %v7898_v30 }
  0xbe   : > { %642 = vadd.xlane.f32.xlu0 %v618_v33 }
  0xc0   : > { %644 = vadd.xlane.f32.xlu1 %v619_v35 }
  0xc2   : > { %581 = vadd.xlane.f32.xlu0 %v7907_v38 }
  0xc4   : > { %583 = vadd.xlane.f32.xlu1 %v7910_v40 }
  0xc6   : > { %646 = vadd.xlane.f32.xlu0 %v620_v43 }
  0xc8   : > { %648 = vadd.xlane.f32.xlu1 %v621_v45 }
  0xca   : > { %585 = vadd.xlane.f32.xlu0 %v7919_v46 }
  0xcc   : > { %587 = vadd.xlane.f32.xlu1 %v7923_v49 }
  0xce   : > { %650 = vadd.xlane.f32.xlu0 %v622_v51 }
  0xd0   : > { %652 = vadd.xlane.f32.xlu1 %v623_v52 }
  0xd2   : > { %589 = vadd.xlane.f32.xlu0 %v7932_v53 }
  0xd4   : > { %591 = vadd.xlane.f32.xlu1 %v7935_v54 }
  0xd6   : > { %654 = vadd.xlane.f32.xlu0 %v624_v55 }
  0xd8   : > { %656 = vadd.xlane.f32.xlu1 %v625_v56  ;;  %v7962_v56 = vld [vmem:[#allocation5] ss:$0 sm:$0xff] }
 0x123   : > { %v562_v57 = vpop.xlane.xlu0 %561 }
 0x124   : > { %v594_v58 = vmul.f32 0.0078125, %v562_v57 }
 0x125   : > { %v627_v59 = vpop.xlane.xlu1 %626 }
 0x126   : > { %v674_v60 = vmul.f32 %v594_v58, %v594_v58  ;;  %v658_v61 = vmul.f32 0.0078125, %v627_v59  ;;  %v706_v41 = vsub.f32 %v7847_v0, %v594_v58 }
 0x127   : > { %v564_v62 = vpop.xlane.xlu0 %563 }
 0x128   : > { %v690_v63 = vsub.f32 %v658_v61, %v674_v60  ;;  %v595_v2 = vmul.f32 0.0078125, %v564_v62 }
 0x129   : > { %v629_v3 = vpop.xlane.xlu1 %628 }
 0x12a   : > { %v722_v6 = vadd.f32 1e-05, %v690_v63  ;;  %v675_v7 = vmul.f32 %v595_v2, %v595_v2  ;;  %v659_v8 = vmul.f32 0.0078125, %v629_v3  ;;  %v707_v59 = vsub.f32 %v7850_v1, %v595_v2 }
 0x12b   : > { %v566_v10 = vpop.xlane.xlu0 %565 }
 0x12c   : > { %6827 = vrsqrt.f32 %v722_v6  ;;  %v691_v12 = vsub.f32 %v659_v8, %v675_v7  ;;  %v7943_v13 = vmul.f32 0.0078125, %v566_v10  ;;  %v7970_v7 = vld [vmem:[#allocation7] ss:$0 sm:$0xff] }
 0x12d   : > { %v568_v14 = vpop.xlane.xlu1 %567 }
 0x12e   : > { %v723_v15 = vadd.f32 1e-05, %v691_v12  ;;  %v676_v16 = vmul.f32 %v7943_v13, %v7943_v13  ;;  %v7947_v17 = vmul.f32 0.0078125, %v568_v14  ;;  %v708_v1 = vsub.f32 %v7859_v4, %v7943_v13 }
 0x12f   : > { %v631_v19 = vpop.xlane.xlu0 %630 }
 0x130   : > { %6829 = vrsqrt.f32 %v723_v15  ;;  %v660_v21 = vmul.f32 0.0078125, %v631_v19  ;;  %v677_v23 = vmul.f32 %v7947_v17, %v7947_v17  ;;  %v709_v4 = vsub.f32 %v7862_v5, %v7947_v17 }
 0x131   : > { %v633_v22 = vpop.xlane.xlu1 %632 }
 0x132   : > { %v692_v24 = vsub.f32 %v660_v21, %v676_v16  ;;  %v661_v25 = vmul.f32 0.0078125, %v633_v22 }
 0x133   : > { %v570_v27 = vpop.xlane.xlu0 %569 }
 0x134   : > { %v724_v28 = vadd.f32 1e-05, %v692_v24  ;;  %v693_v29 = vsub.f32 %v661_v25, %v677_v23  ;;  %v7951_v31 = vmul.f32 0.0078125, %v570_v27 }
 0x135   : > { %v572_v32 = vpop.xlane.xlu1 %571 }
 0x136   : > { %6831 = vrsqrt.f32 %v724_v28  ;;  %v725_v33 = vadd.f32 1e-05, %v693_v29  ;;  %v678_v34 = vmul.f32 %v7951_v31, %v7951_v31  ;;  %v7955_v35 = vmul.f32 0.0078125, %v572_v32 }
 0x137   : > { %v635_v36 = vpop.xlane.xlu0 %634 }
 0x138   : > { %6833 = vrsqrt.f32 %v725_v33  ;;  %v662_v37 = vmul.f32 0.0078125, %v635_v36  ;;  %v679_v43 = vmul.f32 %v7955_v35, %v7955_v35 }
 0x139   : > { %v6828_v39 = vpop.eup %6827  ;;  %v637_v42 = vpop.xlane.xlu1 %636 }
 0x13a   : > { %v694_v44 = vsub.f32 %v662_v37, %v678_v34  ;;  %v663_v45 = vmul.f32 0.0078125, %v637_v42  ;;  %v754_v50 = vmul.f32 %v6828_v39, %v706_v41  ;;  %v710_v41 = vsub.f32 %v7871_v9, %v7951_v31 }
 0x13b   : > { %v574_v47 = vpop.xlane.xlu0 %573  ;;  %v711_v9 = vsub.f32 %v7874_v11, %v7955_v35 }
 0x13c   : > { %v726_v51 = vadd.f32 1e-05, %v694_v44  ;;  %v695_v52 = vsub.f32 %v663_v45, %v679_v43  ;;  %v7960_v55 = vmul.f32 0.0078125, %v574_v47  ;;  %v776_v3 = vmul.f32 %v7962_v56, %v754_v50 }
 0x13d   : > { %v6830_v57 = vpop.eup %6829  ;;  %v576_v60 = vpop.xlane.xlu1 %575 }
 0x13e   : > { %6835 = vrsqrt.f32 %v726_v51  ;;  %v727_v0 = vadd.f32 1e-05, %v695_v52  ;;  %v680_v58 = vmul.f32 %v7960_v55, %v7960_v55  ;;  %v7967_v61 = vmul.f32 0.0078125, %v576_v60 }
 0x13f   : > { %v639_v62 = vpop.xlane.xlu0 %638  ;;  %v755_v63 = vmul.f32 %v6830_v57, %v707_v59  ;;  %v798_v19 = vadd.f32 %v7970_v7, %v776_v3 }
 0x140   : > { %6837 = vrsqrt.f32 %v727_v0  ;;  %v664_v6 = vmul.f32 0.0078125, %v639_v62  ;;  %v681_v2 = vmul.f32 %v7967_v61, %v7967_v61 }
 0x141   : > { %v641_v8 = vpop.xlane.xlu1 %640  ;;  %v777_v10 = vmul.f32 %v7962_v56, %v755_v63 }
 0x142   : > { %v696_v12 = vsub.f32 %v664_v6, %v680_v58  ;;  %v665_v14 = vmul.f32 0.0078125, %v641_v8 }
 0x143   : > { %v6832_v15 = vpop.eup %6831  ;;  %v578_v16 = vpop.xlane.xlu0 %577  ;;  %v799_v21 = vadd.f32 %v7970_v7, %v777_v10 }
 0x144   : > { %v728_v22 = vadd.f32 1e-05, %v696_v12  ;;  %v697_v23 = vsub.f32 %v665_v14, %v681_v2  ;;  %v7979_v24 = vmul.f32 0.0078125, %v578_v16  ;;  %v756_v25 = vmul.f32 %v6832_v15, %v708_v1 }
 0x145   : > { %v6834_v27 = vpop.eup %6833  ;;  %v580_v13 = vpop.xlane.xlu1 %579  ;;  %v814_v28 = vpack.c.bf16 %v799_v21, %v798_v19  ;;  %v712_v2 = vsub.f32 %v7883_v18, %v7960_v55  ;;  %v713_v18 = vsub.f32 %v7886_v20, %v7967_v61 }
 0x146   : > { %6839 = vrsqrt.f32 %v728_v22  ;;  %v729_v29 = vadd.f32 1e-05, %v697_v23  ;;  %v682_v32 = vmul.f32 %v7979_v24, %v7979_v24  ;;  %v7985_v33 = vmul.f32 0.0078125, %v580_v13 }
 0x147   : > { %1032 = vmatmul.mubr.bf16.vlgmr.msra.gmra.mxu0 %v814_v28  ;;  %6201 = vmatprep.mubr.bf16.mxu1 %v814_v28  ;;  %v643_v34 = vpop.xlane.xlu0 %642  ;;  %v757_v36 = vmul.f32 %v6834_v27, %v709_v4  ;;  %v778_v37 = vmul.f32 %v7962_v56, %v756_v25 }
 0x148   : > { %6841 = vrsqrt.f32 %v729_v29  ;;  %v666_v39 = vmul.f32 0.0078125, %v643_v34  ;;  %1041 = vmatprep.mubr.bf16.mxu0 %v10634_v48  ;;  %v683_v42 = vmul.f32 %v7985_v33, %v7985_v33 }
 0x149   : > { %v645_v5 = vpop.xlane.xlu1 %644  ;;  %v779_v17 = vmul.f32 %v7962_v56, %v757_v36  ;;  %v800_v50 = vadd.f32 %v7970_v7, %v778_v37 }
 0x14a   : > { %v698_v43 = vsub.f32 %v666_v39, %v682_v32  ;;  %v667_v44 = vmul.f32 0.0078125, %v645_v5 }
 0x14b   : > { %v6836_v45 = vpop.eup %6835  ;;  %v582_v47 = vpop.xlane.xlu0 %581  ;;  %v801_v51 = vadd.f32 %v7970_v7, %v779_v17  ;;  %v714_v17 = vsub.f32 %v7895_v26, %v7979_v24  ;;  %v715_v26 = vsub.f32 %v7898_v30, %v7985_v33 }
 0x14c   : > { %v730_v52 = vadd.f32 1e-05, %v698_v43  ;;  %v699_v57 = vsub.f32 %v667_v44, %v683_v42  ;;  %v7996_v59 = vmul.f32 0.0078125, %v582_v47  ;;  %v758_v60 = vmul.f32 %v6836_v45, %v710_v41 }
 0x14d   : > { %v6838_v0 = vpop.eup %6837  ;;  %v584_v31 = vpop.xlane.xlu1 %583  ;;  %v815_v58 = vpack.c.bf16 %v801_v51, %v800_v50 }
 0x14e   : > { %6843 = vrsqrt.f32 %v730_v52  ;;  %v731_v62 = vadd.f32 1e-05, %v699_v57  ;;  %v684_v63 = vmul.f32 %v7996_v59, %v7996_v59  ;;  %v8002_v3 = vmul.f32 0.0078125, %v584_v31 }
 0x14f   : > { %1042 = vmatmul.mubr.bf16.gmra.mxu0 %v815_v58  ;;  %6202 = vmatmul.mubr.bf16.vlgmr.msra.gmra.mxu1 %v815_v58  ;;  %v647_v6 = vpop.xlane.xlu0 %646  ;;  %v759_v8 = vmul.f32 %v6838_v0, %v711_v9  ;;  %v780_v10 = vmul.f32 %v7962_v56, %v758_v60  ;;  %v716_v33 = vsub.f32 %v7907_v38, %v7996_v59 }
 0x150   : > { %6845 = vrsqrt.f32 %v731_v62  ;;  %v668_v1 = vmul.f32 0.0078125, %v647_v6  ;;  %1051 = vmatprep.mubr.bf16.mxu0 %v10634_v48  ;;  %v685_v12 = vmul.f32 %v8002_v3, %v8002_v3 }
 0x151   : > { %v649_v11 = vpop.xlane.xlu1 %648  ;;  %v781_v35 = vmul.f32 %v7962_v56, %v759_v8  ;;  %v802_v21 = vadd.f32 %v7970_v7, %v780_v10 }
 0x152   : > { %v700_v14 = vsub.f32 %v668_v1, %v684_v63  ;;  %v669_v15 = vmul.f32 0.0078125, %v649_v11 }
 0x153   : > { %v6840_v16 = vpop.eup %6839  ;;  %v586_v19 = vpop.xlane.xlu0 %585  ;;  %v803_v22 = vadd.f32 %v7970_v7, %v781_v35 }
 0x154   : > { %v732_v23 = vadd.f32 1e-05, %v700_v14  ;;  %v701_v25 = vsub.f32 %v669_v15, %v685_v12  ;;  %v8013_v27 = vmul.f32 0.0078125, %v586_v19  ;;  %v760_v4 = vmul.f32 %v6840_v16, %v712_v2 }
 0x155   : > { %v6842_v13 = vpop.eup %6841  ;;  %v588_v55 = vpop.xlane.xlu1 %587  ;;  %v816_v28 = vpack.c.bf16 %v803_v22, %v802_v21  ;;  %v717_v16 = vsub.f32 %v7910_v40, %v8002_v3 }
 0x156   : > { %6847 = vrsqrt.f32 %v732_v23  ;;  %v733_v29 = vadd.f32 1e-05, %v701_v25  ;;  %v686_v32 = vmul.f32 %v8013_v27, %v8013_v27  ;;  %v8019_v34 = vmul.f32 0.0078125, %v588_v55 }
 0x157   : > { %1052 = vmatmul.mubr.bf16.gmra.mxu0 %v816_v28  ;;  %6205 = vmatprep.mubr.bf16.mxu1 %v816_v28  ;;  %v651_v36 = vpop.xlane.xlu0 %650  ;;  %v761_v37 = vmul.f32 %v6842_v13, %v713_v18  ;;  %v782_v39 = vmul.f32 %v7962_v56, %v760_v4  ;;  %v718_v40 = vsub.f32 %v7919_v46, %v8013_v27 }
 0x158   : > { %6849 = vrsqrt.f32 %v733_v29  ;;  %v670_v5 = vmul.f32 0.0078125, %v651_v36  ;;  %1061 = vmatprep.mubr.bf16.mxu0 %v10634_v48  ;;  %v687_v41 = vmul.f32 %v8019_v34, %v8019_v34  ;;  %v719_v28 = vsub.f32 %v7923_v49, %v8019_v34 }
 0x159   : > { %v653_v20 = vpop.xlane.xlu1 %652  ;;  %v783_v61 = vmul.f32 %v7962_v56, %v761_v37  ;;  %v804_v47 = vadd.f32 %v7970_v7, %v782_v39 }
 0x15a   : > { %v702_v42 = vsub.f32 %v670_v5, %v686_v32  ;;  %v671_v43 = vmul.f32 0.0078125, %v653_v20 }
 0x15b   : > { %v6844_v44 = vpop.eup %6843  ;;  %v590_v45 = vpop.xlane.xlu0 %589  ;;  %v805_v50 = vadd.f32 %v7970_v7, %v783_v61 }
 0x15c   : > { %v734_v51 = vadd.f32 1e-05, %v702_v42  ;;  %v703_v52 = vsub.f32 %v671_v43, %v687_v41  ;;  %v8030_v57 = vmul.f32 0.0078125, %v590_v45  ;;  %v762_v60 = vmul.f32 %v6844_v44, %v714_v17 }
 0x15d   : > { %v6846_v0 = vpop.eup %6845  ;;  %v592_v24 = vpop.xlane.xlu1 %591  ;;  %v817_v9 = vpack.c.bf16 %v805_v50, %v804_v47 }
 0x15e   : > { %6851 = vrsqrt.f32 %v734_v51  ;;  %v735_v31 = vadd.f32 1e-05, %v703_v52  ;;  %v688_v58 = vmul.f32 %v8030_v57, %v8030_v57  ;;  %v609_v62 = vmul.f32 0.0078125, %v592_v24  ;;  %v8074_v52 = vld [vmem:[%s10617_s4] sm:$0x7] }
 0x15f   : > { %1062 = vmatmul.mubr.bf16.gmra.mxu0 %v817_v9  ;;  %6206 = vmatmul.mubr.bf16.gmra.mxu1 %v817_v9  ;;  %v655_v63 = vpop.xlane.xlu0 %654  ;;  %v763_v6 = vmul.f32 %v6846_v0, %v715_v26  ;;  %v784_v8 = vmul.f32 %v7962_v56, %v762_v60  ;;  %v720_v27 = vsub.f32 %v7932_v53, %v8030_v57 }
 0x160   : > { %6853 = vrsqrt.f32 %v735_v31  ;;  %v672_v10 = vmul.f32 0.0078125, %v655_v63  ;;  %1071 = vmatprep.mubr.bf16.mxu0 %v10634_v48  ;;  %v689_v11 = vmul.f32 %v609_v62, %v609_v62  ;;  %v721_v34 = vsub.f32 %v7935_v54, %v609_v62 }
 0x161   : > { %v657_v1 = vpop.xlane.xlu1 %656  ;;  %v785_v30 = vmul.f32 %v7962_v56, %v763_v6  ;;  %v806_v14 = vadd.f32 %v7970_v7, %v784_v8  ;;  %v856_v54 = vlaneseq }
 0x162   : > { %v704_v35 = vsub.f32 %v672_v10, %v688_v58  ;;  %v673_v2 = vmul.f32 0.0078125, %v657_v1 }
 0x163   : > { %v6848_v12 = vpop.eup %6847  ;;  %v807_v15 = vadd.f32 %v7970_v7, %v785_v30  ;;  %v8068_v50 = vshrl.u32 %v856_v54, 7 }
 0x164   : > { %v736_v19 = vadd.f32 1e-05, %v704_v35  ;;  %v705_v21 = vsub.f32 %v673_v2, %v689_v11  ;;  %v764_v22 = vmul.f32 %v6848_v12, %v716_v33 }
 0x165   : > { %v6850_v23 = vpop.eup %6849  ;;  %v818_v25 = vpack.c.bf16 %v807_v15, %v806_v14  ;;  %10749 = vst [vmem:[#allocation21_spill] sm:$0xff] %v8068_v50  ;;  %v10633_v51 = vsub.s32 0, %v8068_v50 }
 0x166   : > { %6855 = vrsqrt.f32 %v736_v19  ;;  %v737_v4 = vadd.f32 1e-05, %v705_v21  ;;  %v765_v13 = vmul.f32 %v6850_v23, %v717_v16  ;;  %v786_v38 = vmul.f32 %v7962_v56, %v764_v22 }
 0x167   : > { %1072 = vmatmul.mubr.bf16.gmra.mxu0 %v818_v25  ;;  %6209 = vmatprep.mubr.bf16.mxu1 %v818_v25 }
 0x168   : > { %6857 = vrsqrt.f32 %v737_v4  ;;  %1081 = vmatprep.mubr.bf16.mxu0 %v10634_v48  ;;  %v787_v59 = vmul.f32 %v7962_v56, %v765_v13  ;;  %v808_v3 = vadd.f32 %v7970_v7, %v786_v38 }
 0x16a   : > { %v809_v18 = vadd.f32 %v7970_v7, %v787_v59 }
 0x16b   : > { %v6852_v55 = vpop.eup %6851 }
 0x16c   : > { %v819_v29 = vpack.c.bf16 %v809_v18, %v808_v3  ;;  %v766_v32 = vmul.f32 %v6852_v55, %v718_v40 }
 0x16d   : > { %v6854_v36 = vpop.eup %6853 }
 0x16e   : > { %6210 = vmatmul.mubr.bf16.gmra.mxu1 %v819_v29  ;;  %v767_v37 = vmul.f32 %v6854_v36, %v719_v28  ;;  %v788_v39 = vmul.f32 %v7962_v56, %v766_v32 }
 0x16f   : > { %1082 = vmatmul.mubr.bf16.gmra.mxu0 %v819_v29 }
 0x170   : > { %1091 = vmatprep.mubr.bf16.mxu0 %v10634_v48  ;;  %v789_v46 = vmul.f32 %v7962_v56, %v767_v37  ;;  %v810_v5 = vadd.f32 %v7970_v7, %v788_v39 }
 0x172   : > { %v811_v20 = vadd.f32 %v7970_v7, %v789_v46 }
 0x173   : > { %v6856_v49 = vpop.eup %6855 }
 0x174   : > { %v820_v61 = vpack.c.bf16 %v811_v20, %v810_v5  ;;  %v768_v17 = vmul.f32 %v6856_v49, %v720_v27  ;;  %v10631_v5 = vsub.s32 1, %v8068_v50 }
 0x175   : > { %v6858_v41 = vpop.eup %6857 }
 0x176   : > { %6213 = vmatprep.mubr.bf16.mxu1 %v820_v61  ;;  %v769_v42 = vmul.f32 %v6858_v41, %v721_v34  ;;  %v790_v43 = vmul.f32 %v7962_v56, %v768_v17  ;;  %v10632_v41 = vsub.s32 2, %v8068_v50 }
 0x177   : > { %1092 = vmatmul.mubr.bf16.gmra.mxu0 %v820_v61  ;;  %v863_v61 = vrot.slane %v8074_v52, %v10631_v5 }
 0x178   : > { %1101 = vmatprep.mubr.bf16.mxu0 %v10634_v48  ;;  %v791_v44 = vmul.f32 %v7962_v56, %v769_v42  ;;  %v812_v53 = vadd.f32 %v7970_v7, %v790_v43  ;;  %v8079_v56 = vrot.slane %v8074_v52, %v10633_v51 }
 0x17a   : > { %v813_v45 = vadd.f32 %v7970_v7, %v791_v44 }
 0x17c   : > { %v821_v47 = vpack.c.bf16 %v813_v45, %v812_v53 }
 0x17e   : > { %6214 = vmatmul.mubr.bf16.gmra.mxu1 %v821_v47 }
 0x17f   : > { %1102 = vmatmul.mubr.bf16.gmra.mxu0 %v821_v47 }
 0x207   : > { %v1033_v7 = vpop.f32.mrf.mxu0 }
 0x208   : > { %v1034_v60 = vadd.f32 %v1033_v7, %v8079_v56 }
 0x209   : > { %v8081_v57 = vpop.f32.mrf.mxu0 }
 0x20a   : > { %v1209_v9 = vmul.f32 0.17677669, %v1034_v60 }
 0x20b   : > { %v1037_v0 = vpop.f32.mrf.mxu0 }
 0x20c   : > { %v1038_v26 = vadd.f32 %v1037_v0, %v8079_v56  ;;  %v8151_v0 = vrot.slane %v8074_v52, %v10632_v41 }
 0x20d   : > { %v8085_v24 = vpop.f32.mrf.mxu0 }
 0x20e   : > { %v1210_v31 = vmul.f32 0.17677669, %v1038_v26 }
 0x20f   : > { %v1043_v58 = vpop.f32.mrf.mxu0  ;;  %v8094_v10 = vpop.f32.mrf.mxu1 }
 0x210   : > { %v8087_v62 = vpack.c.bf16 %v1210_v31, %v1209_v9  ;;  %v1044_v63 = vadd.f32 %v1043_v58, %v8079_v56 }
 0x211   : > { %v8090_v6 = vpop.f32.mrf.mxu0  ;;  %v8101_v2 = vpop.f32.mrf.mxu1 }
 0x212   : > { %6233 = vmatprep.mubr.msk.bf16.mxu0 %vm1323_vm0, %v8087_v62  ;;  %v1211_v33 = vmul.f32 0.17677669, %v1044_v63 }
 0x213   : > { %v1047_v8 = vpop.f32.mrf.mxu0  ;;  %v8109_v16 = vpop.f32.mrf.mxu1 }
 0x214   : > { %v1048_v1 = vadd.f32 %v1047_v8, %v8079_v56 }
 0x215   : > { %v8097_v30 = vpop.f32.mrf.mxu0  ;;  %v8113_v22 = vpop.f32.mrf.mxu1 }
 0x216   : > { %v1212_v11 = vmul.f32 0.17677669, %v1048_v1 }
 0x217   : > { %v8099_v35 = vpop.f32.mrf.mxu0 }
 0x218   : > { %v8103_v12 = vpack.c.bf16 %v1212_v11, %v1211_v33 }
 0x219   : > { %v8105_v14 = vpop.f32.mrf.mxu0 }
 0x21b   : > { %v8107_v15 = vpop.f32.mrf.mxu0 }
 0x21d   : > { %v1059_v19 = vpop.f32.mrf.mxu0 }
 0x21f   : > { %v8111_v21 = vpop.f32.mrf.mxu0  ;;  %v8117_v25 = vpop.f32.mrf.mxu1 }
 0x221   : > { %v8115_v23 = vpop.f32.mrf.mxu0  ;;  %v8121_v38 = vpop.f32.mrf.mxu1 }
 0x223   : > { %v8119_v4 = vpop.f32.mrf.mxu0  ;;  %v8125_v3 = vpop.f32.mrf.mxu1 }
 0x225   : > { %v1069_v13 = vpop.f32.mrf.mxu0  ;;  %v8129_v28 = vpop.f32.mrf.mxu1 }
 0x227   : > { %v8123_v59 = vpop.f32.mrf.mxu0 }
 0x229   : > { %v1075_v40 = vpop.f32.mrf.mxu0 }
 0x22b   : > { %v8127_v18 = vpop.f32.mrf.mxu0 }
 0x22d   : > { %v1079_v55 = vpop.f32.mrf.mxu0 }
 0x22e   : > { %v6211_v32 = vpop.f32.mrf.mxu1  ;;  %v1080_v1 = vadd.f32 %v1079_v55, %v863_v61  ;;  %v1060_v55 = vadd.f32 %v1059_v19, %v863_v61 }
 0x22f   : > { %v8131_v29 = vpop.f32.mrf.mxu0 }
 0x230   : > { %v1178_v39 = vpop.f32.mrf.mxu1 }
 0x231   : > { %v1085_v36 = vpop.f32.mrf.mxu0 }
 0x232   : > { %v6212_v20 = vpop.f32.mrf.mxu1  ;;  %v1086_v9 = vadd.f32 %v1085_v36, %v863_v61 }
 0x233   : > { %v8133_v37 = vpop.f32.mrf.mxu0 }
 0x234   : > { %v1181_v17 = vpop.f32.mrf.mxu1 }
 0x235   : > { %v1089_v46 = vpop.f32.mrf.mxu0 }
 0x236   : > { %v1090_v47 = vadd.f32 %v1089_v46, %v863_v61 }
 0x237   : > { %v8135_v27 = vpop.f32.mrf.mxu0 }
 0x238   : > { %v8159_v33 = vpack.c.bf16 %v1090_v47, %v1086_v9  ;;  %v1070_v47 = vadd.f32 %v1069_v13, %v863_v61  ;;  %v1040_v13 = vadd.f32 %v8085_v24, %v863_v61  ;;  %v1036_v24 = vadd.f32 %v8081_v57, %v863_v61 }
 0x239   : > { %v1095_v49 = vpop.f32.mrf.mxu0 }
 0x23a   : > { %v1096_v43 = vadd.f32 %v1095_v49, %v863_v61  ;;  %10751 = vst [vmem:[#allocation23_spill] sm:$0xff] %v8159_v33  ;;  %v8216_v57 = vpack.c.bf16 %v1040_v13, %v1036_v24  ;;  %v1094_v13 = vadd.f32 %v8135_v27, %v8079_v56 }
 0x23b   : > { %v8138_v34 = vpop.f32.mrf.mxu0 }
 0x23d   : > { %v1099_v42 = vpop.f32.mrf.mxu0 }
 0x23e   : > { %v1100_v44 = vadd.f32 %v1099_v42, %v863_v61  ;;  %v6215_v53 = vpop.f32.mrf.mxu1  ;;  %v1076_v42 = vadd.f32 %v1075_v40, %v863_v61  ;;  %v1187_v40 = vadd.f32 %v6211_v32, %v8151_v0  ;;  %v1182_v32 = vadd.f32 %v1181_v17, %v8151_v0 }
 0x23f   : > { %v8144_v45 = vpop.f32.mrf.mxu0  ;;  %v1203_v58 = vadd.f32 %v6215_v53, %v8151_v0  ;;  %v1190_v53 = vadd.f32 %v6212_v20, %v8151_v0  ;;  %v1066_v20 = vadd.f32 %v8115_v23, %v863_v61  ;;  %v1046_v17 = vadd.f32 %v8090_v6, %v863_v61 }
 0x240   : > { %v8146_v7 = vpack.c.bf16 %v1100_v44, %v1096_v43  ;;  %v1194_v60 = vpop.f32.mrf.mxu1 }
 0x241   : > { %v1105_v26 = vpop.f32.mrf.mxu0  ;;  %v1195_v52 = vadd.f32 %v1194_v60, %v8151_v0  ;;  %v8171_v60 = vpack.c.bf16 %v1080_v1, %v1076_v42  ;;  %v1179_v1 = vadd.f32 %v1178_v39, %v8151_v0  ;;  %v1068_v39 = vadd.f32 %v8119_v4, %v8079_v56 }
 0x242   : > { %10750 = vst [vmem:[#allocation22_spill] sm:$0xff] %v8146_v7  ;;  %1923 = vrot.lane.b32.xlu1 %v8146_v7, %s7570_s9  ;;  %v6216_v31 = vpop.f32.mrf.mxu1  ;;  %v1106_v43 = vadd.f32 %v1105_v26, %v863_v61  ;;  %v1056_v26 = vadd.f32 %v8105_v14, %v863_v61  ;;  %v1050_v14 = vadd.f32 %v8097_v30, %v863_v61 }
 0x243   : > { %v8156_v63 = vpop.f32.mrf.mxu0  ;;  %v1206_v8 = vadd.f32 %v6216_v31, %v8151_v0  ;;  %v1058_v30 = vadd.f32 %v8107_v15, %v8079_v56  ;;  %v1054_v15 = vadd.f32 %v8099_v35, %v8079_v56  ;;  %v1171_v4 = vadd.f32 %v8117_v25, %v8151_v0 }
 0x244   : > { %v1197_v11 = vpop.f32.mrf.mxu1  ;;  %v8193_v23 = vpack.c.bf16 %v1060_v55, %v1056_v26  ;;  %v8218_v6 = vpack.c.bf16 %v1050_v14, %v1046_v17  ;;  %v1166_v35 = vadd.f32 %v8129_v28, %v8151_v0  ;;  %v1078_v25 = vadd.f32 %v8127_v18, %v8079_v56 }
 0x245   : > { %v8162_v46 = vpack.c.bf16 %v1206_v8, %v1203_v58  ;;  %v1109_v36 = vpop.f32.mrf.mxu0  ;;  %v1198_v49 = vadd.f32 %v1197_v11, %v8151_v0  ;;  %v8187_v58 = vpack.c.bf16 %v1190_v53, %v1187_v40  ;;  %v8195_v8 = vpack.c.bf16 %v1070_v47, %v1066_v20 }
 0x246   : > { %v1110_v44 = vadd.f32 %v1109_v36, %v863_v61  ;;  %1921 = vrot.lane.b32.xlu1 %v8159_v33, %s7570_s9  ;;  %v1174_v11 = vadd.f32 %v8125_v3, %v8151_v0  ;;  %v1064_v61 = vadd.f32 %v8111_v21, %v8079_v56  ;;  %v1214_v3 = vmul.f32 0.17677669, %v1058_v30 }
 0x247   : > { %10752 = vst [vmem:[#allocation24_spill] sm:$0xff] %v8162_v46  ;;  %v8168_v31 = vpack.c.bf16 %v1198_v49, %v1195_v52  ;;  %6249 = vmatprep.subr.bf16.mxu1 %v8162_v46  ;;  %10755 = vst [vmem:[#allocation27_spill] sm:$0xff] %v8187_v58  ;;  %v8214_v52 = vpack.c.bf16 %v1182_v32, %v1179_v1  ;;  %v1216_v36 = vmul.f32 0.17677669, %v1068_v39  ;;  %v1367_v21 = vsel %vm1323_vm0, %v8146_v7, 0 }
 0x248   : > { %v8173_v9 = vpack.c.bf16 %v1110_v44, %v1106_v43  ;;  %6250 = vmatpush3.bf16.msra.mxu1 %v8162_v46  ;;  %v8232_v49 = vpack.c.bf16 %v1174_v11, %v1171_v4  ;;  %v1088_v42 = vadd.f32 %v8133_v37, %v8079_v56  ;;  %v1213_v43 = vmul.f32 0.17677669, %v1054_v15 }
 0x249   : > { %10753 = vst [vmem:[#allocation25_spill] sm:$0xff] %v8168_v31  ;;  %6251 = vmatprep.subr.bf16.mxu1 %v8168_v31  ;;  %10756 = vst [vmem:[#allocation28_spill] sm:$0xff] %v8214_v52  ;;  %v1215_v44 = vmul.f32 0.17677669, %v1064_v61  ;;  %v1163_v53 = vadd.f32 %v8121_v38, %v8151_v0  ;;  %v1074_v28 = vadd.f32 %v8123_v59, %v8079_v56  ;;  %v1218_v40 = vmul.f32 0.17677669, %v1078_v25 }
 0x24a   : > { %10754 = vst [vmem:[#allocation26_spill] sm:$0xff] %v8173_v9  ;;  %1919 = vrot.lane.b32.xlu1 %v8171_v60, %s7570_s9  ;;  %1925 = vrot.lane.b32.xlu0 %v8173_v9, %s7570_s9  ;;  %v1370_v19 = vsel %vm1323_vm0, %v8173_v9, 0  ;;  %10757 = vst [vmem:[#allocation29_spill] sm:$0xff] %v8232_v49  ;;  %v1084_v18 = vadd.f32 %v8131_v29, %v8079_v56  ;;  %v1158_v38 = vadd.f32 %v8109_v16, %v8151_v0 }
 0x24b   : > { %6553 = vmatprep.subr.msk.bf16.mxu0 %vm1323_vm0, %v8173_v9  ;;  %v8258_v37 = vpack.c.bf16 %v1214_v3, %v1213_v43  ;;  %v8260_v55 = vpack.c.bf16 %v1216_v36, %v1215_v44  ;;  %v8262_v47 = vpack.c.bf16 %v1166_v35, %v1163_v53  ;;  %v1220_v59 = vmul.f32 0.17677669, %v1088_v42 }
 0x24c   : > { %6218 = vmatpush3.bf16.xpose.msra.mxu0 %v1370_v19  ;;  %6252 = vmatpush3.bf16.msra.mxu1 %v8168_v31  ;;  %v1098_v29 = vadd.f32 %v8138_v34, %v8079_v56  ;;  %v1108_v26 = vadd.f32 %v8156_v63, %v8079_v56  ;;  %v1155_v20 = vadd.f32 %v8094_v10, %v8151_v0  ;;  %v1217_v16 = vmul.f32 0.17677669, %v1074_v28 }
 0x24d   : > { %6554 = vmatprep.subr.msk.bf16.mxu0 %vm1323_vm0, %v8146_v7  ;;  %6253 = vmatprep.subr.bf16.mxu1 %v8187_v58  ;;  %10758 = vst [vmem:[#allocation30_spill] sm:$0xff] %v8262_v47  ;;  %v1219_v19 = vmul.f32 0.17677669, %v1084_v18  ;;  %v1104_v32 = vadd.f32 %v8144_v45, %v8079_v56  ;;  %v1150_v10 = vadd.f32 %v8113_v22, %v8151_v0  ;;  %v1364_v63 = vsel %vm1323_vm0, %v8159_v33, 0 }
 0x24e   : > { %1915 = vrot.lane.b32.xlu1 %v8193_v23, %s7570_s9  ;;  %1917 = vrot.lane.b32.xlu0 %v8195_v8, %s7570_s9  ;;  %v8280_v34 = vpack.c.bf16 %v1158_v38, %v1155_v20  ;;  %v8286_v14 = vpack.c.bf16 %v1218_v40, %v1217_v16  ;;  %v1222_v1 = vmul.f32 0.17677669, %v1098_v29  ;;  %v1224_v56 = vmul.f32 0.17677669, %v1108_v26 }
 0x24f   : > { %v8288_v27 = vpack.c.bf16 %v1220_v59, %v1219_v19  ;;  %v1147_v45 = vadd.f32 %v8101_v2, %v8151_v0  ;;  %v1221_v22 = vmul.f32 0.17677669, %v1094_v13  ;;  %v1223_v24 = vmul.f32 0.17677669, %v1104_v32 }
 0x250   : > { %6254 = vmatpush3.bf16.msra.mxu1 %v8187_v58  ;;  %10759 = vst [vmem:[#allocation31_spill] sm:$0xff] %v8280_v34  ;;  %10760 = vst [vmem:[#allocation32_spill] sm:$0xff] %v8286_v14  ;;  %v1361_v2 = vsel %vm1323_vm0, %v8171_v60, 0  ;;  %v1358_v0 = vsel %vm1323_vm0, %v8195_v8, 0  ;;  %v1355_v11 = vsel %vm1323_vm0, %v8193_v23, 0  ;;  %v1352_v15 = vsel %vm1323_vm0, %v8218_v6, 0 }
 0x251   : > { %6255 = vmatprep.subr.bf16.mxu1 %v8214_v52  ;;  %10761 = vst [vmem:[#allocation33_spill] sm:$0xff] %v8288_v27  ;;  %v8300_v17 = vpack.c.bf16 %v1150_v10, %v1147_v45  ;;  %v8302_v30 = vpack.c.bf16 %v1222_v1, %v1221_v22  ;;  %v8304_v39 = vpack.c.bf16 %v1224_v56, %v1223_v24  ;;  %v1349_v61 = vsel %vm1323_vm0, %v8216_v57, 0 }
 0x252   : > { %1911 = vrot.lane.b32.xlu1 %v8216_v57, %s7570_s9  ;;  %1913 = vrot.lane.b32.xlu0 %v8218_v6, %s7570_s9  ;;  %v8370_v1 = vand.u32 127, %v856_v54  ;;  %v1252_v56 = vadd.s32 16, %v8068_v50  ;;  %v1251_v45 = vadd.s32 8, %v8068_v50  ;;  %v7571_v24 = vmov -1e+30  }
 0x253   : > { %10762 = vst [vmem:[#allocation34_spill] sm:$0xff] %v8300_v17  ;;  %10763 = vst [vmem:[#allocation35_spill] sm:$0xff] %v8302_v30 }
 0x254   : > { %6220 = vmatpush3.bf16.xpose.msra.mxu0 %v1367_v21  ;;  %6256 = vmatpush3.bf16.msra.mxu1 %v8214_v52  ;;  %10764 = vst [vmem:[#allocation36_spill] sm:$0xff] %v8304_v39  ;;  %vm1268_vm1 = vcmp.ge.s32.totalorder %v8068_v50, %v8370_v1  ;;  %vm1270_vm2 = vcmp.ge.s32.totalorder %v1252_v56, %v8370_v1  ;;  %v1261_v56 = vadd.s32 88, %v8068_v50 }
 0x255   : > { %6555 = vmatprep.subr.msk.bf16.mxu0 %vm1323_vm0, %v8159_v33  ;;  %6257 = vmatprep.subr.bf16.mxu1 %v8232_v49  ;;  %vm1269_vm3 = vcmp.ge.s32.totalorder %v1251_v45, %v8370_v1 }
 0x256   : > { %1889 = vrot.lane.b32.xlu1 %v8103_v12, %s7570_s9  ;;  %1887 = vrot.lane.b32.xlu0 %v8087_v62, %s7570_s9  ;;  %vm1279_vm12 = vcmp.ge.s32.totalorder %v1261_v56, %v8370_v1 }
 0x258   : > { %6258 = vmatpush3.bf16.msra.mxu1 %v8232_v49 }
 0x259   : > { %6259 = vmatprep.subr.bf16.mxu1 %v8262_v47 }
 0x25a   : > { %1893 = vrot.lane.b32.xlu1 %v8260_v55, %s7570_s9  ;;  %1891 = vrot.lane.b32.xlu0 %v8258_v37, %s7570_s9 }
 0x25c   : > { %6222 = vmatpush3.bf16.xpose.msra.mxu0 %v1364_v63  ;;  %6260 = vmatpush3.bf16.msra.mxu1 %v8262_v47 }
 0x25d   : > { %6556 = vmatprep.subr.msk.bf16.mxu0 %vm1323_vm0, %v8171_v60  ;;  %6261 = vmatprep.subr.bf16.mxu1 %v8280_v34 }
 0x25e   : > { %1897 = vrot.lane.b32.xlu1 %v8288_v27, %s7570_s9  ;;  %1895 = vrot.lane.b32.xlu0 %v8286_v14, %s7570_s9 }
 0x260   : > { %6262 = vmatpush3.bf16.msra.mxu1 %v8280_v34 }
 0x261   : > { %6263 = vmatprep.subr.bf16.mxu1 %v8300_v17 }
 0x262   : > { %1899 = vrot.lane.b32.xlu0 %v8302_v30, %s7570_s9  ;;  %1901 = vrot.lane.b32.xlu1 %v8304_v39, %s7570_s9 }
 0x264   : > { %6224 = vmatpush3.bf16.xpose.msra.mxu0 %v1361_v2  ;;  %6264 = vmatpush3.bf16.msra.mxu1 %v8300_v17  ;;  %v8377_v2 = vsel %vm1268_vm1, 0.0, %v7571_v24 }
 0x265   : > { %6557 = vmatprep.subr.msk.bf16.mxu0 %vm1323_vm0, %v8195_v8 }
 0x26c   : > { %6226 = vmatpush3.bf16.xpose.msra.mxu0 %v1358_v0  ;;  %v1253_v0 = vadd.s32 24, %v8068_v50 }
 0x26d   : > { %6558 = vmatprep.subr.msk.bf16.mxu0 %vm1323_vm0, %v8193_v23 }
 0x26e   : > { %vm1271_vm4 = vcmp.ge.s32.totalorder %v1253_v0, %v8370_v1 }
 0x274   : > { %6228 = vmatpush3.bf16.xpose.msra.mxu0 %v1355_v11 }
 0x275   : > { %6559 = vmatprep.subr.msk.bf16.mxu0 %vm1323_vm0, %v8218_v6 }
 0x27c   : > { %6230 = vmatpush3.bf16.xpose.msra.mxu0 %v1352_v15  ;;  %v8386_v15 = vsel %vm1270_vm2, 0.0, %v7571_v24 }
 0x27d   : > { %6560 = vmatprep.subr.msk.bf16.mxu0 %vm1323_vm0, %v8216_v57 }
 0x284   : > { %6232 = vmatpush3.bf16.xpose.msra.mxu0 %v1349_v61 }
 0x28b   : > { %6234 = vmatmul.mubr.msk.bf16.vlgmr.msra.gmra.mxu0 %vm1323_vm0, %v8103_v12 }
 0x28c   : > { %6237 = vmatprep.mubr.msk.bf16.mxu0 %vm1323_vm0, %v8258_v37 }
 0x293   : > { %6238 = vmatmul.mubr.msk.bf16.gmra.mxu0 %vm1323_vm0, %v8260_v55 }
 0x294   : > { %6241 = vmatprep.mubr.msk.bf16.mxu0 %vm1323_vm0, %v8286_v14 }
 0x29b   : > { %6242 = vmatmul.mubr.msk.bf16.gmra.mxu0 %vm1323_vm0, %v8288_v27 }
 0x29c   : > { %6245 = vmatprep.mubr.msk.bf16.mxu0 %vm1323_vm0, %v8302_v30 }
 0x2a3   : > { %6246 = vmatmul.mubr.msk.bf16.gmra.mxu0 %vm1323_vm0, %v8304_v39 }
 0x2b4   : > { %v1924_v36 = vpop.permute.xlu1 %1923 }
 0x2b5   : > { %v1970_v25 = vsel %vm1323_vm0, %v1924_v36, 0 }
 0x2b8   : > { %v1922_v42 = vpop.permute.xlu1 %1921 }
 0x2b9   : > { %v1967_v44 = vsel %vm1323_vm0, %v1922_v42, 0 }
 0x2bc   : > { %v1926_v4 = vpop.permute.xlu0 %1925  ;;  %v1920_v53 = vpop.permute.xlu1 %1919 }
 0x2bd   : > { %6561 = vmatprep.subr.msk.bf16.mxu0 %vm1323_vm0, %v1926_v4  ;;  %v1973_v3 = vsel %vm1323_vm0, %v1926_v4, 0  ;;  %v1964_v28 = vsel %vm1323_vm0, %v1920_v53, 0  ;;  %v8389_v4 = vsel %vm1269_vm3, 0.0, %v7571_v24 }
 0x2be   : > { %6302 = vmatpush3.bf16.xpose.msra.mxu0 %v1973_v3  ;;  %v1256_v3 = vadd.s32 48, %v8068_v50 }
 0x2bf   : > { %6562 = vmatprep.subr.msk.bf16.mxu0 %vm1323_vm0, %v1924_v36  ;;  %v1255_v36 = vadd.s32 40, %v8068_v50 }
 0x2c0   : > { %v1918_v35 = vpop.permute.xlu0 %1917  ;;  %v1916_v38 = vpop.permute.xlu1 %1915  ;;  %vm1274_vm5 = vcmp.ge.s32.totalorder %v1256_v3, %v8370_v1 }
 0x2c1   : > { %v1961_v18 = vsel %vm1323_vm0, %v1918_v35, 0  ;;  %v1958_v40 = vsel %vm1323_vm0, %v1916_v38, 0  ;;  %vm1273_vm6 = vcmp.ge.s32.totalorder %v1255_v36, %v8370_v1  ;;  %v1264_v36 = vadd.s32 112, %v8068_v50 }
 0x2c3   : > { %vm1282_vm13 = vcmp.ge.s32.totalorder %v1264_v36, %v8370_v1 }
 0x2c4   : > { %v1914_v21 = vpop.permute.xlu0 %1913  ;;  %v1912_v29 = vpop.permute.xlu1 %1911 }
 0x2c5   : > { %v1955_v59 = vsel %vm1323_vm0, %v1914_v21, 0  ;;  %v1952_v26 = vsel %vm1323_vm0, %v1912_v29, 0 }
 0x2c6   : > { %6304 = vmatpush3.bf16.xpose.msra.mxu0 %v1970_v25 }
 0x2c7   : > { %6563 = vmatprep.subr.msk.bf16.mxu0 %vm1323_vm0, %v1922_v42  ;;  %v8402_v42 = vsel %vm1271_vm4, 0.0, %v7571_v24 }
 0x2c8   : > { %v1888_v43 = vpop.permute.xlu0 %1887  ;;  %v1890_v20 = vpop.permute.xlu1 %1889  ;;  %10765 = vst [vmem:[#allocation37_spill] sm:$0xff] %v8402_v42 }
 0x2c9   : > { %6317 = vmatprep.mubr.msk.bf16.mxu0 %vm1323_vm0, %v1888_v43 }
 0x2cc   : > { %v1892_v16 = vpop.permute.xlu0 %1891  ;;  %v1894_v19 = vpop.permute.xlu1 %1893 }
 0x2ce   : > { %6306 = vmatpush3.bf16.xpose.msra.mxu0 %v1967_v44  ;;  %v1254_v44 = vadd.s32 32, %v8068_v50 }
 0x2cf   : > { %6564 = vmatprep.subr.msk.bf16.mxu0 %vm1323_vm0, %v1920_v53  ;;  %v1257_v53 = vadd.s32 56, %v8068_v50 }
 0x2d0   : > { %v1896_v13 = vpop.permute.xlu0 %1895  ;;  %v1898_v32 = vpop.permute.xlu1 %1897  ;;  %vm1272_vm7 = vcmp.ge.s32.totalorder %v1254_v44, %v8370_v1 }
 0x2d1   : > { %vm1275_vm8 = vcmp.ge.s32.totalorder %v1257_v53, %v8370_v1 }
 0x2d4   : > { %v1900_v10 = vpop.permute.xlu0 %1899  ;;  %v1902_v63 = vpop.permute.xlu1 %1901 }
 0x2d6   : > { %6308 = vmatpush3.bf16.xpose.msra.mxu0 %v1964_v28 }
 0x2d7   : > { %6565 = vmatprep.subr.msk.bf16.mxu0 %vm1323_vm0, %v1918_v35 }
 0x2de   : > { %6310 = vmatpush3.bf16.xpose.msra.mxu0 %v1961_v18 }
 0x2df   : > { %6566 = vmatprep.subr.msk.bf16.mxu0 %vm1323_vm0, %v1916_v38  ;;  %v8414_v38 = vsel %vm1274_vm5, 0.0, %v7571_v24 }
 0x2e0   : > { %10766 = vst [vmem:[#allocation38_spill] sm:$0xff] %v8414_v38 }
 0x2e6   : > { %6312 = vmatpush3.bf16.xpose.msra.mxu0 %v1958_v40 }
 0x2e7   : > { %6567 = vmatprep.subr.msk.bf16.mxu0 %vm1323_vm0, %v1914_v21 }
 0x2ee   : > { %6314 = vmatpush3.bf16.xpose.msra.mxu0 %v1955_v59  ;;  %v8417_v59 = vsel %vm1273_vm6, 0.0, %v7571_v24 }
 0x2ef   : > { %6568 = vmatprep.subr.msk.bf16.mxu0 %vm1323_vm0, %v1912_v29  ;;  %10767 = vst [vmem:[#allocation39_spill] sm:$0xff] %v8417_v59  ;;  %v1260_v29 = vadd.s32 80, %v8068_v50 }
 0x2f1   : > { %vm1278_vm9 = vcmp.ge.s32.totalorder %v1260_v29, %v8370_v1 }
 0x2f6   : > { %6316 = vmatpush3.bf16.xpose.msra.mxu0 %v1952_v26  ;;  %v1259_v26 = vadd.s32 72, %v8068_v50 }
 0x2f8   : > { %vm1277_vm10 = vcmp.ge.s32.totalorder %v1259_v26, %v8370_v1  ;;  %v1262_v26 = vadd.s32 96, %v8068_v50 }
 0x2f9   : > { %v8452_v3 = vsel %vm1277_vm10, 0.0, %v7571_v24 }
 0x2fa   : > { %10771 = vst [vmem:[#allocation43_spill] sm:$0xff] %v8452_v3  ;;  %vm1280_vm15 = vcmp.ge.s32.totalorder %v1262_v26, %v8370_v1 }
 0x2fb   : > { %v8501_v41 = vsel %vm1280_vm15, 0.0, %v7571_v24 }
 0x2fc   : > { %10776 = vst [vmem:[#allocation48_spill] sm:$0xff] %v8501_v41 }
 0x2fd   : > { %6318 = vmatmul.mubr.msk.bf16.vlgmr.msra.gmra.mxu0 %vm1323_vm0, %v1890_v20 }
 0x2fe   : > { %6321 = vmatprep.mubr.msk.bf16.mxu0 %vm1323_vm0, %v1892_v16 }
 0x305   : > { %6322 = vmatmul.mubr.msk.bf16.gmra.mxu0 %vm1323_vm0, %v1894_v19 }
 0x306   : > { %6325 = vmatprep.mubr.msk.bf16.mxu0 %vm1323_vm0, %v1896_v13  ;;  %v8431_v13 = vsel %vm1272_vm7, 0.0, %v7571_v24 }
 0x307   : > { %10768 = vst [vmem:[#allocation40_spill] sm:$0xff] %v8431_v13 }
 0x30d   : > { %6326 = vmatmul.mubr.msk.bf16.gmra.mxu0 %vm1323_vm0, %v1898_v32  ;;  %v8434_v32 = vsel %vm1275_vm8, 0.0, %v7571_v24 }
 0x30e   : > { %6329 = vmatprep.mubr.msk.bf16.mxu0 %vm1323_vm0, %v1900_v10  ;;  %10769 = vst [vmem:[#allocation41_spill] sm:$0xff] %v8434_v32 }
 0x315   : > { %6330 = vmatmul.mubr.msk.bf16.gmra.mxu0 %vm1323_vm0, %v1902_v63  ;;  %v1258_v63 = vadd.s32 64, %v8068_v50 }
 0x317   : > { %vm1276_vm11 = vcmp.ge.s32.totalorder %v1258_v63, %v8370_v1 }
 0x34b   : > { %v6235_v22 = vpop.f32.mrf.mxu0 }
 0x34c   : > { %v8396_v21 = vadd.f32 %v6235_v22, %v8386_v15 }
 0x34d   : > { %v1406_v54 = vpop.f32.mrf.mxu0 }
 0x34e   : > { %v8383_v11 = vadd.f32 %v1406_v54, %v8377_v2  ;;  %v8449_v54 = vsel %vm1278_vm9, 0.0, %v7571_v24 }
 0x34f   : > { %v6236_v61 = vpop.f32.mrf.mxu0  ;;  %10770 = vst [vmem:[#allocation42_spill] sm:$0xff] %v8449_v54 }
 0x350   : > { %1469 = vmax.xlane.f32.xlu0 %v8383_v11  ;;  %v8411_v18 = vadd.f32 %v6236_v61, %v8402_v42 }
 0x351   : > { %v1409_v35 = vpop.f32.mrf.mxu0 }
 0x352   : > { %v8399_v25 = vadd.f32 %v1409_v35, %v8389_v4  ;;  %v1263_v35 = vadd.s32 104, %v8068_v50 }
 0x353   : > { %v6239_v43 = vpop.f32.mrf.mxu0 }
 0x354   : > { %1473 = vmax.xlane.f32.xlu0 %v8396_v21  ;;  %1471 = vmax.xlane.f32.xlu1 %v8399_v25  ;;  %v8425_v16 = vadd.f32 %v6239_v43, %v8414_v38  ;;  %vm1281_vm14 = vcmp.ge.s32.totalorder %v1263_v35, %v8370_v1 }
 0x355   : > { %v1422_v28 = vpop.f32.mrf.mxu0  ;;  %v8488_v5 = vsel %vm1281_vm14, 0.0, %v7571_v24 }
 0x356   : > { %v8443_v22 = vadd.f32 %v1422_v28, %v8431_v13  ;;  %v8467_v28 = vsel %vm1276_vm11, 0.0, %v7571_v24  ;;  %10775 = vst [vmem:[#allocation47_spill] sm:$0xff] %v8488_v5 }
 0x357   : > { %v6240_v40 = vpop.f32.mrf.mxu0  ;;  %10772 = vst [vmem:[#allocation44_spill] sm:$0xff] %v8467_v28 }
 0x358   : > { %1475 = vmax.xlane.f32.xlu0 %v8411_v18  ;;  %v8446_v0 = vadd.f32 %v6240_v40, %v8434_v32  ;;  %v8470_v40 = vsel %vm1279_vm12, 0.0, %v7571_v24 }
 0x359   : > { %v1425_v20 = vpop.f32.mrf.mxu0  ;;  %10773 = vst [vmem:[#allocation45_spill] sm:$0xff] %v8470_v40 }
 0x35a   : > { %v8428_v19 = vadd.f32 %v1425_v20, %v8417_v59  ;;  %v1265_v20 = vadd.s32 120, %v8068_v50 }
 0x35b   : > { %v6243_v10 = vpop.f32.mrf.mxu0 }
 0x35c   : > { %1481 = vmax.xlane.f32.xlu0 %v8425_v16  ;;  %1479 = vmax.xlane.f32.xlu1 %v8428_v19  ;;  %v8461_v44 = vadd.f32 %v6243_v10, %v8449_v54  ;;  %vm1283_vm1 = vcmp.ge.s32.totalorder %v1265_v20, %v8370_v1 }
 0x35d   : > { %v1438_v45 = vpop.f32.mrf.mxu0  ;;  %v8504_v51 = vsel %vm1283_vm1, 0.0, %v7571_v24 }
 0x35e   : > { %v8479_v63 = vadd.f32 %v1438_v45, %v8467_v28  ;;  %10777 = vst [vmem:[#allocation49_spill] sm:$0xff] %v8504_v51 }
 0x35f   : > { %v6244_v61 = vpop.f32.mrf.mxu0 }
 0x360   : > { %1477 = vmax.xlane.f32.xlu0 %v8443_v22  ;;  %1483 = vmax.xlane.f32.xlu1 %v8446_v0  ;;  %v8482_v56 = vadd.f32 %v6244_v61, %v8470_v40 }
 0x361   : > { %v1441_v43 = vpop.f32.mrf.mxu0 }
 0x362   : > { %v8464_v53 = vadd.f32 %v1441_v43, %v8452_v3  ;;  %v8485_v43 = vsel %vm1282_vm13, 0.0, %v7571_v24 }
 0x363   : > { %v6247_v29 = vpop.f32.mrf.mxu0  ;;  %10774 = vst [vmem:[#allocation46_spill] sm:$0xff] %v8485_v43 }
 0x364   : > { %1489 = vmax.xlane.f32.xlu0 %v8461_v44  ;;  %1487 = vmax.xlane.f32.xlu1 %v8464_v53  ;;  %v8495_v35 = vadd.f32 %v6247_v29, %v8485_v43 }
 0x365   : > { %v1454_v10 = vpop.f32.mrf.mxu0 }
 0x366   : > { %v8509_v1 = vadd.f32 %v1454_v10, %v8501_v41 }
 0x367   : > { %v6248_v36 = vpop.f32.mrf.mxu0 }
 0x368   : > { %1485 = vmax.xlane.f32.xlu0 %v8479_v63  ;;  %1491 = vmax.xlane.f32.xlu1 %v8482_v56  ;;  %v8512_v26 = vadd.f32 %v6248_v36, %v8504_v51 }
 0x369   : > { %v1457_v45 = vpop.f32.mrf.mxu0 }
 0x36a   : > { %v8498_v61 = vadd.f32 %v1457_v45, %v8488_v5 }
 0x36c   : > { %1497 = vmax.xlane.f32.xlu0 %v8495_v35  ;;  %1495 = vmax.xlane.f32.xlu1 %v8498_v61 }
 0x370   : > { %1499 = vmax.xlane.f32.xlu1 %v8512_v26  ;;  %1493 = vmax.xlane.f32.xlu0 %v8509_v1 }
 0x381   : > { %2542 = vrot.lane.b32.xlu1 %v8146_v7, %s7572_s15 }
 0x385   : > { %2540 = vrot.lane.b32.xlu1 %v8159_v33, %s7572_s15 }
 0x386   : > { %2544 = vrot.lane.b32.xlu0 %v8173_v9, %s7572_s15 }
 0x3d9   : > { %v1470_v24 = vpop.xlane.xlu0 %1469 }
 0x3da   : > { %v1501_v29 = vsub.f32 %v8383_v11, %v1470_v24 }
 0x3dc   : > { %v1517_v48 = vmul.f32 1.442695, %v1501_v29 }
 0x3dd   : > { %v1474_v20 = vpop.xlane.xlu0 %1473  ;;  %v1472_v36 = vpop.xlane.xlu1 %1471 }
 0x3de   : > { %v1503_v10 = vsub.f32 %v8396_v21, %v1474_v20  ;;  %v1502_v50 = vsub.f32 %v8399_v25, %v1472_v36 }
 0x3e0   : > { %v1521_v45 = vmul.f32 1.442695, %v1503_v10  ;;  %v1519_v33 = vmul.f32 1.442695, %v1502_v50 }
 0x3e1   : > { %v1476_v34 = vpop.xlane.xlu0 %1475 }
 0x3e2   : > { %6859 = vpow2.f32 %v1521_v45  ;;  %v1504_v7 = vsub.f32 %v8411_v18, %v1476_v34 }
 0x3e3   : > { %6861 = vpow2.f32 %v1517_v48 }
 0x3e4   : > { %v1523_v52 = vmul.f32 1.442695, %v1504_v7 }
 0x3e5   : > { %v1482_v17 = vpop.xlane.xlu0 %1481  ;;  %v1480_v9 = vpop.xlane.xlu1 %1479 }
 0x3e6   : > { %6863 = vpow2.f32 %v1523_v52  ;;  %v1507_v11 = vsub.f32 %v8425_v16, %v1482_v17  ;;  %v1506_v10 = vsub.f32 %v8428_v19, %v1480_v9 }
 0x3e7   : > { %6865 = vpow2.f32 %v1519_v33 }
 0x3e8   : > { %v1529_v24 = vmul.f32 1.442695, %v1507_v11  ;;  %v1527_v17 = vmul.f32 1.442695, %v1506_v10 }
 0x3e9   : > { %v1478_v21 = vpop.xlane.xlu0 %1477  ;;  %v1484_v20 = vpop.xlane.xlu1 %1483 }
 0x3ea   : > { %6867 = vpow2.f32 %v1529_v24  ;;  %v1505_v29 = vsub.f32 %v8443_v22, %v1478_v21  ;;  %v1508_v25 = vsub.f32 %v8446_v0, %v1484_v20 }
 0x3ec   : > { %v1525_v34 = vmul.f32 1.442695, %v1505_v29  ;;  %v1531_v7 = vmul.f32 1.442695, %v1508_v25 }
 0x3ed   : > { %v1490_v48 = vpop.xlane.xlu0 %1489  ;;  %v1488_v50 = vpop.xlane.xlu1 %1487 }
 0x3ee   : > { %6869 = vpow2.f32 %v1525_v34  ;;  %v1511_v52 = vsub.f32 %v8461_v44, %v1490_v48  ;;  %v1510_v44 = vsub.f32 %v8464_v53, %v1488_v50 }
 0x3ef   : > { %v8531_v18 = vpop.eup %6859  ;;  %6871 = vpow2.f32 %v1531_v7 }
 0x3f0   : > { %v1537_v33 = vmul.f32 1.442695, %v1511_v52  ;;  %1553 = vadd.xlane.f32.xlu0 %v8531_v18  ;;  %v8534_v36 = vpop.eup %6861 }
 0x3f1   : > { %v1486_v16 = vpop.xlane.xlu0 %1485  ;;  %v1492_v22 = vpop.xlane.xlu1 %1491 }
 0x3f2   : > { %6873 = vpow2.f32 %v1537_v33  ;;  %v1509_v9 = vsub.f32 %v8479_v63, %v1486_v16  ;;  %v1512_v19 = vsub.f32 %v8482_v56, %v1492_v22  ;;  %v1535_v56 = vmul.f32 1.442695, %v1510_v44 }
 0x3f3   : > { %v8538_v0 = vpop.eup %6863  ;;  %6875 = vpow2.f32 %v1527_v17 }
 0x3f4   : > { %v1533_v45 = vmul.f32 1.442695, %v1509_v9  ;;  %v1539_v11 = vmul.f32 1.442695, %v1512_v19  ;;  %1555 = vadd.xlane.f32.xlu1 %v8538_v0  ;;  %1549 = vadd.xlane.f32.xlu0 %v8534_v36  ;;  %v8543_v20 = vpop.eup %6865 }
 0x3f5   : > { %v1498_v24 = vpop.xlane.xlu0 %1497  ;;  %v1496_v21 = vpop.xlane.xlu1 %1495 }
 0x3f6   : > { %6877 = vpow2.f32 %v1533_v45  ;;  %v1515_v63 = vsub.f32 %v8495_v35, %v1498_v24  ;;  %v1514_v35 = vsub.f32 %v8498_v61, %v1496_v21 }
 0x3f7   : > { %v8546_v29 = vpop.eup %6867  ;;  %6879 = vpow2.f32 %v1539_v11 }
 0x3f8   : > { %v1545_v25 = vmul.f32 1.442695, %v1515_v63  ;;  %1561 = vadd.xlane.f32.xlu0 %v8546_v29  ;;  %1551 = vadd.xlane.f32.xlu1 %v8543_v20  ;;  %v1543_v16 = vmul.f32 1.442695, %v1514_v35 }
 0x3f9   : > { %v1494_v53 = vpop.xlane.xlu0 %1493  ;;  %v1500_v10 = vpop.xlane.xlu1 %1499 }
 0x3fa   : > { %6881 = vpow2.f32 %v1545_v25  ;;  %v1513_v34 = vsub.f32 %v8509_v1, %v1494_v53  ;;  %v1516_v7 = vsub.f32 %v8512_v26, %v1500_v10  ;;  %v6319_v53 = vpop.f32.mrf.mxu0 }
 0x3fb   : > { %v8552_v48 = vpop.eup %6869  ;;  %6883 = vpow2.f32 %v1535_v56 }
 0x3fc   : > { %v8555_v50 = vpop.eup %6871  ;;  %v1541_v52 = vmul.f32 1.442695, %v1513_v34  ;;  %v1547_v17 = vmul.f32 1.442695, %v1516_v7  ;;  %1557 = vadd.xlane.f32.xlu0 %v8552_v48  ;;  %v2009_v10 = vpop.f32.mrf.mxu0 }
 0x3fd   : > { %1563 = vadd.xlane.f32.xlu1 %v8555_v50  ;;  %v2545_v33 = vpop.permute.xlu0 %2544  ;;  %v2543_v22 = vpop.permute.xlu1 %2542 }
 0x3fe   : > { %6885 = vpow2.f32 %v1541_v52  ;;  %6569 = vmatprep.subr.msk.bf16.mxu0 %vm1323_vm0, %v2545_v33  ;;  %v2592_v1 = vsel %vm1323_vm0, %v2545_v33, 0  ;;  %v2589_v44 = vsel %vm1323_vm0, %v2543_v22, 0  ;;  %v6320_v34 = vpop.f32.mrf.mxu0 }
 0x3ff   : > { %v8561_v26 = vpop.eup %6873  ;;  %6887 = vpow2.f32 %v1547_v17  ;;  %6386 = vmatpush3.bf16.xpose.msra.mxu0 %v2592_v1 }
 0x400   : > { %v8563_v61 = vpop.eup %6875  ;;  %1569 = vadd.xlane.f32.xlu0 %v8561_v26  ;;  %6570 = vmatprep.subr.msk.bf16.mxu0 %vm1323_vm0, %v2543_v22  ;;  %6889 = vpow2.f32 %v1543_v16  ;;  %v2012_v7 = vpop.f32.mrf.mxu0  ;;  %v8619_v16 = vadd.f32 %v2009_v10, %v8377_v2 }
 0x401   : > { %1559 = vadd.xlane.f32.xlu1 %v8563_v61  ;;  %v2541_v11 = vpop.permute.xlu1 %2540 }
 0x402   : > { %v2586_v56 = vsel %vm1323_vm0, %v2541_v11, 0  ;;  %v6323_v35 = vpop.f32.mrf.mxu0 }
 0x403   : > { %v8568_v9 = vpop.eup %6877 }
 0x404   : > { %v8570_v19 = vpop.eup %6879  ;;  %1565 = vadd.xlane.f32.xlu0 %v8568_v9  ;;  %v2025_v52 = vpop.f32.mrf.mxu0 }
 0x405   : > { %1571 = vadd.xlane.f32.xlu1 %v8570_v19  ;;  %v8635_v10 = vadd.f32 %v2025_v52, %v8431_v13 }
 0x406   : > { %v6324_v17 = vpop.f32.mrf.mxu0 }
 0x407   : > { %v8575_v45 = vpop.eup %6881  ;;  %6388 = vmatpush3.bf16.xpose.msra.mxu0 %v2589_v44  ;;  %v8623_v44 = vadd.f32 %v6319_v53, %v8386_v15 }
 0x408   : > { %v8577_v24 = vpop.eup %6883  ;;  %1577 = vadd.xlane.f32.xlu0 %v8575_v45  ;;  %6571 = vmatprep.subr.msk.bf16.mxu0 %vm1323_vm0, %v2541_v11  ;;  %v2028_v33 = vpop.f32.mrf.mxu0 }
 0x409   : > { %1567 = vadd.xlane.f32.xlu1 %v8577_v24  ;;  %v8638_v53 = vadd.f32 %v2028_v33, %v8417_v59 }
 0x40a   : > { %v6327_v1 = vpop.f32.mrf.mxu0 }
 0x40b   : > { %v8582_v21 = vpop.eup %6885 }
 0x40c   : > { %v8584_v63 = vpop.eup %6887  ;;  %1573 = vadd.xlane.f32.xlu0 %v8582_v21  ;;  %v2041_v22 = vpop.f32.mrf.mxu0 }
 0x40d   : > { %1579 = vadd.xlane.f32.xlu1 %v8584_v63  ;;  %v8589_v25 = vpop.eup %6889  ;;  %v8651_v52 = vadd.f32 %v2041_v22, %v8467_v28 }
 0x40e   : > { %v6328_v11 = vpop.f32.mrf.mxu0 }
 0x40f   : > { %6390 = vmatpush3.bf16.xpose.msra.mxu0 %v2586_v56  ;;  %v8627_v56 = vadd.f32 %v6320_v34, %v8402_v42  ;;  %v8643_v34 = vadd.f32 %v6323_v35, %v8414_v38  ;;  %v8659_v35 = vadd.f32 %v6327_v1, %v8449_v54 }
 0x411   : > { %1575 = vadd.xlane.f32.xlu1 %v8589_v25 }
 0x422   : > { %2538 = vrot.lane.b32.xlu1 %v8171_v60, %s7572_s15  ;;  %2536 = vrot.lane.b32.xlu0 %v8195_v8, %s7572_s15 }
 0x426   : > { %2534 = vrot.lane.b32.xlu1 %v8193_v23, %s7572_s15  ;;  %2532 = vrot.lane.b32.xlu0 %v8218_v6, %s7572_s15 }
 0x42a   : > { %2530 = vrot.lane.b32.xlu1 %v8216_v57, %s7572_s15  ;;  %2514 = vrot.lane.b32.xlu0 %v8087_v62, %s7572_s15 }
 0x42e   : > { %2516 = vrot.lane.b32.xlu1 %v8103_v12, %s7572_s15  ;;  %2518 = vrot.lane.b32.xlu0 %v8258_v37, %s7572_s15 }
 0x432   : > { %2520 = vrot.lane.b32.xlu1 %v8260_v55, %s7572_s15  ;;  %2522 = vrot.lane.b32.xlu0 %v8286_v14, %s7572_s15 }
 0x436   : > { %2524 = vrot.lane.b32.xlu1 %v8288_v27, %s7572_s15  ;;  %2526 = vrot.lane.b32.xlu0 %v8302_v30, %s7572_s15  ;;  %v8630_v30 = vadd.f32 %v2012_v7, %v8389_v4  ;;  %v8646_v7 = vadd.f32 %v6324_v17, %v8434_v32  ;;  %v8662_v17 = vadd.f32 %v6328_v11, %v8470_v40 }
 0x43a   : > { %2528 = vrot.lane.b32.xlu1 %v8304_v39, %s7572_s15  ;;  %v2044_v39 = vpop.f32.mrf.mxu0 }
 0x43b   : > { %v8654_v33 = vadd.f32 %v2044_v39, %v8452_v3 }
 0x43c   : > { %v6331_v14 = vpop.f32.mrf.mxu0 }
 0x43d   : > { %v8675_v1 = vadd.f32 %v6331_v14, %v8485_v43 }
 0x43e   : > { %v2057_v27 = vpop.f32.mrf.mxu0 }
 0x43f   : > { %v8667_v22 = vadd.f32 %v2057_v27, %v8501_v41  ;;  %v6739_v27 = vld [vmem:[#allocation10 + $0x8] sm:$0xff]  }
 0x440   : > { %v6332_v59 = vpop.f32.mrf.mxu0  ;;  %6281 = vmatprep.subr.bf16.mxu1 %v6739_v27 }
 0x441   : > { %v8678_v11 = vadd.f32 %v6332_v59, %v8504_v51 }
 0x442   : > { %v2060_v38 = vpop.f32.mrf.mxu0 }
 0x443   : > { %v8670_v39 = vadd.f32 %v2060_v38, %v8488_v5 }
 0x455   : > { %2072 = vmax.xlane.f32.xlu0 %v8619_v16 }
 0x459   : > { %2076 = vmax.xlane.f32.xlu0 %v8623_v44 }
 0x45d   : > { %2078 = vmax.xlane.f32.xlu0 %v8627_v56 }
 0x45e   : > { %2074 = vmax.xlane.f32.xlu1 %v8630_v30 }
 0x461   : > { %2080 = vmax.xlane.f32.xlu0 %v8635_v10 }
 0x462   : > { %2082 = vmax.xlane.f32.xlu1 %v8638_v53 }
 0x465   : > { %2084 = vmax.xlane.f32.xlu0 %v8643_v34 }
 0x466   : > { %2086 = vmax.xlane.f32.xlu1 %v8646_v7 }
 0x469   : > { %2088 = vmax.xlane.f32.xlu0 %v8651_v52 }
 0x46a   : > { %2090 = vmax.xlane.f32.xlu1 %v8654_v33 }
 0x46d   : > { %2092 = vmax.xlane.f32.xlu0 %v8659_v35 }
 0x46e   : > { %2094 = vmax.xlane.f32.xlu1 %v8662_v17 }
 0x471   : > { %2096 = vmax.xlane.f32.xlu0 %v8667_v22 }
 0x472   : > { %2098 = vmax.xlane.f32.xlu1 %v8670_v39 }
 0x475   : > { %2100 = vmax.xlane.f32.xlu0 %v8675_v1 }
 0x476   : > { %2102 = vmax.xlane.f32.xlu1 %v8678_v11 }
 0x479   : > { %v1554_v54 = vpop.xlane.xlu0 %1553 }
 0x47d   : > { %v1550_v41 = vpop.xlane.xlu0 %1549  ;;  %v1556_v40 = vpop.xlane.xlu1 %1555 }
 0x47e   : > { %6891 = vrcp.f32 %v1556_v40 }
 0x47f   : > { %6893 = vrcp.f32 %v1550_v41 }
 0x480   : > { %6895 = vrcp.f32 %v1554_v54 }
 0x481   : > { %v1562_v38 = vpop.xlane.xlu0 %1561  ;;  %v1552_v5 = vpop.xlane.xlu1 %1551 }
 0x482   : > { %6897 = vrcp.f32 %v1552_v5 }
 0x485   : > { %v1558_v14 = vpop.xlane.xlu0 %1557 }
 0x486   : > { %v1564_v43 = vpop.xlane.xlu1 %1563 }
 0x487   : > { %2244 = vrot.lane.b32.xlu1 %v8168_v31, %s7570_s9  ;;  %6899 = vrcp.f32 %v1564_v43 }
 0x488   : > { %6901 = vrcp.f32 %v1558_v14 }
 0x489   : > { %v1570_v59 = vpop.xlane.xlu0 %1569  ;;  %6903 = vrcp.f32 %v1562_v38 }
 0x48a   : > { %v1560_v51 = vpop.xlane.xlu1 %1559 }
 0x48b   : > { %6905 = vrcp.f32 %v1560_v51  ;;  %2238 = vrot.lane.b32.xlu1 %v8232_v49, %s7570_s9  ;;  %2246 = vrot.lane.b32.xlu0 %v8162_v46, %s7570_s9  ;;  %v6892_v41 = vpop.eup %6891 }
 0x48c   : > { %v6894_v5 = vpop.eup %6893  ;;  %v1600_v51 = vmul.f32 %v6892_v41, %v8538_v0 }
 0x48d   : > { %v1566_v54 = vpop.xlane.xlu0 %1565  ;;  %v6896_v28 = vpop.eup %6895  ;;  %v1597_v14 = vmul.f32 %v6894_v5, %v8534_v36 }
 0x48e   : > { %v1572_v40 = vpop.xlane.xlu1 %1571  ;;  %v1599_v31 = vmul.f32 %v6896_v28, %v8531_v18  ;;  %v10780_v28 = vld [vmem:[#allocation22_spill] sm:$0xff] }
 0x48f   : > { %2236 = vrot.lane.b32.xlu1 %v8262_v47, %s7570_s9  ;;  %2242 = vrot.lane.b32.xlu0 %v8187_v58, %s7570_s9  ;;  %v6898_v43 = vpop.eup %6897  ;;  %6907 = vrcp.f32 %v1572_v40  ;;  %v10778_v47 = vld [vmem:[#allocation34_spill] sm:$0xff]  ;;  %v10779_v58 = vld [vmem:[#allocation28_spill] sm:$0xff] }
 0x490   : > { %6909 = vrcp.f32 %v1566_v54  ;;  %v1598_v46 = vmul.f32 %v6898_v43, %v8543_v20  ;;  %v1614_v3 = vpack.c.bf16 %v1600_v51, %v1599_v31  ;;  %v6740_v54 = vld [vmem:[#allocation10] sm:$0xff]  }
 0x491   : > { %v1578_v38 = vpop.xlane.xlu0 %1577  ;;  %6911 = vrcp.f32 %v1570_v59 }
 0x492   : > { %v1568_v49 = vpop.xlane.xlu1 %1567  ;;  %v1613_v40 = vpack.c.bf16 %v1598_v46, %v1597_v14  ;;  %v10782_v14 = vld [vmem:[#allocation23_spill] sm:$0xff] }
 0x493   : > { %6913 = vrcp.f32 %v1568_v49  ;;  %2232 = vrot.lane.b32.xlu1 %v10778_v47, %s7570_s9  ;;  %2240 = vrot.lane.b32.xlu0 %v10779_v58, %s7570_s9  ;;  %v10781_v49 = vld [vmem:[#allocation31_spill] sm:$0xff] }
 0x494   : > { %v6900_v0 = vpop.eup %6899  ;;  %6265 = vmatprep.mubr.bf16.mxu1 %v1613_v40  ;;  %v10783_v40 = vld [vmem:[#allocation26_spill] sm:$0xff] }
 0x495   : > { %v1574_v41 = vpop.xlane.xlu0 %1573  ;;  %v6902_v36 = vpop.eup %6901  ;;  %6266 = vmatmul.mubr.bf16.vlgmr.msra.gmra.mxu1 %v1614_v3  ;;  %v1604_v46 = vmul.f32 %v6900_v0, %v8555_v50 }
 0x496   : > { %v1580_v20 = vpop.xlane.xlu1 %1579  ;;  %v6904_v59 = vpop.eup %6903  ;;  %6282 = vmatpush3.bf16.msra.mxu1 %v6739_v27  ;;  %v1601_v5 = vmul.f32 %v6902_v36, %v8552_v48 }
 0x497   : > { %3153 = vrot.lane.b32.xlu1 %v10780_v28, %s7573_s3  ;;  %2234 = vrot.lane.b32.xlu0 %v10781_v49, %s7570_s9  ;;  %6915 = vrcp.f32 %v1580_v20  ;;  %v1603_v51 = vmul.f32 %v6904_v59, %v8546_v29 }
 0x498   : > { %v6906_v18 = vpop.eup %6905  ;;  %6917 = vrcp.f32 %v1574_v41  ;;  %6283 = vmatprep.subr.bf16.mxu1 %v6740_v54 }
 0x499   : > { %v2537_v31 = vpop.permute.xlu0 %2536  ;;  %v1602_v3 = vmul.f32 %v6906_v18, %v8563_v61  ;;  %6919 = vrcp.f32 %v1578_v38  ;;  %v1616_v27 = vpack.c.bf16 %v1604_v46, %v1603_v51 }
 0x49a   : > { %v1576_v43 = vpop.xlane.xlu1 %1575  ;;  %6284 = vmatpush3.bf16.msra.mxu1 %v6740_v54 }
 0x49b   : > { %6921 = vrcp.f32 %v1576_v43  ;;  %3151 = vrot.lane.b32.xlu1 %v10782_v14, %s7573_s3  ;;  %3155 = vrot.lane.b32.xlu0 %v10783_v40, %s7573_s3  ;;  %v1615_v50 = vpack.c.bf16 %v1602_v3, %v1601_v5 }
 0x49c   : > { %v6908_v0 = vpop.eup %6907 }
 0x49d   : > { %6269 = vmatprep.mubr.bf16.mxu1 %v1615_v50  ;;  %v2533_v48 = vpop.permute.xlu0 %2532  ;;  %v6910_v41 = vpop.eup %6909  ;;  %v1608_v54 = vmul.f32 %v6908_v0, %v8570_v19 }
 0x49e   : > { %6270 = vmatmul.mubr.bf16.gmra.mxu1 %v1616_v27  ;;  %v2539_v61 = vpop.permute.xlu1 %2538  ;;  %v6912_v38 = vpop.eup %6911  ;;  %v1605_v59 = vmul.f32 %v6910_v41, %v8568_v9  ;;  %v2580_v9 = vsel %vm1323_vm0, %v2537_v31, 0 }
 0x49f   : > { %3149 = vrot.lane.b32.xlu1 %v8171_v60, %s7573_s3  ;;  %6572 = vmatprep.subr.msk.bf16.mxu0 %vm1323_vm0, %v2539_v61  ;;  %v2583_v29 = vsel %vm1323_vm0, %v2539_v61, 0  ;;  %v1607_v60 = vmul.f32 %v6912_v38, %v8561_v26 }
 0x4a0   : > { %v6914_v36 = vpop.eup %6913  ;;  %3147 = vrot.lane.b32.xlu0 %v8195_v8, %s7573_s3  ;;  %6392 = vmatpush3.bf16.xpose.msra.mxu0 %v2583_v29 }
 0x4a1   : > { %6573 = vmatprep.subr.msk.bf16.mxu0 %vm1323_vm0, %v2537_v31  ;;  %v2515_v20 = vpop.permute.xlu0 %2514  ;;  %v1606_v28 = vmul.f32 %v6914_v36, %v8577_v24  ;;  %v1618_v8 = vpack.c.bf16 %v1608_v54, %v1607_v60 }
 0x4a2   : > { %6401 = vmatprep.mubr.msk.bf16.mxu0 %vm1323_vm0, %v2515_v20  ;;  %v2535_v26 = vpop.permute.xlu1 %2534 }
 0x4a3   : > { %3145 = vrot.lane.b32.xlu1 %v8193_v23, %s7573_s3  ;;  %v1617_v18 = vpack.c.bf16 %v1606_v28, %v1605_v59 }
 0x4a4   : > { %3143 = vrot.lane.b32.xlu0 %v8218_v6, %s7573_s3  ;;  %v6916_v19 = vpop.eup %6915 }
 0x4a5   : > { %6273 = vmatprep.mubr.bf16.mxu1 %v1617_v18  ;;  %v6918_v46 = vpop.eup %6917  ;;  %v1612_v23 = vmul.f32 %v6916_v19, %v8584_v63  ;;  %v2519_v63 = vpop.permute.xlu0 %2518 }
 0x4a6   : > { %6274 = vmatmul.mubr.bf16.gmra.mxu1 %v1618_v8  ;;  %v6920_v5 = vpop.eup %6919  ;;  %v1609_v6 = vmul.f32 %v6918_v46, %v8582_v21  ;;  %v2531_v21 = vpop.permute.xlu1 %2530 }
 0x4a7   : > { %3141 = vrot.lane.b32.xlu1 %v8216_v57, %s7573_s3  ;;  %v1611_v43 = vmul.f32 %v6920_v5, %v8575_v45  ;;  %v2574_v45 = vsel %vm1323_vm0, %v2533_v48, 0 }
 0x4a8   : > { %v6922_v24 = vpop.eup %6921  ;;  %3125 = vrot.lane.b32.xlu0 %v8087_v62, %s7573_s3  ;;  %6394 = vmatpush3.bf16.xpose.msra.mxu0 %v2580_v9  ;;  %v2577_v62 = vsel %vm1323_vm0, %v2535_v26, 0 }
 0x4a9   : > { %6574 = vmatprep.subr.msk.bf16.mxu0 %vm1323_vm0, %v2535_v26  ;;  %v1610_v3 = vmul.f32 %v6922_v24, %v8589_v25  ;;  %v1620_v31 = vpack.c.bf16 %v1612_v23, %v1611_v43  ;;  %v2523_v25 = vpop.permute.xlu0 %2522 }
 0x4ab   : > { %3127 = vrot.lane.b32.xlu1 %v8103_v12, %s7573_s3  ;;  %v1619_v57 = vpack.c.bf16 %v1610_v3, %v1609_v6  ;;  %v2571_v12 = vsel %vm1323_vm0, %v2531_v21, 0 }
 0x4ac   : > { %3129 = vrot.lane.b32.xlu0 %v8258_v37, %s7573_s3  ;;  %v2517_v37 = vpop.permute.xlu1 %2516 }
 0x4ad   : > { %6277 = vmatprep.mubr.bf16.mxu1 %v1619_v57  ;;  %v2527_v14 = vpop.permute.xlu0 %2526 }
 0x4ae   : > { %6278 = vmatmul.mubr.bf16.gmra.mxu1 %v1620_v31 }
 0x4af   : > { %3131 = vrot.lane.b32.xlu1 %v8260_v55, %s7573_s3 }
 0x4b0   : > { %6396 = vmatpush3.bf16.xpose.msra.mxu0 %v2577_v62  ;;  %v2521_v55 = vpop.permute.xlu1 %2520 }
 0x4b1   : > { %6575 = vmatprep.subr.msk.bf16.mxu0 %vm1323_vm0, %v2533_v48 }
 0x4b4   : > { %v2525_v51 = vpop.permute.xlu1 %2524 }
 0x4b8   : > { %6398 = vmatpush3.bf16.xpose.msra.mxu0 %v2574_v45  ;;  %v2529_v40 = vpop.permute.xlu1 %2528 }
 0x4b9   : > { %6576 = vmatprep.subr.msk.bf16.mxu0 %vm1323_vm0, %v2531_v21 }
 0x4c0   : > { %6400 = vmatpush3.bf16.xpose.msra.mxu0 %v2571_v12 }
 0x4c7   : > { %6402 = vmatmul.mubr.msk.bf16.vlgmr.msra.gmra.mxu0 %vm1323_vm0, %v2517_v37 }
 0x4c8   : > { %6405 = vmatprep.mubr.msk.bf16.mxu0 %vm1323_vm0, %v2519_v63 }
 0x4cf   : > { %6406 = vmatmul.mubr.msk.bf16.gmra.mxu0 %vm1323_vm0, %v2521_v55 }
 0x4d0   : > { %6409 = vmatprep.mubr.msk.bf16.mxu0 %vm1323_vm0, %v2523_v25 }
 0x4d7   : > { %6410 = vmatmul.mubr.msk.bf16.gmra.mxu0 %vm1323_vm0, %v2525_v51 }
 0x4d8   : > { %6413 = vmatprep.mubr.msk.bf16.mxu0 %vm1323_vm0, %v2527_v14 }
 0x4de   : > { %v8755_v50 = vpop.xlane.xlu0 %2072 }
 0x4df   : > { %6414 = vmatmul.mubr.msk.bf16.gmra.mxu0 %vm1323_vm0, %v2529_v40 }
 0x4e2   : > { %v8758_v27 = vpop.xlane.xlu0 %2076 }
 0x4e6   : > { %v8760_v0 = vpop.xlane.xlu0 %2078 }
 0x4e7   : > { %v8762_v48 = vpop.xlane.xlu1 %2074 }
 0x4ea   : > { %v8764_v41 = vpop.xlane.xlu0 %2080 }
 0x4eb   : > { %v8766_v61 = vpop.xlane.xlu1 %2082 }
 0x4ee   : > { %v8768_v38 = vpop.xlane.xlu0 %2084 }
 0x4ef   : > { %v8770_v29 = vpop.xlane.xlu1 %2086 }
 0x4f2   : > { %v8772_v36 = vpop.xlane.xlu0 %2088 }
 0x4f3   : > { %v8774_v54 = vpop.xlane.xlu1 %2090 }
 0x4f6   : > { %v8776_v20 = vpop.xlane.xlu0 %2092 }
 0x4f7   : > { %v8778_v59 = vpop.xlane.xlu1 %2094 }
 0x4fa   : > { %v8780_v28 = vpop.xlane.xlu0 %2096 }
 0x4fb   : > { %v8782_v60 = vpop.xlane.xlu1 %2098 }
 0x4fe   : > { %v8784_v18 = vpop.xlane.xlu0 %2100 }
 0x4ff   : > { %v8786_v8 = vpop.xlane.xlu1 %2102 }
 0x502   : > { %v2247_v19 = vpop.permute.xlu0 %2246 }
 0x503   : > { %v8788_v46 = vpop.permute.xlu1 %2244  ;;  %6333 = vmatprep.subr.bf16.mxu1 %v2247_v19 }
 0x506   : > { %v8790_v5 = vpop.permute.xlu0 %2242 }
 0x507   : > { %v8792_v9 = vpop.permute.xlu1 %2238 }
 0x50a   : > { %v8794_v24 = vpop.permute.xlu0 %2240 }
 0x50b   : > { %v8796_v26 = vpop.permute.xlu1 %2236 }
 0x50e   : > { %v8798_v23 = vpop.permute.xlu0 %2234 }
 0x50f   : > { %v8800_v6 = vpop.permute.xlu1 %2232 }
 0x512   : > { %v3156_v3 = vpop.permute.xlu0 %3155 }
 0x513   : > { %6577 = vmatprep.subr.msk.bf16.mxu0 %vm1323_vm0, %v3156_v3  ;;  %v3203_v43 = vsel %vm1323_vm0, %v3156_v3, 0  ;;  %v3154_v57 = vpop.permute.xlu1 %3153 }
 0x514   : > { %6470 = vmatpush3.bf16.xpose.msra.mxu0 %v3203_v43  ;;  %v3200_v45 = vsel %vm1323_vm0, %v3154_v57, 0 }
 0x515   : > { %6578 = vmatprep.subr.msk.bf16.mxu0 %vm1323_vm0, %v3154_v57 }
 0x516   : > { %v3148_v31 = vpop.permute.xlu0 %3147 }
 0x517   : > { %v3152_v21 = vpop.permute.xlu1 %3151  ;;  %v3191_v25 = vsel %vm1323_vm0, %v3148_v31, 0 }
 0x518   : > { %v3197_v37 = vsel %vm1323_vm0, %v3152_v21, 0 }
 0x51a   : > { %v3144_v62 = vpop.permute.xlu0 %3143 }
 0x51b   : > { %v3150_v63 = vpop.permute.xlu1 %3149  ;;  %v3185_v40 = vsel %vm1323_vm0, %v3144_v62, 0 }
 0x51c   : > { %6472 = vmatpush3.bf16.xpose.msra.mxu0 %v3200_v45  ;;  %v3194_v55 = vsel %vm1323_vm0, %v3150_v63, 0 }
 0x51d   : > { %6579 = vmatprep.subr.msk.bf16.mxu0 %vm1323_vm0, %v3152_v21 }
 0x51e   : > { %v3126_v12 = vpop.permute.xlu0 %3125 }
 0x51f   : > { %6485 = vmatprep.mubr.msk.bf16.mxu0 %vm1323_vm0, %v3126_v12  ;;  %v3146_v51 = vpop.permute.xlu1 %3145 }
 0x520   : > { %v3188_v14 = vsel %vm1323_vm0, %v3146_v51, 0 }
 0x523   : > { %v3142_v3 = vpop.permute.xlu1 %3141 }
 0x524   : > { %6474 = vmatpush3.bf16.xpose.msra.mxu0 %v3197_v37  ;;  %v3182_v43 = vsel %vm1323_vm0, %v3142_v3, 0 }
 0x525   : > { %6580 = vmatprep.subr.msk.bf16.mxu0 %vm1323_vm0, %v3150_v63 }
 0x527   : > { %v3128_v57 = vpop.permute.xlu1 %3127 }
 0x52b   : > { %v3132_v12 = vpop.permute.xlu1 %3131 }
 0x52c   : > { %6476 = vmatpush3.bf16.xpose.msra.mxu0 %v3194_v55 }
 0x52d   : > { %6581 = vmatprep.subr.msk.bf16.mxu0 %vm1323_vm0, %v3148_v31  ;;  %v3130_v31 = vpop.permute.xlu0 %3129 }
 0x534   : > { %6478 = vmatpush3.bf16.xpose.msra.mxu0 %v3191_v25 }
 0x535   : > { %6582 = vmatprep.subr.msk.bf16.mxu0 %vm1323_vm0, %v3146_v51 }
 0x53c   : > { %6480 = vmatpush3.bf16.xpose.msra.mxu0 %v3188_v14 }
 0x53d   : > { %6583 = vmatprep.subr.msk.bf16.mxu0 %vm1323_vm0, %v3144_v62 }
 0x544   : > { %6482 = vmatpush3.bf16.xpose.msra.mxu0 %v3185_v40 }
 0x545   : > { %6584 = vmatprep.subr.msk.bf16.mxu0 %vm1323_vm0, %v3142_v3 }
 0x54c   : > { %6484 = vmatpush3.bf16.xpose.msra.mxu0 %v3182_v43 }
 0x553   : > { %6486 = vmatmul.mubr.msk.bf16.vlgmr.msra.gmra.mxu0 %vm1323_vm0, %v3128_v57 }
 0x554   : > { %6489 = vmatprep.mubr.msk.bf16.mxu0 %vm1323_vm0, %v3130_v31 }
 0x555   : > { %v6267_v45 = vpop.f32.mrf.mxu1 }
 0x557   : > { %v1655_v21 = vpop.f32.mrf.mxu1 }
 0x559   : > { %v6268_v37 = vpop.f32.mrf.mxu1 }
 0x55a   : > { %v1719_v55 = vpack.c.bf16 %v6268_v37, %v6267_v45 }
 0x55b   : > { %6490 = vmatmul.mubr.msk.bf16.gmra.mxu0 %vm1323_vm0, %v3132_v12  ;;  %v1658_v62 = vpop.f32.mrf.mxu1 }
 0x55c   : > { %v1718_v63 = vpack.c.bf16 %v1658_v62, %v1655_v21 }
 0x55e   : > { %v6271_v25 = vpop.f32.mrf.mxu1  ;;  %6285 = vmatprep.mubr.msk.bf16.mxu1 %vm1323_vm0, %v1718_v63 }
 0x55f   : > { %6286 = vmatmul.mubr.msk.bf16.vlgmr.msra.gmra.mxu1 %vm1323_vm0, %v1719_v55 }
 0x560   : > { %v1671_v51 = vpop.f32.mrf.mxu1  ;;  %6334 = vmatpush3.bf16.msra.mxu1 %v2247_v19 }
 0x561   : > { %6335 = vmatprep.subr.bf16.mxu1 %v8788_v46 }
 0x562   : > { %v6272_v14 = vpop.f32.mrf.mxu1 }
 0x563   : > { %v1721_v43 = vpack.c.bf16 %v6272_v14, %v6271_v25  ;;  %v2110_v25 = vsub.f32 %v8643_v34, %v8768_v38  ;;  %v2111_v34 = vsub.f32 %v8646_v7, %v8770_v29 }
 0x564   : > { %v1674_v40 = vpop.f32.mrf.mxu1  ;;  %6336 = vmatpush3.bf16.msra.mxu1 %v8788_v46 }
 0x565   : > { %v1720_v3 = vpack.c.bf16 %v1674_v40, %v1671_v51  ;;  %6337 = vmatprep.subr.bf16.mxu1 %v8790_v5  ;;  %v2107_v51 = vsub.f32 %v8627_v56, %v8760_v0  ;;  %v2132_v40 = vmul.f32 1.442695, %v2110_v25  ;;  %v2109_v0 = vsub.f32 %v8638_v53, %v8766_v61 }
 0x566   : > { %v6275_v57 = vpop.f32.mrf.mxu1  ;;  %v2112_v53 = vsub.f32 %v8651_v52, %v8772_v36 }
 0x567   : > { %6289 = vmatprep.mubr.msk.bf16.mxu1 %vm1323_vm0, %v1720_v3  ;;  %v2126_v3 = vmul.f32 1.442695, %v2107_v51  ;;  %v2130_v29 = vmul.f32 1.442695, %v2109_v0 }
 0x568   : > { %v1687_v31 = vpop.f32.mrf.mxu1  ;;  %6290 = vmatmul.mubr.msk.bf16.gmra.mxu1 %vm1323_vm0, %v1721_v43 }
 0x569   : > { %6338 = vmatpush3.bf16.msra.mxu1 %v8790_v5 }
 0x56a   : > { %6339 = vmatprep.subr.bf16.mxu1 %v8794_v24  ;;  %v6276_v19 = vpop.f32.mrf.mxu1 }
 0x56b   : > { %v1723_v12 = vpack.c.bf16 %v6276_v19, %v6275_v57  ;;  %v2136_v57 = vmul.f32 1.442695, %v2112_v53  ;;  %v10790_v53 = vld [vmem:[#allocation45_spill] sm:$0xff] }
 0x56c   : > { %v1690_v45 = vpop.f32.mrf.mxu1 }
 0x56d   : > { %v1722_v21 = vpack.c.bf16 %v1690_v45, %v1687_v31  ;;  %6340 = vmatpush3.bf16.msra.mxu1 %v8794_v24  ;;  %v2104_v24 = vsub.f32 %v8619_v16, %v8755_v50  ;;  %v2113_v31 = vsub.f32 %v8654_v33, %v8774_v54  ;;  %v2116_v33 = vsub.f32 %v8667_v22, %v8780_v28 }
 0x56e   : > { %6341 = vmatprep.subr.bf16.mxu1 %v8792_v9  ;;  %v6279_v46 = vpop.f32.mrf.mxu1 }
 0x56f   : > { %6293 = vmatprep.mubr.msk.bf16.mxu1 %vm1323_vm0, %v1722_v21  ;;  %v2120_v14 = vmul.f32 1.442695, %v2104_v24  ;;  %v2138_v45 = vmul.f32 1.442695, %v2113_v31  ;;  %v10784_v24 = vld [vmem:[#allocation33_spill] sm:$0xff]  ;;  %v10792_v31 = vld [vmem:[#allocation36_spill] sm:$0xff] }
 0x570   : > { %v1703_v37 = vpop.f32.mrf.mxu1  ;;  %6294 = vmatmul.mubr.msk.bf16.gmra.mxu1 %vm1323_vm0, %v1723_v12 }
 0x571   : > { %6342 = vmatpush3.bf16.msra.mxu1 %v8792_v9  ;;  %v2106_v9 = vsub.f32 %v8623_v44, %v8758_v27  ;;  %v2105_v44 = vsub.f32 %v8630_v30, %v8762_v48  ;;  %v2134_v30 = vmul.f32 1.442695, %v2111_v34  ;;  %v2114_v48 = vsub.f32 %v8659_v35, %v8776_v20 }
 0x572   : > { %6343 = vmatprep.subr.bf16.mxu1 %v8796_v26  ;;  %v6280_v5 = vpop.f32.mrf.mxu1  ;;  %v2115_v35 = vsub.f32 %v8662_v17, %v8778_v59  ;;  %v2118_v17 = vsub.f32 %v8675_v1, %v8784_v18  ;;  %v2119_v1 = vsub.f32 %v8678_v11, %v8786_v8  ;;  %v2144_v18 = vmul.f32 1.442695, %v2116_v33 }
 0x573   : > { %v1725_v55 = vpack.c.bf16 %v6280_v5, %v6279_v46  ;;  %v2140_v61 = vmul.f32 1.442695, %v2114_v48  ;;  %v2117_v46 = vsub.f32 %v8670_v39, %v8782_v60  ;;  %v10789_v48 = vld [vmem:[#allocation44_spill] sm:$0xff] }
 0x574   : > { %v1706_v62 = vpop.f32.mrf.mxu1  ;;  %v2142_v36 = vmul.f32 1.442695, %v2115_v35  ;;  %v2148_v21 = vmul.f32 1.442695, %v2118_v17  ;;  %v2150_v22 = vmul.f32 1.442695, %v2119_v1 }
 0x575   : > { %v1724_v63 = vpack.c.bf16 %v1706_v62, %v1703_v37  ;;  %6344 = vmatpush3.bf16.msra.mxu1 %v8796_v26  ;;  %v2124_v26 = vmul.f32 1.442695, %v2106_v9  ;;  %v2146_v8 = vmul.f32 1.442695, %v2117_v46  ;;  %v10791_v35 = vld [vmem:[#allocation42_spill] sm:$0xff] }
 0x576   : > { %6345 = vmatprep.subr.bf16.mxu1 %v8798_v23 }
 0x577   : > { %6297 = vmatprep.mubr.msk.bf16.mxu1 %vm1323_vm0, %v1724_v63  ;;  %6923 = vpow2.f32 %v2124_v26  ;;  %v10785_v26 = vld [vmem:[#allocation32_spill] sm:$0xff] }
 0x578   : > { %6298 = vmatmul.mubr.msk.bf16.gmra.mxu1 %vm1323_vm0, %v1725_v55  ;;  %6925 = vpow2.f32 %v2120_v14 }
 0x579   : > { %6346 = vmatpush3.bf16.msra.mxu1 %v8798_v23  ;;  %v2108_v23 = vsub.f32 %v8635_v10, %v8764_v41  ;;  %6927 = vpow2.f32 %v2132_v40  ;;  %v2122_v10 = vmul.f32 1.442695, %v2105_v44 }
 0x57a   : > { %6347 = vmatprep.subr.bf16.mxu1 %v8800_v6  ;;  %6929 = vpow2.f32 %v2126_v3 }
 0x57b   : > { %v2128_v16 = vmul.f32 1.442695, %v2108_v23 }
 0x57d   : > { %6348 = vmatpush3.bf16.msra.mxu1 %v8800_v6  ;;  %6931 = vpow2.f32 %v2128_v16 }
 0x57e   : > { %6933 = vpow2.f32 %v2122_v10  ;;  %v10787_v10 = vld [vmem:[#allocation38_spill] sm:$0xff] }
 0x57f   : > { %6935 = vpow2.f32 %v2134_v30 }
 0x580   : > { %6937 = vpow2.f32 %v2130_v29 }
 0x581   : > { %6939 = vpow2.f32 %v2140_v61 }
 0x582   : > { %6941 = vpow2.f32 %v2136_v57 }
 0x583   : > { %6943 = vpow2.f32 %v2142_v36  ;;  %v10793_v36 = vld [vmem:[#allocation35_spill] sm:$0xff] }
 0x584   : > { %v8881_v43 = vpop.eup %6923  ;;  %6945 = vpow2.f32 %v2138_v45 }
 0x585   : > { %v8887_v52 = vpop.eup %6925  ;;  %6947 = vpow2.f32 %v2148_v21 }
 0x586   : > { %v8891_v59 = vpop.eup %6927  ;;  %6949 = vpow2.f32 %v2144_v18 }
 0x587   : > { %v6403_v6 = vpop.f32.mrf.mxu0  ;;  %v8895_v19 = vpop.eup %6929  ;;  %6951 = vpow2.f32 %v2150_v22 }
 0x588   : > { %v8867_v38 = vadd.f32 %v6403_v6, %v8386_v15  ;;  %6953 = vpow2.f32 %v2146_v8 }
 0x589   : > { %v2628_v50 = vpop.f32.mrf.mxu0 }
 0x58a   : > { %v8859_v56 = vadd.f32 %v2628_v50, %v8377_v2  ;;  %v8899_v54 = vpop.eup %6931  ;;  %v10786_v50 = vld [vmem:[#allocation39_spill] sm:$0xff] }
 0x58b   : > { %v6404_v27 = vpop.f32.mrf.mxu0  ;;  %v8905_v12 = vpop.eup %6933 }
 0x58c   : > { %2691 = vmax.xlane.f32.xlu0 %v8859_v56  ;;  %v8879_v20 = vadd.f32 %v6404_v27, %v8402_v42  ;;  %v8909_v28 = vpop.eup %6935  ;;  %v6742_v42 = vld [vmem:[#allocation10 + $0x10] sm:$0xff]  }
 0x58d   : > { %v2631_v41 = vpop.f32.mrf.mxu0  ;;  %v8913_v11 = vpop.eup %6937 }
 0x58e   : > { %v8870_v7 = vadd.f32 %v2631_v41, %v8389_v4  ;;  %v8915_v37 = vpop.eup %6939  ;;  %v10788_v41 = vld [vmem:[#allocation43_spill] sm:$0xff] }
 0x58f   : > { %v8919_v39 = vpop.eup %6941  ;;  %v6407_v25 = vpop.f32.mrf.mxu0 }
 0x590   : > { %2693 = vmax.xlane.f32.xlu1 %v8870_v7  ;;  %2695 = vmax.xlane.f32.xlu0 %v8867_v38  ;;  %v8921_v60 = vpop.eup %6943  ;;  %v8957_v0 = vadd.f32 %v6407_v25, %v10787_v10 }
 0x591   : > { %v8925_v5 = vpop.eup %6945  ;;  %v2644_v51 = vpop.f32.mrf.mxu0 }
 0x592   : > { %v8927_v62 = vpop.eup %6947  ;;  %v8945_v3 = vadd.f32 %v2644_v51, %v8431_v13  ;;  %v10796_v51 = vld [vmem:[#allocation48_spill] sm:$0xff] }
 0x593   : > { %v8931_v63 = vpop.eup %6949  ;;  %v6408_v14 = vpop.f32.mrf.mxu0 }
 0x594   : > { %2156 = vadd.xlane.f32.xlu1 %v8881_v43  ;;  %2697 = vmax.xlane.f32.xlu0 %v8879_v20  ;;  %v8933_v55 = vpop.eup %6951  ;;  %v8949_v16 = vadd.f32 %v6408_v14, %v8434_v32  ;;  %v7276_v32 = vld [vmem:[%s7828_s21 + $0x78] sm:$0xff] }
 0x595   : > { %v8937_v9 = vpop.eup %6953  ;;  %v2647_v23 = vpop.f32.mrf.mxu0 }
 0x596   : > { %v8952_v34 = vadd.f32 %v2647_v23, %v10786_v50 }
 0x597   : > { %v6411_v40 = vpop.f32.mrf.mxu0 }
 0x598   : > { %2152 = vadd.xlane.f32.xlu1 %v8887_v52  ;;  %2164 = vadd.xlane.f32.xlu0 %v8891_v59  ;;  %v8973_v57 = vadd.f32 %v6411_v40, %v10791_v35 }
 0x599   : > { %v2660_v6 = vpop.f32.mrf.mxu0 }
 0x59a   : > { %v8965_v29 = vadd.f32 %v2660_v6, %v10789_v48 }
 0x59b   : > { %v6412_v44 = vpop.f32.mrf.mxu0 }
 0x59c   : > { %2158 = vadd.xlane.f32.xlu1 %v8895_v19  ;;  %2160 = vadd.xlane.f32.xlu0 %v8899_v54  ;;  %v8968_v61 = vadd.f32 %v6412_v44, %v10790_v53 }
 0x59d   : > { %v2663_v27 = vpop.f32.mrf.mxu0 }
 0x59e   : > { %v8960_v30 = vadd.f32 %v2663_v27, %v10788_v41 }
 0x59f   : > { %v6415_v45 = vpop.f32.mrf.mxu0 }
 0x5a0   : > { %2154 = vadd.xlane.f32.xlu1 %v8905_v12  ;;  %2166 = vadd.xlane.f32.xlu0 %v8909_v28 }
 0x5a1   : > { %v2676_v1 = vpop.f32.mrf.mxu0 }
 0x5a2   : > { %v8993_v14 = vadd.f32 %v2676_v1, %v10796_v51 }
 0x5a3   : > { %v6416_v22 = vpop.f32.mrf.mxu0 }
 0x5a4   : > { %2162 = vadd.xlane.f32.xlu1 %v8913_v11  ;;  %2172 = vadd.xlane.f32.xlu0 %v8915_v37 }
 0x5a5   : > { %v2679_v23 = vpop.f32.mrf.mxu0 }
 0x5a8   : > { %2168 = vadd.xlane.f32.xlu1 %v8919_v39  ;;  %2174 = vadd.xlane.f32.xlu0 %v8921_v60 }
 0x5ac   : > { %2180 = vadd.xlane.f32.xlu1 %v8927_v62  ;;  %2170 = vadd.xlane.f32.xlu0 %v8925_v5 }
 0x5b0   : > { %2176 = vadd.xlane.f32.xlu1 %v8931_v63  ;;  %2182 = vadd.xlane.f32.xlu0 %v8933_v55 }
 0x5b4   : > { %2178 = vadd.xlane.f32.xlu0 %v8937_v9 }
 0x5c1   : > { %3135 = vrot.lane.b32.xlu1 %v10784_v24, %s7573_s3 }
 0x5ca   : > { %3133 = vrot.lane.b32.xlu0 %v10785_v26, %s7573_s3 }
 0x5e5   : > { %2699 = vmax.xlane.f32.xlu1 %v8945_v3 }
 0x5e9   : > { %2705 = vmax.xlane.f32.xlu1 %v8949_v16  ;;  %2701 = vmax.xlane.f32.xlu0 %v8952_v34 }
 0x5ed   : > { %2709 = vmax.xlane.f32.xlu1 %v8960_v30  ;;  %2703 = vmax.xlane.f32.xlu0 %v8957_v0 }
 0x5f1   : > { %2713 = vmax.xlane.f32.xlu1 %v8968_v61  ;;  %2707 = vmax.xlane.f32.xlu0 %v8965_v29 }
 0x5f5   : > { %2711 = vmax.xlane.f32.xlu0 %v8973_v57 }
 0x602   : > { %3139 = vrot.lane.b32.xlu1 %v10792_v31, %s7573_s3  ;;  %v10799_v31 = vld [vmem:[#allocation49_spill] sm:$0xff] }
 0x60b   : > { %3137 = vrot.lane.b32.xlu0 %v10793_v36, %s7573_s3  ;;  %v9001_v36 = vadd.f32 %v6416_v22, %v10799_v31 }
 0x615   : > { %v8980_v17 = vpop.xlane.xlu0 %2691 }
 0x619   : > { %v8982_v33 = vpop.xlane.xlu0 %2695  ;;  %v8984_v21 = vpop.xlane.xlu1 %2693 }
 0x61d   : > { %v8986_v18 = vpop.xlane.xlu0 %2697  ;;  %v2157_v46 = vpop.xlane.xlu1 %2156 }
 0x61f   : > { %v8988_v8 = vpop.f32.mrf.mxu1 }
 0x620   : > { %10794 = vst [vmem:[#allocation34_spill] sm:$0xff] %v8988_v8  ;;  %v10800_v8 = vld [vmem:[#allocation47_spill] sm:$0xff] }
 0x621   : > { %v2165_v24 = vpop.xlane.xlu0 %2164  ;;  %v2153_v26 = vpop.xlane.xlu1 %2152  ;;  %v9004_v53 = vadd.f32 %v2679_v23, %v10800_v8 }
 0x622   : > { %v8990_v25 = vpop.f32.mrf.mxu1 }
 0x623   : > { %10795 = vst [vmem:[#allocation28_spill] sm:$0xff] %v8990_v25 }
 0x624   : > { %v8995_v40 = vpop.f32.mrf.mxu1 }
 0x625   : > { %10797 = vst [vmem:[#allocation22_spill] sm:$0xff] %v8995_v40  ;;  %v2161_v6 = vpop.xlane.xlu0 %2160  ;;  %v2159_v44 = vpop.xlane.xlu1 %2158 }
 0x626   : > { %v8997_v27 = vpop.f32.mrf.mxu1  ;;  %2715 = vmax.xlane.f32.xlu1 %v8993_v14  ;;  %6955 = vrcp.f32 %v2159_v44 }
 0x627   : > { %10798 = vst [vmem:[#allocation31_spill] sm:$0xff] %v8997_v27  ;;  %6957 = vrcp.f32 %v2153_v26  ;;  %v10803_v27 = vld [vmem:[#allocation46_spill] sm:$0xff] }
 0x628   : > { %v9006_v25 = vpop.f32.mrf.mxu1  ;;  %6959 = vrcp.f32 %v2157_v46  ;;  %v9013_v22 = vadd.f32 %v6415_v45, %v10803_v27  ;;  %v9027_v45 = vld [vmem:[%s10619_s6] ss:$0 sm:$0xff] }
 0x629   : > { %10801 = vst [vmem:[#allocation23_spill] sm:$0xff] %v9006_v25  ;;  %v2167_v1 = vpop.xlane.xlu0 %2166  ;;  %v2155_v51 = vpop.xlane.xlu1 %2154  ;;  %10808 = vst [vmem:[#allocation50_spill] sm:$0xff] %v9027_v45  ;;  %v1322_v10 = vadd.f32 %v7276_v32, %v9027_v45 }
 0x62a   : > { %v9008_v40 = vpop.f32.mrf.mxu1  ;;  %2721 = vmax.xlane.f32.xlu1 %v9001_v36  ;;  %2717 = vmax.xlane.f32.xlu0 %v9004_v53  ;;  %6961 = vrcp.f32 %v2155_v51 }
 0x62b   : > { %10802 = vst [vmem:[#allocation26_spill] sm:$0xff] %v9008_v40  ;;  %6963 = vrcp.f32 %v2161_v6 }
 0x62c   : > { %v9015_v31 = vpop.f32.mrf.mxu1 }
 0x62d   : > { %10804 = vst [vmem:[#allocation33_spill] sm:$0xff] %v9015_v31  ;;  %v2173_v23 = vpop.xlane.xlu0 %2172  ;;  %v2163_v44 = vpop.xlane.xlu1 %2162 }
 0x62e   : > { %v9017_v26 = vpop.f32.mrf.mxu1  ;;  %2719 = vmax.xlane.f32.xlu0 %v9013_v22  ;;  %6965 = vrcp.f32 %v2163_v44 }
 0x62f   : > { %10805 = vst [vmem:[#allocation32_spill] sm:$0xff] %v9017_v26  ;;  %6967 = vrcp.f32 %v2167_v1  ;;  %v7275_v1 = vld [vmem:[%s7828_s21 + $0x70] sm:$0xff] }
 0x630   : > { %v9020_v46 = vpop.f32.mrf.mxu1  ;;  %6969 = vrcp.f32 %v2165_v24  ;;  %v1321_v44 = vadd.f32 %v7275_v1, %v9027_v45 }
 0x631   : > { %10806 = vst [vmem:[#allocation36_spill] sm:$0xff] %v9020_v46  ;;  %v2175_v40 = vpop.xlane.xlu0 %2174  ;;  %v2169_v25 = vpop.xlane.xlu1 %2168 }
 0x632   : > { %v9022_v51 = vpop.f32.mrf.mxu1  ;;  %6971 = vrcp.f32 %v2169_v25 }
 0x633   : > { %10807 = vst [vmem:[#allocation35_spill] sm:$0xff] %v9022_v51  ;;  %v6956_v26 = vpop.eup %6955  ;;  %v6741_v51 = vld [vmem:[#allocation10 + $0x18] sm:$0xff]  }
 0x634   : > { %v9029_v6 = vpop.f32.mrf.mxu1  ;;  %v6958_v46 = vpop.eup %6957  ;;  %v2203_v25 = vmul.f32 %v6956_v26, %v8895_v19  ;;  %6365 = vmatprep.subr.bf16.mxu1 %v6741_v51  ;;  %v10812_v19 = vld [vmem:[#allocation25_spill] sm:$0xff] }
 0x635   : > { %10809 = vst [vmem:[#allocation51_spill] sm:$0xff] %v9029_v6  ;;  %v2171_v31 = vpop.xlane.xlu0 %2170  ;;  %v2181_v8 = vpop.xlane.xlu1 %2180  ;;  %v2200_v1 = vmul.f32 %v6958_v46, %v8887_v52 }
 0x636   : > { %6973 = vrcp.f32 %v2171_v31  ;;  %v9033_v24 = vpop.f32.mrf.mxu1  ;;  %v6960_v27 = vpop.eup %6959 }
 0x637   : > { %10810 = vst [vmem:[#allocation52_spill] sm:$0xff] %v9033_v24  ;;  %v6962_v35 = vpop.eup %6961  ;;  %6975 = vrcp.f32 %v2175_v40  ;;  %v2202_v40 = vmul.f32 %v6960_v27, %v8881_v43  ;;  %v10813_v27 = vld [vmem:[#allocation29_spill] sm:$0xff] }
 0x638   : > { %v6299_v41 = vpop.f32.mrf.mxu1  ;;  %v2201_v31 = vmul.f32 %v6962_v35, %v8905_v12  ;;  %v6964_v24 = vpop.eup %6963  ;;  %6977 = vrcp.f32 %v2173_v23 }
 0x639   : > { %v9036_v6 = vadd.f32 %v6299_v41, %v1321_v44  ;;  %v2183_v48 = vpop.xlane.xlu0 %2182  ;;  %v2177_v13 = vpop.xlane.xlu1 %2176  ;;  %v2204_v12 = vmul.f32 %v6964_v24, %v8899_v54 }
 0x63a   : > { %v9042_v50 = vpop.f32.mrf.mxu1  ;;  %v2216_v41 = vpack.c.bf16 %v2201_v31, %v2200_v1  ;;  %6979 = vrcp.f32 %v2177_v13 }
 0x63b   : > { %10811 = vst [vmem:[#allocation53_spill] sm:$0xff] %v9036_v6  ;;  %2855 = vrot.lane.b32.xlu1 %v10812_v19, %s7572_s15  ;;  %v6966_v26 = vpop.eup %6965  ;;  %v2217_v6 = vpack.c.bf16 %v2203_v25, %v2202_v40 }
 0x63c   : > { %v6300_v44 = vpop.f32.mrf.mxu1  ;;  %v6968_v32 = vpop.eup %6967  ;;  %6349 = vmatprep.mubr.bf16.mxu1 %v2216_v41  ;;  %v2205_v35 = vmul.f32 %v6966_v26, %v8913_v11 }
 0x63d   : > { %v9047_v45 = vadd.f32 %v6300_v44, %v1322_v10  ;;  %v2179_v52 = vpop.xlane.xlu0 %2178  ;;  %6350 = vmatmul.mubr.bf16.vlgmr.msra.gmra.mxu1 %v2217_v6  ;;  %v6970_v43 = vpop.eup %6969  ;;  %v2207_v13 = vmul.f32 %v6968_v32, %v8909_v28  ;;  %v10814_v6 = vld [vmem:[#allocation30_spill] sm:$0xff] }
 0x63e   : > { %6981 = vrcp.f32 %v2179_v52  ;;  %v2218_v23 = vpack.c.bf16 %v2205_v35, %v2204_v12  ;;  %6366 = vmatpush3.bf16.msra.mxu1 %v6741_v51  ;;  %v3136_v25 = vpop.permute.xlu1 %3135  ;;  %v2206_v54 = vmul.f32 %v6970_v43, %v8891_v59  ;;  %v10816_v59 = vld [vmem:[#allocation27_spill] sm:$0xff] }
 0x63f   : > { %2849 = vrot.lane.b32.xlu1 %v10813_v27, %s7572_s15  ;;  %6983 = vrcp.f32 %v2183_v48  ;;  %6367 = vmatprep.subr.bf16.mxu1 %v6742_v42  ;;  %v6972_v10 = vpop.eup %6971  ;;  %v10815_v48 = vld [vmem:[#allocation24_spill] sm:$0xff] }
 0x640   : > { %6353 = vmatprep.mubr.bf16.mxu1 %v2218_v23  ;;  %6985 = vrcp.f32 %v2181_v8  ;;  %v2219_v28 = vpack.c.bf16 %v2207_v13, %v2206_v54  ;;  %v2208_v51 = vmul.f32 %v6972_v10, %v8919_v39  ;;  %v2723_v23 = vsub.f32 %v8859_v56, %v8980_v17 }
 0x641   : > { %v3134_v46 = vpop.permute.xlu0 %3133 }
 0x642   : > { %6493 = vmatprep.mubr.msk.bf16.mxu0 %vm1323_vm0, %v3134_v46  ;;  %6368 = vmatpush3.bf16.msra.mxu1 %v6742_v42 }
 0x643   : > { %v6974_v11 = vpop.eup %6973  ;;  %2847 = vrot.lane.b32.xlu1 %v10814_v6, %s7572_s15  ;;  %6494 = vmatmul.mubr.msk.bf16.gmra.mxu0 %vm1323_vm0, %v3136_v25 }
 0x644   : > { %2857 = vrot.lane.b32.xlu0 %v10815_v48, %s7572_s15  ;;  %v2209_v24 = vmul.f32 %v6974_v11, %v8925_v5  ;;  %v6976_v8 = vpop.eup %6975 }
 0x645   : > { %6354 = vmatmul.mubr.bf16.gmra.mxu1 %v2219_v28  ;;  %v6978_v31 = vpop.eup %6977  ;;  %v2211_v40 = vmul.f32 %v6976_v8, %v8921_v60  ;;  %v2725_v60 = vsub.f32 %v8867_v38, %v8982_v33 }
 0x646   : > { %v2220_v1 = vpack.c.bf16 %v2209_v24, %v2208_v51  ;;  %v2210_v26 = vmul.f32 %v6978_v31, %v8915_v37 }
 0x647   : > { %v6980_v41 = vpop.eup %6979  ;;  %v2743_v13 = vmul.f32 1.442695, %v2725_v60 }
 0x648   : > { %2853 = vrot.lane.b32.xlu0 %v10816_v59, %s7572_s15  ;;  %6357 = vmatprep.mubr.bf16.mxu1 %v2220_v1  ;;  %v2221_v39 = vpack.c.bf16 %v2211_v40, %v2210_v26  ;;  %v2212_v42 = vmul.f32 %v6980_v41, %v8931_v63  ;;  %v2739_v63 = vmul.f32 1.442695, %v2723_v23 }
 0x649   : > { %6987 = vpow2.f32 %v2743_v13 }
 0x64a   : > { %6989 = vpow2.f32 %v2739_v63 }
 0x64b   : > { %v6982_v44 = vpop.eup %6981 }
 0x64c   : > { %2851 = vrot.lane.b32.xlu0 %v10779_v58, %s7572_s15  ;;  %v2213_v5 = vmul.f32 %v6982_v44, %v8937_v9  ;;  %v6984_v32 = vpop.eup %6983  ;;  %v2726_v9 = vsub.f32 %v8879_v20, %v8986_v18 }
 0x64d   : > { %6358 = vmatmul.mubr.bf16.gmra.mxu1 %v2221_v39  ;;  %v6986_v12 = vpop.eup %6985  ;;  %v2215_v35 = vmul.f32 %v6984_v32, %v8933_v55  ;;  %v2724_v55 = vsub.f32 %v8870_v7, %v8984_v21 }
 0x64e   : > { %v2222_v52 = vpack.c.bf16 %v2213_v5, %v2212_v42  ;;  %v2214_v37 = vmul.f32 %v6986_v12, %v8927_v62  ;;  %v2745_v10 = vmul.f32 1.442695, %v2726_v9 }
 0x64f   : > { %v2741_v46 = vmul.f32 1.442695, %v2724_v55 }
 0x650   : > { %6361 = vmatprep.mubr.bf16.mxu1 %v2222_v52  ;;  %v2223_v43 = vpack.c.bf16 %v2215_v35, %v2214_v37  ;;  %6991 = vpow2.f32 %v2745_v10 }
 0x651   : > { %6993 = vpow2.f32 %v2741_v46 }
 0x655   : > { %6362 = vmatmul.mubr.bf16.gmra.mxu1 %v2223_v43 }
 0x656   : > { %v9081_v38 = vpop.eup %6987 }
 0x657   : > { %v9084_v56 = vpop.eup %6989 }
 0x65d   : > { %v9087_v62 = vpop.eup %6991 }
 0x65e   : > { %v9090_v20 = vpop.eup %6993 }
 0x667   : > { %2775 = vadd.xlane.f32.xlu1 %v9081_v38 }
 0x66b   : > { %2771 = vadd.xlane.f32.xlu1 %v9084_v56 }
 0x66e   : > { %v2700_v17 = vpop.xlane.xlu1 %2699 }
 0x66f   : > { %2777 = vadd.xlane.f32.xlu1 %v9087_v62  ;;  %v2727_v25 = vsub.f32 %v8945_v3, %v2700_v17 }
 0x671   : > { %v2747_v24 = vmul.f32 1.442695, %v2727_v25 }
 0x672   : > { %v2702_v7 = vpop.xlane.xlu0 %2701  ;;  %v2706_v33 = vpop.xlane.xlu1 %2705 }
 0x673   : > { %v2728_v21 = vsub.f32 %v8952_v34, %v2702_v7  ;;  %2773 = vadd.xlane.f32.xlu1 %v9090_v20  ;;  %v2730_v1 = vsub.f32 %v8949_v16, %v2706_v33 }
 0x675   : > { %v2749_v18 = vmul.f32 1.442695, %v2728_v21  ;;  %v2753_v26 = vmul.f32 1.442695, %v2730_v1 }
 0x676   : > { %v2704_v54 = vpop.xlane.xlu0 %2703  ;;  %v2710_v28 = vpop.xlane.xlu1 %2709 }
 0x677   : > { %6995 = vpow2.f32 %v2749_v18  ;;  %v2729_v11 = vsub.f32 %v8957_v0, %v2704_v54  ;;  %v2732_v5 = vsub.f32 %v8960_v30, %v2710_v28 }
 0x679   : > { %v2751_v51 = vmul.f32 1.442695, %v2729_v11  ;;  %v2757_v52 = vmul.f32 1.442695, %v2732_v5 }
 0x67a   : > { %v2708_v8 = vpop.xlane.xlu0 %2707  ;;  %v2714_v34 = vpop.xlane.xlu1 %2713 }
 0x67b   : > { %6997 = vpow2.f32 %v2751_v51  ;;  %v2731_v31 = vsub.f32 %v8965_v29, %v2708_v8  ;;  %v2734_v0 = vsub.f32 %v8968_v61, %v2714_v34  ;;  %v10817_v29 = vmov 0  }
 0x67c   : > { %6999 = vpow2.f32 %v2747_v24 }
 0x67d   : > { %v2755_v40 = vmul.f32 1.442695, %v2731_v31  ;;  %v2761_v32 = vmul.f32 1.442695, %v2734_v0  ;;  %v10820_v0 = vld [vmem:[#allocation38_spill] sm:$0xff] }
 0x67e   : > { %v2712_v41 = vpop.xlane.xlu0 %2711  ;;  %v3140_v42 = vpop.permute.xlu1 %3139 }
 0x67f   : > { %7001 = vpow2.f32 %v2755_v40  ;;  %v2733_v3 = vsub.f32 %v8973_v57, %v2712_v41 }
 0x680   : > { %7003 = vpow2.f32 %v2753_v26 }
 0x681   : > { %v2759_v39 = vmul.f32 1.442695, %v2733_v3 }
 0x682   : > { %v3138_v44 = vpop.permute.xlu0 %3137 }
 0x683   : > { %6497 = vmatprep.mubr.msk.bf16.mxu0 %vm1323_vm0, %v3138_v44  ;;  %7005 = vpow2.f32 %v2759_v39 }
 0x684   : > { %v9101_v16 = vpop.eup %6995  ;;  %6498 = vmatmul.mubr.msk.bf16.gmra.mxu0 %vm1323_vm0, %v3140_v42  ;;  %7007 = vpow2.f32 %v2761_v32  ;;  %v10821_v42 = vld [vmem:[#allocation41_spill] sm:$0xff] }
 0x685   : > { %2781 = vadd.xlane.f32.xlu1 %v9101_v16  ;;  %4244 = vmatprep.mubr.bf16.mxu0 %v10817_v29  ;;  %7009 = vpow2.f32 %v2757_v52 }
 0x688   : > { %v9107_v57 = vpop.eup %6997 }
 0x689   : > { %2783 = vadd.xlane.f32.xlu0 %v9107_v57  ;;  %v9110_v61 = vpop.eup %6999 }
 0x68c   : > { %v9112_v12 = vpop.eup %7001 }
 0x68d   : > { %2787 = vadd.xlane.f32.xlu1 %v9112_v12  ;;  %2779 = vadd.xlane.f32.xlu0 %v9110_v61  ;;  %v9116_v35 = vpop.eup %7003 }
 0x690   : > { %v9119_v30 = vpop.eup %7005 }
 0x691   : > { %2785 = vadd.xlane.f32.xlu0 %v9116_v35  ;;  %v9122_v60 = vpop.eup %7007 }
 0x692   : > { %v9125_v37 = vpop.eup %7009 }
 0x695   : > { %2791 = vadd.xlane.f32.xlu0 %v9119_v30 }
 0x699   : > { %2793 = vadd.xlane.f32.xlu0 %v9122_v60 }
 0x69d   : > { %2789 = vadd.xlane.f32.xlu0 %v9125_v37 }
 0x6af   : > { %v2716_v23 = vpop.xlane.xlu1 %2715 }
 0x6b0   : > { %v2735_v63 = vsub.f32 %v8993_v14, %v2716_v23  ;;  %v9183_v23 = vpop.f32.mrf.mxu1 }
 0x6b2   : > { %v2763_v46 = vmul.f32 1.442695, %v2735_v63 }
 0x6b3   : > { %v2718_v43 = vpop.xlane.xlu0 %2717  ;;  %2845 = vrot.lane.b32.xlu0 %v10781_v49, %s7572_s15  ;;  %v2722_v7 = vpop.xlane.xlu1 %2721 }
 0x6b4   : > { %v2736_v17 = vsub.f32 %v9004_v53, %v2718_v43  ;;  %v2738_v21 = vsub.f32 %v9001_v36, %v2722_v7 }
 0x6b6   : > { %v2765_v33 = vmul.f32 1.442695, %v2736_v17  ;;  %v2769_v18 = vmul.f32 1.442695, %v2738_v21 }
 0x6b7   : > { %v2720_v13 = vpop.xlane.xlu0 %2719  ;;  %v2856_v40 = vpop.permute.xlu1 %2855 }
 0x6b8   : > { %v2737_v9 = vsub.f32 %v9013_v22, %v2720_v13  ;;  %v6487_v22 = vpop.f32.mrf.mxu0 }
 0x6b9   : > { %v9160_v31 = vadd.f32 %v6487_v22, %v8386_v15 }
 0x6ba   : > { %v2767_v55 = vmul.f32 1.442695, %v2737_v9  ;;  %v3239_v54 = vpop.f32.mrf.mxu0  ;;  %v10822_v9 = vld [vmem:[#allocation40_spill] sm:$0xff] }
 0x6bb   : > { %v9132_v10 = vpop.permute.xlu0 %2857  ;;  %v9150_v51 = vadd.f32 %v3239_v54, %v8377_v2  ;;  %v10818_v2 = vld [vmem:[#allocation37_spill] sm:$0xff]  ;;  %v9166_v3 = vpop.permute.xlu1 %2849 }
 0x6bc   : > { %7011 = vpow2.f32 %v2767_v55  ;;  %6417 = vmatprep.subr.bf16.mxu1 %v9132_v10  ;;  %v6488_v11 = vpop.f32.mrf.mxu0 }
 0x6bd   : > { %7013 = vpow2.f32 %v2763_v46  ;;  %v9164_v41 = vadd.f32 %v6488_v11, %v10818_v2 }
 0x6be   : > { %7015 = vpow2.f32 %v2765_v33  ;;  %v3242_v36 = vpop.f32.mrf.mxu0 }
 0x6bf   : > { %7017 = vpow2.f32 %v2769_v18  ;;  %v9154_v8 = vadd.f32 %v3242_v36, %v8389_v4  ;;  %v10819_v4 = vld [vmem:[#allocation39_spill] sm:$0xff]  ;;  %v9176_v39 = vpop.permute.xlu1 %2847  ;;  %v10823_v36 = vld [vmem:[#allocation44_spill] sm:$0xff] }
 0x6c0   : > { %v6491_v24 = vpop.f32.mrf.mxu0 }
 0x6c1   : > { %v9174_v15 = vadd.f32 %v6491_v24, %v10820_v0 }
 0x6c2   : > { %v3255_v1 = vpop.f32.mrf.mxu0 }
 0x6c3   : > { %v9186_v55 = vadd.f32 %v3255_v1, %v10822_v9 }
 0x6c4   : > { %v6492_v34 = vpop.f32.mrf.mxu0 }
 0x6c5   : > { %v9180_v5 = vadd.f32 %v6492_v34, %v10821_v42  ;;  %v2854_v34 = vpop.permute.xlu0 %2853 }
 0x6c6   : > { %v3258_v26 = vpop.f32.mrf.mxu0 }
 0x6c7   : > { %v9170_v44 = vadd.f32 %v3258_v26, %v10819_v4 }
 0x6c9   : > { %v9137_v14 = vpop.eup %7011  ;;  %v2852_v9 = vpop.permute.xlu0 %2851 }
 0x6ca   : > { %2799 = vadd.xlane.f32.xlu1 %v9137_v14  ;;  %v9140_v25 = vpop.eup %7013 }
 0x6cb   : > { %v9143_v53 = vpop.eup %7015 }
 0x6cc   : > { %v9146_v28 = vpop.eup %7017 }
 0x6ce   : > { %2795 = vadd.xlane.f32.xlu1 %v9140_v25 }
 0x6d2   : > { %2797 = vadd.xlane.f32.xlu0 %v9143_v53 }
 0x6d6   : > { %2801 = vadd.xlane.f32.xlu0 %v9146_v28 }
 0x6da   : > { %3302 = vmax.xlane.f32.xlu0 %v9150_v51 }
 0x6de   : > { %3304 = vmax.xlane.f32.xlu0 %v9154_v8 }
 0x6df   : > { %2843 = vrot.lane.b32.xlu1 %v10778_v47, %s7572_s15 }
 0x6e2   : > { %3306 = vmax.xlane.f32.xlu0 %v9160_v31 }
 0x6e6   : > { %3308 = vmax.xlane.f32.xlu0 %v9164_v41 }
 0x6ea   : > { %3312 = vmax.xlane.f32.xlu0 %v9170_v44 }
 0x6ee   : > { %3314 = vmax.xlane.f32.xlu0 %v9174_v15 }
 0x6f0   : > { %v2776_v32 = vpop.xlane.xlu1 %2775 }
 0x6f1   : > { %7019 = vrcp.f32 %v2776_v32 }
 0x6f2   : > { %3316 = vmax.xlane.f32.xlu0 %v9180_v5 }
 0x6f4   : > { %v2772_v52 = vpop.xlane.xlu1 %2771 }
 0x6f8   : > { %v2778_v43 = vpop.xlane.xlu1 %2777 }
 0x6f9   : > { %7021 = vrcp.f32 %v2778_v43 }
 0x6fc   : > { %v2774_v4 = vpop.xlane.xlu1 %2773 }
 0x6fd   : > { %v6351_v13 = vpop.f32.mrf.mxu1  ;;  %7023 = vrcp.f32 %v2774_v4 }
 0x6fe   : > { %v7020_v7 = vpop.eup %7019  ;;  %7025 = vrcp.f32 %v2772_v52 }
 0x6ff   : > { %v2290_v63 = vpop.f32.mrf.mxu1  ;;  %v9194_v1 = vmul.f32 %v7020_v7, %v9081_v38 }
 0x701   : > { %v6352_v46 = vpop.f32.mrf.mxu1 }
 0x702   : > { %v2354_v54 = vpack.c.bf16 %v6352_v46, %v6351_v13  ;;  %v10824_v13 = vld [vmem:[#allocation43_spill] sm:$0xff]  ;;  %v10825_v46 = vld [vmem:[#allocation42_spill] sm:$0xff] }
 0x703   : > { %v6495_v17 = vpop.f32.mrf.mxu0  ;;  %3310 = vmax.xlane.f32.xlu1 %v9186_v55  ;;  %v2293_v33 = vpop.f32.mrf.mxu1 }
 0x704   : > { %v2353_v21 = vpack.c.bf16 %v2293_v33, %v2290_v63  ;;  %v9209_v7 = vadd.f32 %v6495_v17, %v10825_v46 }
 0x705   : > { %v3271_v18 = vpop.f32.mrf.mxu0  ;;  %v6355_v11 = vpop.f32.mrf.mxu1 }
 0x706   : > { %v7022_v22 = vpop.eup %7021  ;;  %v9190_v24 = vadd.f32 %v3271_v18, %v10823_v36  ;;  %6369 = vmatprep.mubr.msk.bf16.mxu1 %vm1323_vm0, %v2353_v21  ;;  %v10826_v18 = vld [vmem:[#allocation45_spill] sm:$0xff] }
 0x707   : > { %v6496_v2 = vpop.f32.mrf.mxu0  ;;  %v9197_v26 = vmul.f32 %v7022_v22, %v9087_v62  ;;  %v2306_v0 = vpop.f32.mrf.mxu1  ;;  %6370 = vmatmul.mubr.msk.bf16.vlgmr.msra.gmra.mxu1 %vm1323_vm0, %v2354_v54 }
 0x708   : > { %3318 = vmax.xlane.f32.xlu0 %v9190_v24  ;;  %6418 = vmatpush3.bf16.msra.mxu1 %v9132_v10  ;;  %v9215_v22 = vadd.f32 %v6496_v2, %v10826_v18 }
 0x709   : > { %v3274_v42 = vpop.f32.mrf.mxu0  ;;  %v2836_v32 = vpack.c.bf16 %v9197_v26, %v9194_v1  ;;  %6419 = vmatprep.subr.bf16.mxu1 %v2856_v40  ;;  %v6356_v43 = vpop.f32.mrf.mxu1 }
 0x70a   : > { %v9205_v38 = vadd.f32 %v3274_v42, %v10824_v13  ;;  %v2356_v10 = vpack.c.bf16 %v6356_v43, %v6355_v11 }
 0x70b   : > { %v2309_v62 = vpop.f32.mrf.mxu1 }
 0x70c   : > { %3320 = vmax.xlane.f32.xlu0 %v9205_v38  ;;  %v2355_v63 = vpack.c.bf16 %v2309_v62, %v2306_v0  ;;  %6420 = vmatpush3.bf16.msra.mxu1 %v2856_v40  ;;  %v7024_v0 = vpop.eup %7023 }
 0x70d   : > { %6421 = vmatprep.subr.bf16.mxu1 %v2854_v34  ;;  %v6359_v33 = vpop.f32.mrf.mxu1  ;;  %v7026_v2 = vpop.eup %7025  ;;  %v2820_v13 = vmul.f32 %v7024_v0, %v9090_v20 }
 0x70e   : > { %6373 = vmatprep.mubr.msk.bf16.mxu1 %vm1323_vm0, %v2355_v63 }
 0x70f   : > { %v2322_v21 = vpop.f32.mrf.mxu1  ;;  %6374 = vmatmul.mubr.msk.bf16.gmra.mxu1 %vm1323_vm0, %v2356_v10 }
 0x710   : > { %3322 = vmax.xlane.f32.xlu0 %v9209_v7  ;;  %6422 = vmatpush3.bf16.msra.mxu1 %v2854_v34 }
 0x711   : > { %6423 = vmatprep.subr.bf16.mxu1 %v2852_v9  ;;  %v6360_v40 = vpop.f32.mrf.mxu1 }
 0x712   : > { %v2784_v52 = vpop.xlane.xlu0 %2783  ;;  %v2358_v11 = vpack.c.bf16 %v6360_v40, %v6359_v33  ;;  %v10827_v40 = vld [vmem:[#allocation46_spill] sm:$0xff] }
 0x713   : > { %v2325_v54 = vpop.f32.mrf.mxu1 }
 0x714   : > { %3324 = vmax.xlane.f32.xlu0 %v9215_v22  ;;  %v2357_v17 = vpack.c.bf16 %v2325_v54, %v2322_v21  ;;  %6424 = vmatpush3.bf16.msra.mxu1 %v2852_v9  ;;  %v2819_v9 = vmul.f32 %v7026_v2, %v9084_v56 }
 0x715   : > { %6425 = vmatprep.subr.bf16.mxu1 %v9166_v3  ;;  %v6363_v36 = vpop.f32.mrf.mxu1 }
 0x716   : > { %v2780_v4 = vpop.xlane.xlu0 %2779  ;;  %6377 = vmatprep.mubr.msk.bf16.mxu1 %vm1323_vm0, %v2357_v17  ;;  %v2835_v33 = vpack.c.bf16 %v2820_v13, %v2819_v9  ;;  %v10828_v17 = vld [vmem:[#allocation48_spill] sm:$0xff]  ;;  %v10830_v13 = vld [vmem:[#allocation49_spill] sm:$0xff] }
 0x717   : > { %v2338_v34 = vpop.f32.mrf.mxu1  ;;  %6378 = vmatmul.mubr.msk.bf16.gmra.mxu1 %vm1323_vm0, %v2358_v11  ;;  %7027 = vrcp.f32 %v2780_v4 }
 0x718   : > { %6426 = vmatpush3.bf16.msra.mxu1 %v9166_v3 }
 0x719   : > { %6427 = vmatprep.subr.bf16.mxu1 %v9176_v39  ;;  %v6364_v42 = vpop.f32.mrf.mxu1 }
 0x71a   : > { %v2786_v43 = vpop.xlane.xlu0 %2785  ;;  %v2360_v46 = vpack.c.bf16 %v6364_v42, %v6363_v36  ;;  %v2782_v36 = vpop.xlane.xlu1 %2781 }
 0x71b   : > { %v2341_v62 = vpop.f32.mrf.mxu1  ;;  %7029 = vrcp.f32 %v2782_v36 }
 0x71c   : > { %v2359_v63 = vpack.c.bf16 %v2341_v62, %v2338_v34  ;;  %6428 = vmatpush3.bf16.msra.mxu1 %v9176_v39  ;;  %v10829_v34 = vld [vmem:[#allocation47_spill] sm:$0xff]  ;;  %7031 = vrcp.f32 %v2786_v43  ;;  %v6744_v43 = vld [vmem:[#allocation10 + $0x20] sm:$0xff]  }
 0x71e   : > { %v2792_v10 = vpop.xlane.xlu0 %2791  ;;  %6381 = vmatprep.mubr.msk.bf16.mxu1 %vm1323_vm0, %v2359_v63  ;;  %v2788_v42 = vpop.xlane.xlu1 %2787 }
 0x71f   : > { %6382 = vmatmul.mubr.msk.bf16.gmra.mxu1 %vm1323_vm0, %v2360_v46 }
 0x720   : > { %6433 = vmatprep.mubr.bf16.mxu1 %v2835_v33  ;;  %v6743_v33 = vld [vmem:[#allocation10 + $0x28] sm:$0xff]  }
 0x722   : > { %v2794_v3 = vpop.xlane.xlu0 %2793 }
 0x724   : > { %v7028_v46 = vpop.eup %7027 }
 0x726   : > { %v2790_v21 = vpop.xlane.xlu0 %2789 }
 0x727   : > { %7033 = vrcp.f32 %v2790_v21 }
 0x728   : > { %7035 = vrcp.f32 %v2784_v52  ;;  %v7030_v4 = vpop.eup %7029 }
 0x729   : > { %7037 = vrcp.f32 %v2788_v42  ;;  %v2824_v52 = vmul.f32 %v7030_v4, %v9101_v16 }
 0x72a   : > { %v2846_v18 = vpop.permute.xlu0 %2845  ;;  %7039 = vrcp.f32 %v2794_v3 }
 0x72b   : > { %6429 = vmatprep.subr.bf16.mxu1 %v2846_v18  ;;  %7041 = vrcp.f32 %v2792_v10 }
 0x72c   : > { %6430 = vmatpush3.bf16.msra.mxu1 %v2846_v18 }
 0x744   : > { %v6499_v20 = vpop.f32.mrf.mxu0 }
 0x745   : > { %v9229_v54 = vadd.f32 %v6499_v20, %v10827_v40  ;;  %v2823_v40 = vmul.f32 %v7028_v46, %v9110_v61 }
 0x746   : > { %v3287_v39 = vpop.f32.mrf.mxu0 }
 0x747   : > { %v9232_v56 = vadd.f32 %v3287_v39, %v10828_v17  ;;  %3330 = vmax.xlane.f32.xlu1 %v9229_v54  ;;  %v2837_v3 = vpack.c.bf16 %v2824_v52, %v2823_v40 }
 0x748   : > { %v6500_v11 = vpop.f32.mrf.mxu0 }
 0x749   : > { %3326 = vmax.xlane.f32.xlu0 %v9232_v56  ;;  %v9241_v62 = vadd.f32 %v6500_v11, %v10830_v13 }
 0x74a   : > { %v3290_v0 = vpop.f32.mrf.mxu0 }
 0x74b   : > { %v9237_v2 = vadd.f32 %v3290_v0, %v10829_v34 }
 0x74d   : > { %3328 = vmax.xlane.f32.xlu0 %v9237_v2 }
 0x751   : > { %3332 = vmax.xlane.f32.xlu0 %v9241_v62 }
 0x753   : > { %v2800_v63 = vpop.xlane.xlu1 %2799 }
 0x757   : > { %v2796_v9 = vpop.xlane.xlu1 %2795 }
 0x758   : > { %3468 = vrot.lane.b32.xlu1 %v10815_v48, %s7573_s3  ;;  %v7032_v48 = vpop.eup %7031 }
 0x759   : > { %v7034_v39 = vpop.eup %7033  ;;  %v2826_v16 = vmul.f32 %v7032_v48, %v9116_v35 }
 0x75a   : > { %v7036_v61 = vpop.eup %7035  ;;  %v2828_v17 = vmul.f32 %v7034_v39, %v9125_v37 }
 0x75b   : > { %v2798_v18 = vpop.xlane.xlu0 %2797  ;;  %v2844_v20 = vpop.permute.xlu1 %2843 }
 0x75c   : > { %7043 = vrcp.f32 %v2798_v18  ;;  %3466 = vrot.lane.b32.xlu1 %v10812_v19, %s7573_s3  ;;  %6431 = vmatprep.subr.bf16.mxu1 %v2844_v20  ;;  %v7038_v19 = vpop.eup %7037 }
 0x75d   : > { %7045 = vrcp.f32 %v2796_v9  ;;  %6432 = vmatpush3.bf16.msra.mxu1 %v2844_v20  ;;  %v2827_v1 = vmul.f32 %v7038_v19, %v9112_v12 }
 0x75e   : > { %6449 = vmatprep.subr.bf16.mxu1 %v6743_v33 }
 0x75f   : > { %v2802_v21 = vpop.xlane.xlu0 %2801  ;;  %v2839_v35 = vpack.c.bf16 %v2828_v17, %v2827_v1 }
 0x760   : > { %3462 = vrot.lane.b32.xlu1 %v10779_v58, %s7573_s3  ;;  %6434 = vmatmul.mubr.bf16.vlgmr.msra.gmra.mxu1 %v2836_v32  ;;  %7047 = vrcp.f32 %v2802_v21  ;;  %v2825_v58 = vmul.f32 %v7036_v61, %v9107_v57  ;;  %v7040_v32 = vpop.eup %7039 }
 0x761   : > { %6437 = vmatprep.mubr.bf16.mxu1 %v2837_v3  ;;  %6450 = vmatpush3.bf16.msra.mxu1 %v6743_v33  ;;  %7049 = vrcp.f32 %v2800_v63  ;;  %v7042_v36 = vpop.eup %7041  ;;  %v2830_v34 = vmul.f32 %v7040_v32, %v9122_v60 }
 0x762   : > { %6451 = vmatprep.subr.bf16.mxu1 %v6744_v43  ;;  %v2838_v26 = vpack.c.bf16 %v2826_v16, %v2825_v58  ;;  %v2829_v12 = vmul.f32 %v7042_v36, %v9119_v30 }
 0x763   : > { %v3303_v10 = vpop.xlane.xlu0 %3302 }
 0x764   : > { %3460 = vrot.lane.b32.xlu1 %v10813_v27, %s7573_s3  ;;  %v2840_v13 = vpack.c.bf16 %v2830_v34, %v2829_v12  ;;  %v3334_v60 = vsub.f32 %v9150_v51, %v3303_v10  ;;  %v7278_v12 = vld [vmem:[%s7828_s21] sm:$0xff] }
 0x765   : > { %6452 = vmatpush3.bf16.msra.mxu1 %v6744_v43 }
 0x766   : > { %v3350_v40 = vmul.f32 1.442695, %v3334_v60 }
 0x767   : > { %3464 = vrot.lane.b32.xlu0 %v10816_v59, %s7573_s3  ;;  %v3305_v11 = vpop.xlane.xlu0 %3304 }
 0x768   : > { %6438 = vmatmul.mubr.bf16.gmra.mxu1 %v2838_v26  ;;  %v3335_v48 = vsub.f32 %v9154_v8, %v3305_v11 }
 0x769   : > { %v7044_v0 = vpop.eup %7043  ;;  %6441 = vmatprep.mubr.bf16.mxu1 %v2839_v35 }
 0x76a   : > { %v7046_v37 = vpop.eup %7045  ;;  %v2832_v57 = vmul.f32 %v7044_v0, %v9143_v53  ;;  %v3352_v51 = vmul.f32 1.442695, %v3335_v48 }
 0x76b   : > { %v3307_v27 = vpop.xlane.xlu0 %3306  ;;  %v2831_v42 = vmul.f32 %v7046_v37, %v9140_v25 }
 0x76c   : > { %v3336_v46 = vsub.f32 %v9160_v31, %v3307_v27  ;;  %v7277_v27 = vld [vmem:[%s7828_s21 + $0x10] sm:$0xff] }
 0x76d   : > { %v7048_v63 = vpop.eup %7047  ;;  %v2841_v59 = vpack.c.bf16 %v2832_v57, %v2831_v42  ;;  %v10831_v57 = vld [vmem:[#allocation50_spill] sm:$0xff] }
 0x76e   : > { %v7050_v4 = vpop.eup %7049  ;;  %v2834_v33 = vmul.f32 %v7048_v63, %v9146_v28  ;;  %v3354_v20 = vmul.f32 1.442695, %v3336_v46  ;;  %v10832_v42 = vld [vmem:[#allocation34_spill] sm:$0xff] }
 0x76f   : > { %v3309_v9 = vpop.xlane.xlu0 %3308  ;;  %v2833_v53 = vmul.f32 %v7050_v4, %v9137_v14 }
 0x770   : > { %6442 = vmatmul.mubr.bf16.gmra.mxu1 %v2840_v13  ;;  %7051 = vpow2.f32 %v3354_v20  ;;  %v3337_v52 = vsub.f32 %v9164_v41, %v3309_v9  ;;  %v7279_v13 = vld [vmem:[%s7828_s21 + $0x18] sm:$0xff] }
 0x771   : > { %6445 = vmatprep.mubr.bf16.mxu1 %v2841_v59  ;;  %v2842_v30 = vpack.c.bf16 %v2834_v33, %v2833_v53  ;;  %7053 = vpow2.f32 %v3350_v40  ;;  %v1310_v63 = vadd.f32 %v7279_v13, %v10831_v57  ;;  %v7280_v53 = vld [vmem:[%s7828_s21 + $0x30] sm:$0xff]  ;;  %v10838_v13 = vld [vmem:[#allocation36_spill] sm:$0xff] }
 0x772   : > { %v3356_v28 = vmul.f32 1.442695, %v3337_v52 }
 0x773   : > { %v3313_v18 = vpop.xlane.xlu0 %3312 }
 0x774   : > { %v3339_v21 = vsub.f32 %v9170_v44, %v3313_v18  ;;  %v10834_v18 = vld [vmem:[#allocation22_spill] sm:$0xff] }
 0x775   : > { %v1866_v20 = vadd.f32 %v10834_v18, %v1310_v63 }
 0x776   : > { %v3360_v14 = vmul.f32 1.442695, %v3339_v21  ;;  %v7282_v21 = vld [vmem:[%s7828_s21 + $0x38] sm:$0xff] }
 0x777   : > { %v3315_v25 = vpop.xlane.xlu0 %3314 }
 0x778   : > { %v3340_v43 = vsub.f32 %v9174_v15, %v3315_v25  ;;  %6446 = vmatmul.mubr.bf16.gmra.mxu1 %v2842_v30  ;;  %v7281_v25 = vld [vmem:[%s7828_s21 + $0x20] sm:$0xff] }
 0x779   : > { %v1311_v52 = vadd.f32 %v7281_v25, %v10831_v57  ;;  %v10840_v25 = vld [vmem:[#allocation51_spill] sm:$0xff] }
 0x77a   : > { %v3362_v31 = vmul.f32 1.442695, %v3340_v43 }
 0x77b   : > { %v3317_v39 = vpop.xlane.xlu0 %3316 }
 0x77c   : > { %7055 = vpow2.f32 %v3362_v31  ;;  %v3341_v44 = vsub.f32 %v9180_v5, %v3317_v39 }
 0x77d   : > { %7057 = vpow2.f32 %v3356_v28  ;;  %v9275_v3 = vpop.eup %7051  ;;  %v10835_v28 = vld [vmem:[#allocation23_spill] sm:$0xff] }
 0x77e   : > { %7059 = vpow2.f32 %v3352_v51  ;;  %v9278_v41 = vpop.eup %7053  ;;  %v3364_v17 = vmul.f32 1.442695, %v3341_v44  ;;  %v10836_v44 = vld [vmem:[#allocation26_spill] sm:$0xff] }
 0x77f   : > { %7061 = vpow2.f32 %v3360_v14  ;;  %v1314_v14 = vadd.f32 %v7282_v21, %v10831_v57 }
 0x786   : > { %3386 = vadd.xlane.f32.xlu0 %v9275_v3 }
 0x789   : > { %v9280_v15 = vpop.eup %7055 }
 0x78a   : > { %3382 = vadd.xlane.f32.xlu0 %v9278_v41  ;;  %3394 = vadd.xlane.f32.xlu1 %v9280_v15  ;;  %v9284_v61 = vpop.eup %7057 }
 0x78b   : > { %v9289_v10 = vpop.eup %7059 }
 0x78c   : > { %v3311_v8 = vpop.xlane.xlu1 %3310  ;;  %v9292_v58 = vpop.eup %7061 }
 0x78d   : > { %v3338_v19 = vsub.f32 %v9186_v55, %v3311_v8 }
 0x78e   : > { %3388 = vadd.xlane.f32.xlu0 %v9284_v61 }
 0x78f   : > { %v3358_v16 = vmul.f32 1.442695, %v3338_v19  ;;  %v1867_v19 = vadd.f32 %v10836_v44, %v1311_v52 }
 0x791   : > { %7063 = vpow2.f32 %v3358_v16  ;;  %v3319_v55 = vpop.xlane.xlu0 %3318 }
 0x792   : > { %3384 = vadd.xlane.f32.xlu0 %v9289_v10  ;;  %7065 = vpow2.f32 %v3364_v17  ;;  %v3342_v11 = vsub.f32 %v9190_v24, %v3319_v55  ;;  %v1307_v24 = vadd.f32 %v7278_v12, %v10831_v57 }
 0x794   : > { %v3366_v35 = vmul.f32 1.442695, %v3342_v11  ;;  %v10837_v11 = vld [vmem:[#allocation33_spill] sm:$0xff] }
 0x795   : > { %v3321_v26 = vpop.xlane.xlu0 %3320 }
 0x796   : > { %3392 = vadd.xlane.f32.xlu0 %v9292_v58  ;;  %7067 = vpow2.f32 %v3366_v35  ;;  %v1870_v35 = vadd.f32 %v10837_v11, %v1314_v14 }
 0x799   : > { %v3323_v32 = vpop.xlane.xlu0 %3322 }
 0x79a   : > { %v3344_v36 = vsub.f32 %v9209_v7, %v3323_v32 }
 0x79c   : > { %v3370_v37 = vmul.f32 1.442695, %v3344_v36  ;;  %v7283_v36 = vld [vmem:[%s7828_s21 + $0x50] sm:$0xff] }
 0x79d   : > { %v3325_v0 = vpop.xlane.xlu0 %3324 }
 0x79e   : > { %v9295_v1 = vpop.eup %7063  ;;  %7069 = vpow2.f32 %v3370_v37 }
 0x79f   : > { %3390 = vadd.xlane.f32.xlu1 %v9295_v1  ;;  %v9298_v5 = vpop.eup %7065 }
 0x7a3   : > { %3396 = vadd.xlane.f32.xlu1 %v9298_v5  ;;  %v9321_v4 = vpop.eup %7067 }
 0x7ab   : > { %v9333_v31 = vpop.eup %7069 }
 0x7ac   : > { %3458 = vrot.lane.b32.xlu0 %v10814_v6, %s7573_s3  ;;  %v3345_v6 = vsub.f32 %v9215_v22, %v3325_v0  ;;  %v10833_v22 = vld [vmem:[#allocation28_spill] sm:$0xff]  ;;  %v1317_v0 = vadd.f32 %v7283_v36, %v10831_v57 }
 0x7ad   : > { %v1863_v59 = vadd.f32 %v10833_v22, %v1307_v24 }
 0x7ae   : > { %v3372_v34 = vmul.f32 1.442695, %v3345_v6  ;;  %v1873_v63 = vadd.f32 %v10838_v13, %v1317_v0 }
 0x7b0   : > { %7071 = vpow2.f32 %v3372_v34 }
 0x7b4   : > { %3456 = vrot.lane.b32.xlu1 %v10781_v49, %s7573_s3  ;;  %v1309_v49 = vadd.f32 %v7277_v27, %v10831_v57 }
 0x7b6   : > { %v1865_v7 = vadd.f32 %v10832_v42, %v1309_v49  ;;  %v7284_v49 = vld [vmem:[%s7828_s21 + $0x40] sm:$0xff] }
 0x7b8   : > { %3454 = vrot.lane.b32.xlu1 %v10778_v47, %s7573_s3  ;;  %v3343_v47 = vsub.f32 %v9205_v38, %v3321_v26  ;;  %v1313_v38 = vadd.f32 %v7280_v53, %v10831_v57  ;;  %s10516_s3 = scalar_lea.vmem [#allocation14], %s5692_s30  ;;  %s5872_s30 = sshll.u32 %s7668_s14, 11 }
 0x7b9   : > { %s5549_s29 = sshll.u32 %s10516_s3, 4  ;;  %s10566_s1 = scalar_lea.hbm %s10626_s13, %s5872_s30  ;;  %s10568_s29 = int_to_ptr.vmem [resolvable:$true] %s5549_s29 }
 0x7ba   : > { %v3368_v33 = vmul.f32 1.442695, %v3343_v47  ;;  %v1869_v51 = vadd.f32 %v10835_v28, %v1313_v38  ;;  %s7476_s20 = scalar_lea.vmem %s10568_s29, 2048  ;;  %s7574_s14 = smov [#allocation14]  }
 0x7bb   : > { %p7477_p12 = scmp.ne.s32.totalorder %s10568_s29, %s7476_s20  ;;  %s7480_s23 = sshll.u32 %s7574_s14, 4  ;;  %s7481_s23 = int_to_ptr.vmem [resolvable:$false] %s7480_s23 }
 0x7bc   : > { %7073 = vpow2.f32 %v3368_v33  ;;  %v10839_v33 = vld [vmem:[#allocation35_spill] sm:$0xff]  ;;  %p7483_p5 = scmp.lt.s32.totalorder %s10568_s29, %s7481_s23 }
 0x7bd   : > { %v9344_v17 = vpop.eup %7071  ;;  %p7478_p0 = pnand %p7477_p12, %p10931_p13 }
 0x7bf   : > { %p7479_p2 = pneg %p7478_p0 }
 0x7c7   : > { %v6371_v9 = vpop.f32.mrf.mxu1 }
 0x7c8   : > { %v9319_v46 = vadd.f32 %v6371_v9, %v1865_v7 }
 0x7c9   : > { %v2435_v60 = vpop.f32.mrf.mxu1 }
 0x7ca   : > { %v9326_v30 = vadd.f32 %v2435_v60, %v1863_v59 }
 0x7cb   : > { %3398 = vadd.xlane.f32.xlu0 %v9321_v4  ;;  %v6372_v40 = vpop.f32.mrf.mxu1 }
 0x7cc   : > { %v9331_v43 = vadd.f32 %v6372_v40, %v1866_v20  ;;  %v9370_v40 = vpop.eup %7073 }
 0x7cd   : > { %v9335_v48 = vpop.f32.mrf.mxu1 }
 0x7cf   : > { %3402 = vadd.xlane.f32.xlu0 %v9333_v31  ;;  %v6375_v39 = vpop.f32.mrf.mxu1 }
 0x7d0   : > { %v3331_v8 = vpop.xlane.xlu1 %3330  ;;  %v9342_v16 = vadd.f32 %v6375_v39, %v1869_v51 }
 0x7d1   : > { %v3348_v55 = vsub.f32 %v9229_v54, %v3331_v8  ;;  %v2451_v26 = vpop.f32.mrf.mxu1  ;;  %v1315_v54 = vadd.f32 %v7284_v49, %v10831_v57 }
 0x7d2   : > { %v3327_v32 = vpop.xlane.xlu0 %3326  ;;  %v9350_v37 = vadd.f32 %v2451_v26, %v1867_v19  ;;  %v10841_v26 = vld [vmem:[#allocation53_spill] sm:$0xff] }
 0x7d3   : > { %v3346_v6 = vsub.f32 %v9232_v56, %v3327_v32  ;;  %3404 = vadd.xlane.f32.xlu0 %v9344_v17  ;;  %v6376_v34 = vpop.f32.mrf.mxu1  ;;  %v3378_v47 = vmul.f32 1.442695, %v3348_v55  ;;  %v7285_v56 = vld [vmem:[%s7828_s21 + $0x58] sm:$0xff]  ;;  %v1871_v60 = vadd.f32 %v10839_v33, %v1315_v54 }
 0x7d4   : > { %v9354_v27 = vpop.permute.xlu1 %3468  ;;  %v9358_v24 = vadd.f32 %v6376_v34, %v1870_v35  ;;  %v1318_v9 = vadd.f32 %v7285_v56, %v10831_v57 }
 0x7d5   : > { %v3374_v12 = vmul.f32 1.442695, %v3346_v6  ;;  %6501 = vmatprep.subr.bf16.mxu1 %v9354_v27  ;;  %v9361_v42 = vpop.f32.mrf.mxu1 }
 0x7d6   : > { %v3329_v7 = vpop.xlane.xlu0 %3328  ;;  %v1874_v52 = vadd.f32 %v10840_v25, %v1318_v9 }
 0x7d7   : > { %7075 = vpow2.f32 %v3374_v12  ;;  %v3347_v22 = vsub.f32 %v9237_v2, %v3329_v7  ;;  %v6379_v59 = vpop.f32.mrf.mxu1  ;;  %v7286_v2 = vld [vmem:[%s7828_s21 + $0x60] sm:$0xff] }
 0x7d8   : > { %v9368_v20 = vadd.f32 %v6379_v59, %v1873_v63  ;;  %7077 = vpow2.f32 %v3378_v47  ;;  %v1319_v14 = vadd.f32 %v7286_v2, %v10831_v57  ;;  %v3467_v54 = vpop.permute.xlu1 %3466 }
 0x7d9   : > { %v3376_v18 = vmul.f32 1.442695, %v3347_v22  ;;  %v2467_v53 = vpop.f32.mrf.mxu1 }
 0x7da   : > { %v3333_v38 = vpop.xlane.xlu0 %3332  ;;  %v9373_v28 = vadd.f32 %v2467_v53, %v1871_v60  ;;  %v1875_v55 = vadd.f32 %v9042_v50, %v1319_v14 }
 0x7db   : > { %7079 = vpow2.f32 %v3376_v18  ;;  %v3349_v51 = vsub.f32 %v9241_v62, %v3333_v38  ;;  %v6380_v21 = vpop.f32.mrf.mxu1 }
 0x7dc   : > { %3400 = vadd.xlane.f32.xlu1 %v9370_v40  ;;  %v9379_v8 = vadd.f32 %v6380_v21, %v1874_v52  ;;  %v3463_v13 = vpop.permute.xlu1 %3462 }
 0x7dd   : > { %v3380_v39 = vmul.f32 1.442695, %v3349_v51  ;;  %v9381_v44 = vpop.f32.mrf.mxu1 }
 0x7de   : > { %v3465_v34 = vpop.permute.xlu0 %3464 }
 0x7df   : > { %7081 = vpow2.f32 %v3380_v39  ;;  %v6383_v19 = vpop.f32.mrf.mxu1 }
 0x7e0   : > { %v9385_v32 = vadd.f32 %v6383_v19, %v10841_v26  ;;  %v3461_v60 = vpop.permute.xlu1 %3460 }
 0x7e1   : > { %v2483_v11 = vpop.f32.mrf.mxu1 }
 0x7e2   : > { %v9387_v62 = vadd.f32 %v2483_v11, %v1875_v55 }
 0x7e3   : > { %v6384_v36 = vpop.f32.mrf.mxu1 }
 0x7e4   : > { %v9389_v35 = vpop.eup %7075  ;;  %v9392_v57 = vadd.f32 %v6384_v36, %v9047_v45 }
 0x7e5   : > { %3406 = vadd.xlane.f32.xlu1 %v9389_v35  ;;  %v9395_v0 = vpop.eup %7077  ;;  %v9404_v12 = vpop.f32.mrf.mxu1 }
 0x7e8   : > { %v9397_v6 = vpop.eup %7079 }
 0x7e9   : > { %3408 = vadd.xlane.f32.xlu0 %v9397_v6  ;;  %3410 = vadd.xlane.f32.xlu1 %v9395_v0 }
 0x7ec   : > { %v9401_v50 = vpop.eup %7081 }
 0x7ed   : > { %3412 = vadd.xlane.f32.xlu0 %v9401_v50 }
 0x80f   : > { %v3387_v49 = vpop.xlane.xlu0 %3386 }
 0x813   : > { %v3383_v45 = vpop.xlane.xlu0 %3382  ;;  %v3395_v25 = vpop.xlane.xlu1 %3394 }
 0x817   : > { %v3389_v63 = vpop.xlane.xlu0 %3388 }
 0x81b   : > { %v3385_v18 = vpop.xlane.xlu0 %3384 }
 0x81c   : > { %7083 = vrcp.f32 %v3385_v18 }
 0x81d   : > { %7085 = vrcp.f32 %v3383_v45 }
 0x81e   : > { %7087 = vrcp.f32 %v3389_v63 }
 0x820   : > { %v6435_v47 = vpop.f32.mrf.mxu1 }
 0x822   : > { %v2901_v7 = vpop.f32.mrf.mxu1 }
 0x824   : > { %v6436_v56 = vpop.f32.mrf.mxu1 }
 0x825   : > { %v2965_v59 = vpack.c.bf16 %v6436_v56, %v6435_v47 }
 0x826   : > { %v2904_v9 = vpop.f32.mrf.mxu1 }
 0x827   : > { %v2964_v22 = vpack.c.bf16 %v2904_v9, %v2901_v7 }
 0x828   : > { %v6439_v33 = vpop.f32.mrf.mxu1  ;;  %v3391_v14 = vpop.xlane.xlu1 %3390 }
 0x829   : > { %6453 = vmatprep.mubr.msk.bf16.mxu1 %vm1323_vm0, %v2964_v22  ;;  %7089 = vrcp.f32 %v3391_v14  ;;  %v7084_v45 = vpop.eup %7083 }
 0x82a   : > { %v2917_v53 = vpop.f32.mrf.mxu1  ;;  %6454 = vmatmul.mubr.msk.bf16.vlgmr.msra.gmra.mxu1 %vm1323_vm0, %v2965_v59  ;;  %7091 = vrcp.f32 %v3387_v49  ;;  %v7086_v7 = vpop.eup %7085  ;;  %v3431_v56 = vmul.f32 %v7084_v45, %v9289_v10 }
 0x82b   : > { %6502 = vmatpush3.bf16.msra.mxu1 %v9354_v27  ;;  %v3393_v27 = vpop.xlane.xlu0 %3392  ;;  %v3430_v22 = vmul.f32 %v7086_v7, %v9278_v41 }
 0x82c   : > { %6503 = vmatprep.subr.bf16.mxu1 %v3467_v54  ;;  %v6440_v38 = vpop.f32.mrf.mxu1  ;;  %7093 = vrcp.f32 %v3393_v27  ;;  %v3397_v26 = vpop.xlane.xlu1 %3396 }
 0x82d   : > { %v2967_v21 = vpack.c.bf16 %v6440_v38, %v6439_v33  ;;  %7095 = vrcp.f32 %v3397_v26  ;;  %v7088_v33 = vpop.eup %7087  ;;  %v3446_v18 = vpack.c.bf16 %v3431_v56, %v3430_v22 }
 0x82e   : > { %v2920_v52 = vpop.f32.mrf.mxu1  ;;  %7097 = vrcp.f32 %v3395_v25  ;;  %v3433_v25 = vmul.f32 %v7088_v33, %v9284_v61 }
 0x82f   : > { %v2966_v51 = vpack.c.bf16 %v2920_v52, %v2917_v53  ;;  %6504 = vmatpush3.bf16.msra.mxu1 %v3467_v54 }
 0x830   : > { %6505 = vmatprep.subr.bf16.mxu1 %v3465_v34  ;;  %v6443_v2 = vpop.f32.mrf.mxu1  ;;  %v3457_v63 = vpop.permute.xlu1 %3456 }
 0x831   : > { %6457 = vmatprep.mubr.msk.bf16.mxu1 %vm1323_vm0, %v2966_v51 }
 0x832   : > { %v2933_v39 = vpop.f32.mrf.mxu1  ;;  %6458 = vmatmul.mubr.msk.bf16.gmra.mxu1 %vm1323_vm0, %v2967_v21 }
 0x833   : > { %6506 = vmatpush3.bf16.msra.mxu1 %v3465_v34  ;;  %v3459_v34 = vpop.permute.xlu0 %3458 }
 0x834   : > { %6507 = vmatprep.subr.bf16.mxu1 %v3463_v13  ;;  %v6444_v19 = vpop.f32.mrf.mxu1  ;;  %v3455_v38 = vpop.permute.xlu1 %3454 }
 0x835   : > { %v2969_v36 = vpack.c.bf16 %v6444_v19, %v6443_v2 }
 0x836   : > { %v2936_v55 = vpop.f32.mrf.mxu1 }
 0x837   : > { %v2968_v11 = vpack.c.bf16 %v2936_v55, %v2933_v39  ;;  %6508 = vmatpush3.bf16.msra.mxu1 %v3463_v13 }
 0x838   : > { %6509 = vmatprep.subr.bf16.mxu1 %v3461_v60  ;;  %v6447_v54 = vpop.f32.mrf.mxu1 }
 0x839   : > { %6461 = vmatprep.mubr.msk.bf16.mxu1 %vm1323_vm0, %v2968_v11 }
 0x83a   : > { %v2949_v47 = vpop.f32.mrf.mxu1  ;;  %6462 = vmatmul.mubr.msk.bf16.gmra.mxu1 %vm1323_vm0, %v2969_v36 }
 0x83b   : > { %6510 = vmatpush3.bf16.msra.mxu1 %v3461_v60  ;;  %v7090_v60 = vpop.eup %7089 }
 0x83c   : > { %6511 = vmatprep.subr.bf16.mxu1 %v3459_v34  ;;  %v6448_v49 = vpop.f32.mrf.mxu1  ;;  %v7092_v53 = vpop.eup %7091  ;;  %v3434_v52 = vmul.f32 %v7090_v60, %v9295_v1 }
 0x83d   : > { %v2971_v59 = vpack.c.bf16 %v6448_v49, %v6447_v54  ;;  %v7094_v10 = vpop.eup %7093  ;;  %v3432_v41 = vmul.f32 %v7092_v53, %v9275_v3 }
 0x83e   : > { %v2952_v13 = vpop.f32.mrf.mxu1  ;;  %v3435_v51 = vmul.f32 %v7094_v10, %v9292_v58  ;;  %v7096_v2 = vpop.eup %7095 }
 0x83f   : > { %v2970_v9 = vpack.c.bf16 %v2952_v13, %v2949_v47  ;;  %6512 = vmatpush3.bf16.msra.mxu1 %v3459_v34  ;;  %v3447_v21 = vpack.c.bf16 %v3433_v25, %v3432_v41  ;;  %v7098_v39 = vpop.eup %7097  ;;  %v3437_v27 = vmul.f32 %v7096_v2, %v9298_v5 }
 0x840   : > { %6513 = vmatprep.subr.bf16.mxu1 %v3457_v63  ;;  %v3448_v14 = vpack.c.bf16 %v3435_v51, %v3434_v52  ;;  %v3436_v19 = vmul.f32 %v7098_v39, %v9280_v15 }
 0x841   : > { %6465 = vmatprep.mubr.msk.bf16.mxu1 %vm1323_vm0, %v2970_v9 }
 0x842   : > { %6466 = vmatmul.mubr.msk.bf16.gmra.mxu1 %vm1323_vm0, %v2971_v59  ;;  %v3449_v55 = vpack.c.bf16 %v3437_v27, %v3436_v19 }
 0x843   : > { %6514 = vmatpush3.bf16.msra.mxu1 %v3457_v63  ;;  %6517 = vmatprep.mubr.bf16.mxu1 %v3446_v18 }
 0x844   : > { %6515 = vmatprep.subr.bf16.mxu1 %v3455_v38 }
 0x847   : > { %6516 = vmatpush3.bf16.msra.mxu1 %v3455_v38  ;;  %v6746_v38 = vld [vmem:[#allocation10 + $0x30] sm:$0xff]  }
 0x84a   : > { %6518 = vmatmul.mubr.bf16.vlgmr.msra.gmra.mxu1 %v3447_v21 }
 0x84b   : > { %6521 = vmatprep.mubr.bf16.mxu1 %v3448_v14 }
 0x852   : > { %6522 = vmatmul.mubr.bf16.gmra.mxu1 %v3449_v55 }
 0x854   : > { %v3399_v61 = vpop.xlane.xlu0 %3398 }
 0x858   : > { %v3403_v26 = vpop.xlane.xlu0 %3402 }
 0x85c   : > { %v3405_v1 = vpop.xlane.xlu0 %3404 }
 0x85d   : > { %7099 = vrcp.f32 %v3405_v1 }
 0x85e   : > { %7101 = vrcp.f32 %v3399_v61  ;;  %v7287_v61 = vld [vmem:[%s7828_s21 + $0x68] sm:$0xff] }
 0x85f   : > { %7103 = vrcp.f32 %v3403_v26 }
 0x865   : > { %v3401_v3 = vpop.xlane.xlu1 %3400 }
 0x866   : > { %7105 = vrcp.f32 %v3401_v3 }
 0x86a   : > { %v7100_v11 = vpop.eup %7099 }
 0x86b   : > { %v7102_v36 = vpop.eup %7101  ;;  %v3441_v15 = vmul.f32 %v7100_v11, %v9344_v17 }
 0x86c   : > { %v7104_v54 = vpop.eup %7103  ;;  %v3438_v34 = vmul.f32 %v7102_v36, %v9321_v4  ;;  %v6745_v4 = vld [vmem:[#allocation10 + $0x38] sm:$0xff]  }
 0x86d   : > { %v3440_v49 = vmul.f32 %v7104_v54, %v9333_v31  ;;  %6533 = vmatprep.subr.bf16.mxu1 %v6745_v4 }
 0x86e   : > { %v3407_v58 = vpop.xlane.xlu1 %3406  ;;  %6534 = vmatpush3.bf16.msra.mxu1 %v6745_v4 }
 0x86f   : > { %7107 = vrcp.f32 %v3407_v58  ;;  %v3451_v13 = vpack.c.bf16 %v3441_v15, %v3440_v49  ;;  %6535 = vmatprep.subr.bf16.mxu1 %v6746_v38 }
 0x872   : > { %v3409_v45 = vpop.xlane.xlu0 %3408  ;;  %v3411_v47 = vpop.xlane.xlu1 %3410  ;;  %6536 = vmatpush3.bf16.msra.mxu1 %v6746_v38 }
 0x873   : > { %v7106_v5 = vpop.eup %7105  ;;  %7109 = vrcp.f32 %v3409_v45 }
 0x874   : > { %v3439_v7 = vmul.f32 %v7106_v5, %v9370_v40  ;;  %7111 = vrcp.f32 %v3411_v47 }
 0x876   : > { %v3413_v63 = vpop.xlane.xlu0 %3412  ;;  %v3450_v56 = vpack.c.bf16 %v3439_v7, %v3438_v34 }
 0x877   : > { %7113 = vrcp.f32 %v3413_v63 }
 0x878   : > { %6525 = vmatprep.mubr.bf16.mxu1 %v3450_v56 }
 0x879   : > { %6526 = vmatmul.mubr.bf16.gmra.mxu1 %v3451_v13 }
 0x87c   : > { %v7108_v9 = vpop.eup %7107 }
 0x87d   : > { %v3442_v59 = vmul.f32 %v7108_v9, %v9389_v35 }
 0x880   : > { %v7110_v22 = vpop.eup %7109 }
 0x881   : > { %v3443_v33 = vmul.f32 %v7110_v22, %v9397_v6  ;;  %v7112_v17 = vpop.eup %7111 }
 0x882   : > { %v3444_v40 = vmul.f32 %v7112_v17, %v9395_v0 }
 0x883   : > { %v3452_v18 = vpack.c.bf16 %v3443_v33, %v3442_v59 }
 0x884   : > { %v7114_v60 = vpop.eup %7113 }
 0x885   : > { %6529 = vmatprep.mubr.bf16.mxu1 %v3452_v18  ;;  %v3445_v31 = vmul.f32 %v7114_v60, %v9401_v50 }
 0x887   : > { %v3453_v53 = vpack.c.bf16 %v3445_v31, %v3444_v40 }
 0x889   : > { %6530 = vmatmul.mubr.bf16.gmra.mxu1 %v3453_v53  ;;  %v7289_v53 = vld [vmem:[%s7828_s21 + $0x8] sm:$0xff] }
 0x8ea   : > { %v6455_v10 = vpop.f32.mrf.mxu1 }
 0x8eb   : > { %v9432_v35 = vadd.f32 %v6455_v10, %v9319_v46 }
 0x8ec   : > { %v3046_v6 = vpop.f32.mrf.mxu1 }
 0x8ed   : > { %v9435_v25 = vadd.f32 %v3046_v6, %v9326_v30  ;;  %v10842_v6 = vld [vmem:[#allocation31_spill] sm:$0xff] }
 0x8ee   : > { %v6456_v52 = vpop.f32.mrf.mxu1 }
 0x8ef   : > { %v9438_v0 = vadd.f32 %v6456_v52, %v9331_v43 }
 0x8f0   : > { %v9440_v50 = vpop.f32.mrf.mxu1 }
 0x8f2   : > { %v6459_v41 = vpop.f32.mrf.mxu1 }
 0x8f3   : > { %v9443_v51 = vadd.f32 %v6459_v41, %v9342_v16 }
 0x8f4   : > { %v3062_v21 = vpop.f32.mrf.mxu1 }
 0x8f5   : > { %v9446_v2 = vadd.f32 %v3062_v21, %v9350_v37 }
 0x8f6   : > { %v6460_v46 = vpop.f32.mrf.mxu1 }
 0x8f7   : > { %v9449_v14 = vadd.f32 %v6460_v46, %v9358_v24  ;;  %v9468_v24 = vld [vmem:[%s10619_s6] ss:$0 sm:$0xff] }
 0x8f8   : > { %v9451_v30 = vpop.f32.mrf.mxu1  ;;  %v1320_v26 = vadd.f32 %v9468_v24, %v7287_v61  ;;  %v1308_v38 = vadd.f32 %v7289_v53, %v9468_v24  ;;  %v6776_v53 = vld [vmem:[#allocation11 + $0x6c] ss:$16 sps:$4 sm:$0xff]  }
 0x8fa   : > { %v6463_v39 = vpop.f32.mrf.mxu1  ;;  %v1876_v3 = vadd.f32 %v9183_v23, %v1320_v26  ;;  %v1864_v52 = vadd.f32 %v10842_v6, %v1308_v38  ;;  %v6771_v38 = vld [vmem:[#allocation11 + $0x60] ss:$16 sps:$4 sm:$0xff]   ;;  %v6779_v6 = vld [vmem:[#allocation11 + $0x44] ss:$16 sps:$4 sm:$0xff]  }
 0x8fb   : > { %v9454_v43 = vadd.f32 %v6463_v39, %v9368_v20 }
 0x8fc   : > { %v3078_v27 = vpop.f32.mrf.mxu1  ;;  %v2511_v11 = vadd.f32 %v9404_v12, %v1876_v3  ;;  %v2499_v21 = vadd.f32 %v9335_v48, %v1864_v52  ;;  %v6782_v52 = vld [vmem:[#allocation11 + $0x4c] ss:$16 sps:$4 sm:$0xff]  }
 0x8fd   : > { %v9457_v19 = vadd.f32 %v3078_v27, %v9373_v28 }
 0x8fe   : > { %v6464_v16 = vpop.f32.mrf.mxu1  ;;  %v3110_v27 = vadd.f32 %v9440_v50, %v2499_v21  ;;  %v7290_v50 = vld [vmem:[%s7828_s21 + $0x28] sm:$0xff] }
 0x8ff   : > { %v9460_v55 = vadd.f32 %v6464_v16, %v9379_v8  ;;  %v1312_v3 = vadd.f32 %v7290_v50, %v9468_v24  ;;  %v6780_v21 = vld [vmem:[#allocation11 + $0x48] ss:$16 sps:$4 sm:$0xff]   ;;  %v6791_v50 = vld [vmem:[#allocation11 + $0x4] ss:$16 sps:$4 sm:$0xff]  }
 0x900   : > { %v9462_v37 = vpop.f32.mrf.mxu1 }
 0x902   : > { %v6467_v20 = vpop.f32.mrf.mxu1 }
 0x903   : > { %v9472_v1 = vadd.f32 %v6467_v20, %v9385_v32 }
 0x904   : > { %v3094_v28 = vpop.f32.mrf.mxu1 }
 0x905   : > { %v9476_v8 = vadd.f32 %v3094_v28, %v9387_v62 }
 0x906   : > { %v6468_v58 = vpop.f32.mrf.mxu1 }
 0x907   : > { %v9480_v36 = vadd.f32 %v6468_v58, %v9392_v57 }
 0x908   : > { %v3097_v54 = vpop.f32.mrf.mxu1 }
 0x909   : > { %v9482_v45 = vadd.f32 %v3097_v54, %v2511_v11 }
 0x90a   : > { %v6519_v47 = vpop.f32.mrf.mxu1 }
 0x90c   : > { %v3512_v5 = vpop.f32.mrf.mxu1 }
 0x90e   : > { %v6520_v15 = vpop.f32.mrf.mxu1 }
 0x90f   : > { %v3576_v7 = vpack.c.bf16 %v6520_v15, %v6519_v47  ;;  %v10847_v47 = vld [vmem:[#allocation32_spill] sm:$0xff] }
 0x910   : > { %v3515_v32 = vpop.f32.mrf.mxu1 }
 0x911   : > { %v3575_v34 = vpack.c.bf16 %v3515_v32, %v3512_v5 }
 0x912   : > { %v6523_v49 = vpop.f32.mrf.mxu1 }
 0x913   : > { %6537 = vmatprep.mubr.msk.bf16.mxu1 %vm1323_vm0, %v3575_v34  ;;  %v6749_v34 = vld [vmem:[#allocation11 + $0xe4] ss:$16 sps:$4 sm:$0xff]  }
 0x914   : > { %v3528_v23 = vpop.f32.mrf.mxu1  ;;  %6538 = vmatmul.mubr.msk.bf16.vlgmr.msra.gmra.mxu1 %vm1323_vm0, %v3576_v7  ;;  %4212 = vmatprep.subr.bf16.mxu0 %v6749_v34 }
 0x916   : > { %v6524_v62 = vpop.f32.mrf.mxu1 }
 0x917   : > { %v3578_v57 = vpack.c.bf16 %v6524_v62, %v6523_v49  ;;  %v6747_v49 = vld [vmem:[#allocation11 + $0xe0] ss:$16 sps:$4 sm:$0xff]  }
 0x918   : > { %v3531_v12 = vpop.f32.mrf.mxu1  ;;  %4213 = vmatpush1.bf16.msra.mxu0 %v6747_v49 }
 0x919   : > { %v3577_v63 = vpack.c.bf16 %v3531_v12, %v3528_v23  ;;  %v6750_v23 = vld [vmem:[#allocation11 + $0xe8] ss:$16 sps:$4 sm:$0xff]  }
 0x91b   : > { %6541 = vmatprep.mubr.msk.bf16.mxu1 %vm1323_vm0, %v3577_v63  ;;  %v6758_v63 = vld [vmem:[#allocation11 + $0xcc] ss:$16 sps:$4 sm:$0xff]  }
 0x91c   : > { %6542 = vmatmul.mubr.msk.bf16.gmra.mxu1 %vm1323_vm0, %v3578_v57  ;;  %v6753_v57 = vld [vmem:[#allocation11 + $0xc0] ss:$16 sps:$4 sm:$0xff]  }
 0x939   : > { %v6527_v56 = vpop.f32.mrf.mxu1 }
 0x93b   : > { %v3544_v13 = vpop.f32.mrf.mxu1 }
 0x93d   : > { %v6528_v9 = vpop.f32.mrf.mxu1 }
 0x93e   : > { %v3580_v33 = vpack.c.bf16 %v6528_v9, %v6527_v56  ;;  %v6756_v56 = vld [vmem:[#allocation11 + $0xc8] ss:$16 sps:$4 sm:$0xff]   ;;  %v6761_v9 = vld [vmem:[#allocation11 + $0xa4] ss:$16 sps:$4 sm:$0xff]  }
 0x93f   : > { %v3547_v22 = vpop.f32.mrf.mxu1 }
 0x940   : > { %v3579_v59 = vpack.c.bf16 %v3547_v22, %v3544_v13  ;;  %v6764_v22 = vld [vmem:[#allocation11 + $0xac] ss:$16 sps:$4 sm:$0xff]  }
 0x942   : > { %6545 = vmatprep.mubr.msk.bf16.mxu1 %vm1323_vm0, %v3579_v59  ;;  %v6759_v59 = vld [vmem:[#allocation11 + $0xa0] ss:$16 sps:$4 sm:$0xff]  }
 0x943   : > { %6546 = vmatmul.mubr.msk.bf16.gmra.mxu1 %vm1323_vm0, %v3580_v33  ;;  %v6762_v33 = vld [vmem:[#allocation11 + $0xa8] ss:$16 sps:$4 sm:$0xff]  }
 0x949   : > { %v6531_v17 = vpop.f32.mrf.mxu1 }
 0x94b   : > { %v3560_v18 = vpop.f32.mrf.mxu1 }
 0x94d   : > { %v6532_v4 = vpop.f32.mrf.mxu1 }
 0x94e   : > { %v3582_v31 = vpack.c.bf16 %v6532_v4, %v6531_v17  ;;  %v6770_v4 = vld [vmem:[#allocation11 + $0x8c] ss:$16 sps:$4 sm:$0xff]  }
 0x94f   : > { %v3563_v60 = vpop.f32.mrf.mxu1 }
 0x950   : > { %v3581_v40 = vpack.c.bf16 %v3563_v60, %v3560_v18  ;;  %v6767_v18 = vld [vmem:[#allocation11 + $0x84] ss:$16 sps:$4 sm:$0xff]   ;;  %v6765_v60 = vld [vmem:[#allocation11 + $0x80] ss:$16 sps:$4 sm:$0xff]  }
 0x952   : > { %6549 = vmatprep.mubr.msk.bf16.mxu1 %vm1323_vm0, %v3581_v40  ;;  %v6768_v40 = vld [vmem:[#allocation11 + $0x88] ss:$16 sps:$4 sm:$0xff]  }
 0x953   : > { %6550 = vmatmul.mubr.msk.bf16.gmra.mxu1 %vm1323_vm0, %v3582_v31 }
 0x954   : > { %4357 = vmatprep.mubr.bf16.mxu1 %v10817_v29 }
 0x9d4   : > { %v6539_v10 = vpop.f32.mrf.mxu1 }
 0x9d5   : > { %v9508_v48 = vadd.f32 %v6539_v10, %v9432_v35  ;;  %v1868_v35 = vadd.f32 %v10847_v47, %v1312_v3  ;;  %v6774_v10 = vld [vmem:[#allocation11 + $0x68] ss:$16 sps:$4 sm:$0xff]   ;;  %v6794_v3 = vld [vmem:[#allocation11 + $0xc] ss:$16 sps:$4 sm:$0xff]   ;;  %v6789_v47 = vld [vmem:[#allocation11] ss:$16 sps:$4 sm:$0xff]  }
 0x9d6   : > { %v3657_v41 = vpop.f32.mrf.mxu1 }
 0x9d7   : > { %v9498_v46 = vadd.f32 %v3657_v41, %v9435_v25  ;;  %10845 = vst [vmem:[#allocation30_spill] sm:$0xff] %v9508_v48  ;;  %v3788_v11 = vmul.f32 %v9508_v48, %v9508_v48  ;;  %v2503_v5 = vadd.f32 %v9361_v42, %v1868_v35  ;;  %v6777_v41 = vld [vmem:[#allocation11 + $0x40] ss:$16 sps:$4 sm:$0xff]   ;;  %v6792_v35 = vld [vmem:[#allocation11 + $0x8] ss:$16 sps:$4 sm:$0xff]  }
 0x9d8   : > { %v6540_v39 = vpop.f32.mrf.mxu1 }
 0x9d9   : > { %10843 = vst [vmem:[#allocation25_spill] sm:$0xff] %v9498_v46  ;;  %3738 = vadd.xlane.f32.xlu1 %v9498_v46  ;;  %v3786_v26 = vmul.f32 %v9498_v46, %v9498_v46  ;;  %v9516_v58 = vadd.f32 %v6540_v39, %v9438_v0  ;;  %v6752_v0 = vld [vmem:[#allocation11 + $0xec] ss:$16 sps:$4 sm:$0xff]   ;;  %v3114_v62 = vadd.f32 %v9451_v30, %v2503_v5  ;;  %v6785_v39 = vld [vmem:[#allocation11 + $0x24] ss:$16 sps:$4 sm:$0xff]  }
 0x9da   : > { %v3660_v16 = vpop.f32.mrf.mxu1  ;;  %4325 = vmatprep.subr.bf16.mxu1 %v6752_v0 }
 0x9db   : > { %v9502_v61 = vadd.f32 %v3660_v16, %v3110_v27  ;;  %10846 = vst [vmem:[#allocation24_spill] sm:$0xff] %v9516_v58  ;;  %v3789_v32 = vmul.f32 %v9516_v58, %v9516_v58  ;;  %4326 = vmatpush1.bf16.msra.mxu1 %v6750_v23  ;;  %v6788_v27 = vld [vmem:[#allocation11 + $0x2c] ss:$16 sps:$4 sm:$0xff]   ;;  %v7291_v16 = vld [vmem:[%s7828_s21 + $0x48] sm:$0xff]  ;;  %s7482_s21 = scalar_lea.vmem %s7481_s23, 4096 }
 0x9dc   : > { %v6543_v20 = vpop.f32.mrf.mxu1  ;;  %4327 = vmatprep.subr.bf16.mxu1 %v6758_v63  ;;  %p7484_p8 = scmp.lt.s32.totalorder %s7482_s21, %s7476_s20 }
 0x9dd   : > { %10844 = vst [vmem:[#allocation29_spill] sm:$0xff] %v9502_v61  ;;  %3802 = vadd.xlane.f32.xlu1 %v3786_v26  ;;  %3740 = vadd.xlane.f32.xlu0 %v9502_v61  ;;  %v3787_v25 = vmul.f32 %v9502_v61, %v9502_v61  ;;  %v9536_v30 = vadd.f32 %v6543_v20, %v9443_v51  ;;  %v6783_v20 = vld [vmem:[#allocation11 + $0x20] ss:$16 sps:$4 sm:$0xff]  }
 0x9de   : > { %v3673_v28 = vpop.f32.mrf.mxu1  ;;  %v1316_v26 = vadd.f32 %v7291_v16, %v9468_v24  ;;  %p7485_p7 = por %p7484_p8, %p7483_p5 }
 0x9df   : > { %v9524_v15 = vadd.f32 %v3673_v28, %v9446_v2  ;;  %v6755_v2 = vld [vmem:[#allocation11 + $0xc4] ss:$16 sps:$4 sm:$0xff]   ;;  %10850 = vst [vmem:[#allocation39_spill] sm:$0xff] %v9536_v30  ;;  %4328 = vmatpush1.bf16.msra.mxu1 %v6756_v56  ;;  %v3792_v51 = vmul.f32 %v9536_v30, %v9536_v30 }
 0x9e0   : > { %v6544_v54 = vpop.f32.mrf.mxu1  ;;  %4214 = vmatprep.subr.bf16.mxu0 %v6755_v2  ;;  %4329 = vmatprep.subr.bf16.mxu1 %v6764_v22  ;;  %p7486_p6 = pnand %p7485_p7, %p7479_p2 }
 0x9e1   : > { %3742 = vadd.xlane.f32.xlu1 %v9508_v48  ;;  %3804 = vadd.xlane.f32.xlu0 %v3787_v25  ;;  %10848 = vst [vmem:[#allocation27_spill] sm:$0xff] %v9524_v15  ;;  %v3790_v42 = vmul.f32 %v9524_v15, %v9524_v15  ;;  %v9542_v17 = vadd.f32 %v6544_v54, %v9449_v14  ;;  %v6773_v14 = vld [vmem:[#allocation11 + $0x64] ss:$16 sps:$4 sm:$0xff]   ;;  %v6786_v25 = vld [vmem:[#allocation11 + $0x28] ss:$16 sps:$4 sm:$0xff]  }
 0x9e2   : > { %v3676_v7 = vpop.f32.mrf.mxu1  ;;  %4215 = vmatpush1.bf16.msra.mxu0 %v6753_v57 }
 0x9e3   : > { %v9530_v12 = vadd.f32 %v3676_v7, %v3114_v62  ;;  %4216 = vmatprep.subr.bf16.mxu0 %v6761_v9  ;;  %10851 = vst [vmem:[#allocation38_spill] sm:$0xff] %v9542_v17  ;;  %4330 = vmatpush1.bf16.msra.mxu1 %v6762_v33  ;;  %v3793_v31 = vmul.f32 %v9542_v17, %v9542_v17  ;;  %v6797_v33 = vld [vmem:[#allocation13 + $0xf8] sm:$0xff]  }
 0x9e4   : > { %4331 = vmatprep.subr.bf16.mxu1 %v6770_v4 }
 0x9e5   : > { %3806 = vadd.xlane.f32.xlu1 %v3788_v11  ;;  %3744 = vadd.xlane.f32.xlu0 %v9516_v58  ;;  %10849 = vst [vmem:[#allocation37_spill] sm:$0xff] %v9530_v12  ;;  %v3791_v13 = vmul.f32 %v9530_v12, %v9530_v12  ;;  %v10852_v11 = vld [vmem:[#allocation52_spill] sm:$0xff] }
 0x9e6   : > { %4217 = vmatpush1.bf16.msra.mxu0 %v6759_v59  ;;  %v1872_v54 = vadd.f32 %v10852_v11, %v1316_v26 }
 0x9e7   : > { %4218 = vmatprep.subr.bf16.mxu0 %v6767_v18  ;;  %4332 = vmatpush1.bf16.msra.mxu1 %v6768_v40 }
 0x9e8   : > { %4333 = vmatprep.subr.bf16.mxu1 %v6776_v53 }
 0x9e9   : > { %3808 = vadd.xlane.f32.xlu0 %v3789_v32  ;;  %3746 = vadd.xlane.f32.xlu1 %v9524_v15  ;;  %v2507_v32 = vadd.f32 %v9381_v44, %v1872_v54 }
 0x9ea   : > { %4219 = vmatpush1.bf16.msra.mxu0 %v6765_v60 }
 0x9eb   : > { %4220 = vmatprep.subr.bf16.mxu0 %v6773_v14  ;;  %4334 = vmatpush1.bf16.msra.mxu1 %v6774_v10  ;;  %v3118_v0 = vadd.f32 %v9462_v37, %v2507_v32 }
 0x9ec   : > { %4335 = vmatprep.subr.bf16.mxu1 %v6782_v52 }
 0x9ed   : > { %3810 = vadd.xlane.f32.xlu1 %v3790_v42  ;;  %3748 = vadd.xlane.f32.xlu0 %v9530_v12 }
 0x9ee   : > { %4221 = vmatpush1.bf16.msra.mxu0 %v6771_v38 }
 0x9ef   : > { %4222 = vmatprep.subr.bf16.mxu0 %v6779_v6  ;;  %4336 = vmatpush1.bf16.msra.mxu1 %v6780_v21 }
 0x9f0   : > { %4337 = vmatprep.subr.bf16.mxu1 %v6788_v27 }
 0x9f1   : > { %3750 = vadd.xlane.f32.xlu1 %v9536_v30  ;;  %3812 = vadd.xlane.f32.xlu0 %v3791_v13 }
 0x9f2   : > { %4223 = vmatpush1.bf16.msra.mxu0 %v6777_v41 }
 0x9f3   : > { %4224 = vmatprep.subr.bf16.mxu0 %v6785_v39  ;;  %4338 = vmatpush1.bf16.msra.mxu1 %v6786_v25 }
 0x9f4   : > { %4339 = vmatprep.subr.bf16.mxu1 %v6794_v3 }
 0x9f5   : > { %3814 = vadd.xlane.f32.xlu1 %v3792_v51  ;;  %3752 = vadd.xlane.f32.xlu0 %v9542_v17 }
 0x9f6   : > { %4225 = vmatpush1.bf16.msra.mxu0 %v6783_v20 }
 0x9f7   : > { %4226 = vmatprep.subr.bf16.mxu0 %v6791_v50  ;;  %4340 = vmatpush1.bf16.msra.mxu1 %v6792_v35 }
 0x9f8   : > { %6121 = vmatprep.subr.bf16.mxu1 %v6797_v33 }
 0x9f9   : > { %3816 = vadd.xlane.f32.xlu0 %v3793_v31 }
 0x9fa   : > { %4227 = vmatpush1.bf16.msra.mxu0 %v6789_v47 }
 0xa03   : > { %v6547_v28 = vpop.f32.mrf.mxu1 }
 0xa04   : > { %v9564_v44 = vadd.f32 %v6547_v28, %v9454_v43 }
 0xa05   : > { %v3689_v5 = vpop.f32.mrf.mxu1 }
 0xa06   : > { %v9554_v24 = vadd.f32 %v3689_v5, %v9457_v19  ;;  %10855 = vst [vmem:[#allocation44_spill] sm:$0xff] %v9564_v44  ;;  %v3796_v62 = vmul.f32 %v9564_v44, %v9564_v44 }
 0xa07   : > { %v6548_v34 = vpop.f32.mrf.mxu1 }
 0xa08   : > { %10853 = vst [vmem:[#allocation41_spill] sm:$0xff] %v9554_v24  ;;  %3754 = vadd.xlane.f32.xlu1 %v9554_v24  ;;  %v3794_v23 = vmul.f32 %v9554_v24, %v9554_v24  ;;  %v9570_v37 = vadd.f32 %v6548_v34, %v9460_v55 }
 0xa09   : > { %v3692_v7 = vpop.f32.mrf.mxu1 }
 0xa0a   : > { %v9558_v49 = vadd.f32 %v3692_v7, %v3118_v0  ;;  %10856 = vst [vmem:[#allocation43_spill] sm:$0xff] %v9570_v37  ;;  %v3797_v63 = vmul.f32 %v9570_v37, %v9570_v37 }
 0xa0c   : > { %10854 = vst [vmem:[#allocation40_spill] sm:$0xff] %v9558_v49  ;;  %3818 = vadd.xlane.f32.xlu1 %v3794_v23  ;;  %3756 = vadd.xlane.f32.xlu0 %v9558_v49  ;;  %v3795_v19 = vmul.f32 %v9558_v49, %v9558_v49 }
 0xa10   : > { %3758 = vadd.xlane.f32.xlu1 %v9564_v44  ;;  %3820 = vadd.xlane.f32.xlu0 %v3795_v19 }
 0xa13   : > { %v6551_v42 = vpop.f32.mrf.mxu1 }
 0xa14   : > { %3822 = vadd.xlane.f32.xlu1 %v3796_v62  ;;  %3760 = vadd.xlane.f32.xlu0 %v9570_v37 }
 0xa15   : > { %v3705_v2 = vpop.f32.mrf.mxu1 }
 0xa16   : > { %v9576_v43 = vadd.f32 %v3705_v2, %v9476_v8  ;;  %v9588_v8 = vadd.f32 %v6551_v42, %v9472_v1  ;;  %v6795_v1 = vld [vmem:[#allocation13 + $0x78] sm:$0xff]  }
 0xa17   : > { %v6552_v57 = vpop.f32.mrf.mxu1  ;;  %6057 = vmatprep.subr.bf16.mxu0 %v6795_v1 }
 0xa18   : > { %10857 = vst [vmem:[#allocation42_spill] sm:$0xff] %v9576_v43  ;;  %3824 = vadd.xlane.f32.xlu0 %v3797_v63  ;;  %3762 = vadd.xlane.f32.xlu1 %v9576_v43  ;;  %v3798_v13 = vmul.f32 %v9576_v43, %v9576_v43  ;;  %10859 = vst [vmem:[#allocation46_spill] sm:$0xff] %v9588_v8  ;;  %v9594_v22 = vadd.f32 %v6552_v57, %v9480_v36 }
 0xa19   : > { %v3708_v55 = vpop.f32.mrf.mxu1 }
 0xa1a   : > { %v9582_v56 = vadd.f32 %v3708_v55, %v9482_v45  ;;  %10860 = vst [vmem:[#allocation48_spill] sm:$0xff] %v9594_v22  ;;  %v3800_v45 = vmul.f32 %v9588_v8, %v9588_v8  ;;  %v3801_v59 = vmul.f32 %v9594_v22, %v9594_v22 }
 0xa1c   : > { %10858 = vst [vmem:[#allocation45_spill] sm:$0xff] %v9582_v56  ;;  %3826 = vadd.xlane.f32.xlu1 %v3798_v13  ;;  %3764 = vadd.xlane.f32.xlu0 %v9582_v56  ;;  %v3799_v9 = vmul.f32 %v9582_v56, %v9582_v56 }
 0xa20   : > { %3766 = vadd.xlane.f32.xlu1 %v9588_v8  ;;  %3828 = vadd.xlane.f32.xlu0 %v3799_v9 }
 0xa24   : > { %3830 = vadd.xlane.f32.xlu1 %v3800_v45  ;;  %3768 = vadd.xlane.f32.xlu0 %v9594_v22 }
 0xa28   : > { %3832 = vadd.xlane.f32.xlu0 %v3801_v59 }
 0xa62   : > { %v3739_v51 = vpop.xlane.xlu1 %3738 }
 0xa63   : > { %v3770_v18 = vmul.f32 0.0078125, %v3739_v51  ;;  %v9620_v51 = vld [vmem:[%s10620_s7] ss:$0 sm:$0xff] }
 0xa65   : > { %v3850_v36 = vmul.f32 %v3770_v18, %v3770_v18  ;;  %v3882_v2 = vsub.f32 %v9498_v46, %v3770_v18 }
 0xa66   : > { %v3803_v4 = vpop.xlane.xlu1 %3802  ;;  %v3741_v60 = vpop.xlane.xlu0 %3740 }
 0xa67   : > { %v3834_v40 = vmul.f32 0.0078125, %v3803_v4  ;;  %v3771_v31 = vmul.f32 0.0078125, %v3741_v60 }
 0xa69   : > { %v3866_v14 = vsub.f32 %v3834_v40, %v3850_v36  ;;  %v3851_v6 = vmul.f32 %v3771_v31, %v3771_v31  ;;  %v3883_v1 = vsub.f32 %v9502_v61, %v3771_v31 }
 0xa6a   : > { %v3743_v53 = vpop.xlane.xlu1 %3742  ;;  %v3805_v38 = vpop.xlane.xlu0 %3804 }
 0xa6b   : > { %v3898_v10 = vadd.f32 1e-05, %v3866_v14  ;;  %v3772_v52 = vmul.f32 0.0078125, %v3743_v53  ;;  %v3835_v41 = vmul.f32 0.0078125, %v3805_v38 }
 0xa6d   : > { %7115 = vrsqrt.f32 %v3898_v10  ;;  %v3867_v21 = vsub.f32 %v3835_v41, %v3851_v6  ;;  %v3852_v16 = vmul.f32 %v3772_v52, %v3772_v52  ;;  %v3884_v10 = vsub.f32 %v9508_v48, %v3772_v52  ;;  %v9631_v41 = vld [vmem:[%s10621_s8] ss:$0 sm:$0xff] }
 0xa6e   : > { %v3807_v39 = vpop.xlane.xlu1 %3806  ;;  %v3745_v27 = vpop.xlane.xlu0 %3744 }
 0xa6f   : > { %v3899_v26 = vadd.f32 1e-05, %v3867_v21  ;;  %v3836_v20 = vmul.f32 0.0078125, %v3807_v39  ;;  %v9601_v25 = vmul.f32 0.0078125, %v3745_v27 }
 0xa71   : > { %7117 = vrsqrt.f32 %v3899_v26  ;;  %v3868_v28 = vsub.f32 %v3836_v20, %v3852_v16  ;;  %v3853_v54 = vmul.f32 %v9601_v25, %v9601_v25 }
 0xa72   : > { %v3809_v50 = vpop.xlane.xlu0 %3808  ;;  %v3747_v3 = vpop.xlane.xlu1 %3746 }
 0xa73   : > { %v3900_v11 = vadd.f32 1e-05, %v3868_v28  ;;  %v3837_v47 = vmul.f32 0.0078125, %v3809_v50  ;;  %v9605_v35 = vmul.f32 0.0078125, %v3747_v3  ;;  %v3885_v3 = vsub.f32 %v9516_v58, %v9601_v25 }
 0xa75   : > { %7119 = vrsqrt.f32 %v3900_v11  ;;  %v3869_v5 = vsub.f32 %v3837_v47, %v3853_v54  ;;  %v3854_v7 = vmul.f32 %v9605_v35, %v9605_v35 }
 0xa76   : > { %v3811_v32 = vpop.xlane.xlu1 %3810  ;;  %v3749_v34 = vpop.xlane.xlu0 %3748 }
 0xa77   : > { %v3901_v0 = vadd.f32 1e-05, %v3869_v5  ;;  %v3838_v23 = vmul.f32 0.0078125, %v3811_v32  ;;  %v9609_v19 = vmul.f32 0.0078125, %v3749_v34  ;;  %v6796_v5 = vld [vmem:[#allocation13 + $0x38] sm:$0xff]  }
 0xa78   : > { %v6798_v32 = vld [vmem:[#allocation13 + $0xb8] sm:$0xff]  }
 0xa79   : > { %7121 = vrsqrt.f32 %v3901_v0  ;;  %v3870_v62 = vsub.f32 %v3838_v23, %v3854_v7  ;;  %v3855_v13 = vmul.f32 %v9609_v19, %v9609_v19  ;;  %v6799_v23 = vld [vmem:[#allocation13 + $0x70] sm:$0xff]  }
 0xa7a   : > { %v7116_v42 = vpop.eup %7115  ;;  %v3751_v63 = vpop.xlane.xlu1 %3750 }
 0xa7b   : > { %v3813_v57 = vpop.xlane.xlu0 %3812  ;;  %v3902_v55 = vadd.f32 1e-05, %v3870_v62  ;;  %v9614_v9 = vmul.f32 0.0078125, %v3751_v63  ;;  %v3930_v59 = vmul.f32 %v7116_v42, %v3882_v2  ;;  %v3886_v62 = vsub.f32 %v9524_v15, %v9605_v35 }
 0xa7c   : > { %v3839_v45 = vmul.f32 0.0078125, %v3813_v57 }
 0xa7d   : > { %7123 = vrsqrt.f32 %v3902_v55  ;;  %v3856_v4 = vmul.f32 %v9614_v9, %v9614_v9  ;;  %v3952_v31 = vmul.f32 %v9620_v51, %v3930_v59  ;;  %v3887_v55 = vsub.f32 %v9530_v12, %v9609_v19 }
 0xa7e   : > { %v3871_v33 = vsub.f32 %v3839_v45, %v3855_v13  ;;  %v7118_v18 = vpop.eup %7117  ;;  %v3815_v60 = vpop.xlane.xlu1 %3814 }
 0xa7f   : > { %v3753_v36 = vpop.xlane.xlu0 %3752  ;;  %v3931_v40 = vmul.f32 %v7118_v18, %v3883_v1  ;;  %v3840_v53 = vmul.f32 0.0078125, %v3815_v60  ;;  %v3974_v50 = vadd.f32 %v9631_v41, %v3952_v31  ;;  %v3888_v1 = vsub.f32 %v9536_v30, %v9614_v9 }
 0xa80   : > { %v3903_v14 = vadd.f32 1e-05, %v3871_v33  ;;  %v9624_v38 = vmul.f32 0.0078125, %v3753_v36 }
 0xa81   : > { %v3872_v6 = vsub.f32 %v3840_v53, %v3856_v4  ;;  %v3953_v27 = vmul.f32 %v9620_v51, %v3931_v40 }
 0xa82   : > { %7125 = vrsqrt.f32 %v3903_v14  ;;  %v7120_v21 = vpop.eup %7119  ;;  %v3857_v26 = vmul.f32 %v9624_v38, %v9624_v38  ;;  %v3889_v14 = vsub.f32 %v9542_v17, %v9624_v38 }
 0xa83   : > { %v3817_v39 = vpop.xlane.xlu0 %3816  ;;  %v3904_v16 = vadd.f32 1e-05, %v3872_v6  ;;  %v3932_v28 = vmul.f32 %v7120_v21, %v3884_v10  ;;  %v3975_v52 = vadd.f32 %v9631_v41, %v3953_v27 }
 0xa84   : > { %v3841_v20 = vmul.f32 0.0078125, %v3817_v39 }
 0xa85   : > { %7127 = vrsqrt.f32 %v3904_v16  ;;  %v3990_v47 = vpack.c.bf16 %v3975_v52, %v3974_v50  ;;  %v3954_v7 = vmul.f32 %v9620_v51, %v3932_v28 }
 0xa86   : > { %v3873_v11 = vsub.f32 %v3841_v20, %v3857_v26  ;;  %v7122_v54 = vpop.eup %7121 }
 0xa87   : > { %v3933_v0 = vmul.f32 %v7122_v54, %v3885_v3  ;;  %4245 = vmatmul.mubr.bf16.vlgmr.msra.gmra.mxu0 %v3990_v47  ;;  %4358 = vmatmul.mubr.bf16.vlgmr.msra.gmra.mxu1 %v3990_v47  ;;  %v3976_v2 = vadd.f32 %v9631_v41, %v3954_v7 }
 0xa88   : > { %v3905_v34 = vadd.f32 1e-05, %v3873_v11  ;;  %4254 = vmatprep.mubr.bf16.mxu0 %v10817_v29  ;;  %4367 = vmatprep.mubr.bf16.mxu1 %v10817_v29 }
 0xa89   : > { %v3955_v25 = vmul.f32 %v9620_v51, %v3933_v0  ;;  %6058 = vmatpush3.bf16.msra.mxu0 %v6796_v5  ;;  %6122 = vmatpush3.bf16.msra.mxu1 %v6798_v32 }
 0xa8a   : > { %7129 = vrsqrt.f32 %v3905_v34  ;;  %v7124_v42 = vpop.eup %7123  ;;  %6059 = vmatprep.subr.bf16.mxu0 %v6799_v23 }
 0xa8b   : > { %v3977_v63 = vadd.f32 %v9631_v41, %v3955_v25  ;;  %v3934_v57 = vmul.f32 %v7124_v42, %v3886_v62 }
 0xa8d   : > { %v3991_v35 = vpack.c.bf16 %v3977_v63, %v3976_v2  ;;  %v3956_v59 = vmul.f32 %v9620_v51, %v3934_v57 }
 0xa8f   : > { %v7126_v13 = vpop.eup %7125  ;;  %4255 = vmatmul.mubr.bf16.gmra.mxu0 %v3991_v35  ;;  %4368 = vmatmul.mubr.bf16.gmra.mxu1 %v3991_v35  ;;  %v3978_v19 = vadd.f32 %v9631_v41, %v3956_v59 }
 0xa90   : > { %v3935_v45 = vmul.f32 %v7126_v13, %v3887_v55  ;;  %4264 = vmatprep.mubr.bf16.mxu0 %v10817_v29  ;;  %4377 = vmatprep.mubr.bf16.mxu1 %v10817_v29 }
 0xa91   : > { %v3755_v33 = vpop.xlane.xlu1 %3754 }
 0xa92   : > { %v3957_v18 = vmul.f32 %v9620_v51, %v3935_v45  ;;  %v7128_v4 = vpop.eup %7127  ;;  %v9656_v60 = vmul.f32 0.0078125, %v3755_v33 }
 0xa93   : > { %v3936_v40 = vmul.f32 %v7128_v4, %v3888_v1 }
 0xa94   : > { %v3979_v36 = vadd.f32 %v9631_v41, %v3957_v18  ;;  %v3858_v6 = vmul.f32 %v9656_v60, %v9656_v60 }
 0xa95   : > { %v3819_v53 = vpop.xlane.xlu1 %3818  ;;  %v3757_v9 = vpop.xlane.xlu0 %3756  ;;  %v3958_v16 = vmul.f32 %v9620_v51, %v3936_v40 }
 0xa96   : > { %v3992_v31 = vpack.c.bf16 %v3979_v36, %v3978_v19  ;;  %v3842_v21 = vmul.f32 0.0078125, %v3819_v53  ;;  %v9664_v39 = vmul.f32 0.0078125, %v3757_v9 }
 0xa97   : > { %v7130_v10 = vpop.eup %7129  ;;  %v3980_v54 = vadd.f32 %v9631_v41, %v3958_v16 }
 0xa98   : > { %v3937_v27 = vmul.f32 %v7130_v10, %v3889_v14  ;;  %v3874_v26 = vsub.f32 %v3842_v21, %v3858_v6  ;;  %4265 = vmatmul.mubr.bf16.gmra.mxu0 %v3992_v31  ;;  %4378 = vmatmul.mubr.bf16.gmra.mxu1 %v3992_v31  ;;  %v3859_v52 = vmul.f32 %v9664_v39, %v9664_v39 }
 0xa99   : > { %v3759_v20 = vpop.xlane.xlu1 %3758  ;;  %v3821_v28 = vpop.xlane.xlu0 %3820  ;;  %4274 = vmatprep.mubr.bf16.mxu0 %v10817_v29  ;;  %4387 = vmatprep.mubr.bf16.mxu1 %v10817_v29  ;;  %v3890_v14 = vsub.f32 %v9554_v24, %v9656_v60  ;;  %v3891_v16 = vsub.f32 %v9558_v49, %v9664_v39 }
 0xa9a   : > { %v3959_v38 = vmul.f32 %v9620_v51, %v3937_v27  ;;  %v3906_v50 = vadd.f32 1e-05, %v3874_v26  ;;  %v9672_v3 = vmul.f32 0.0078125, %v3759_v20  ;;  %v3843_v11 = vmul.f32 0.0078125, %v3821_v28 }
 0xa9c   : > { %v3981_v47 = vadd.f32 %v9631_v41, %v3959_v38  ;;  %7131 = vrsqrt.f32 %v3906_v50  ;;  %v3875_v5 = vsub.f32 %v3843_v11, %v3859_v52  ;;  %v3860_v7 = vmul.f32 %v9672_v3, %v9672_v3 }
 0xa9d   : > { %v3823_v32 = vpop.xlane.xlu1 %3822  ;;  %v3761_v34 = vpop.xlane.xlu0 %3760 }
 0xa9e   : > { %v3993_v0 = vpack.c.bf16 %v3981_v47, %v3980_v54  ;;  %v3907_v23 = vadd.f32 1e-05, %v3875_v5  ;;  %v3844_v62 = vmul.f32 0.0078125, %v3823_v32  ;;  %v9678_v25 = vmul.f32 0.0078125, %v3761_v34 }
 0xa9f   : > { %v3892_v5 = vsub.f32 %v9564_v44, %v9672_v3 }
 0xaa0   : > { %7133 = vrsqrt.f32 %v3907_v23  ;;  %v3876_v42 = vsub.f32 %v3844_v62, %v3860_v7  ;;  %4275 = vmatmul.mubr.bf16.gmra.mxu0 %v3993_v0  ;;  %4388 = vmatmul.mubr.bf16.gmra.mxu1 %v3993_v0  ;;  %v3861_v55 = vmul.f32 %v9678_v25, %v9678_v25 }
 0xaa1   : > { %v3825_v2 = vpop.xlane.xlu0 %3824  ;;  %v3763_v63 = vpop.xlane.xlu1 %3762  ;;  %4284 = vmatprep.mubr.bf16.mxu0 %v10817_v29  ;;  %4397 = vmatprep.mubr.bf16.mxu1 %v10817_v29 }
 0xaa2   : > { %v3908_v57 = vadd.f32 1e-05, %v3876_v42  ;;  %v3845_v35 = vmul.f32 0.0078125, %v3825_v2  ;;  %v9684_v13 = vmul.f32 0.0078125, %v3763_v63 }
 0xaa4   : > { %7135 = vrsqrt.f32 %v3908_v57  ;;  %v3877_v45 = vsub.f32 %v3845_v35, %v3861_v55  ;;  %v3862_v18 = vmul.f32 %v9684_v13, %v9684_v13  ;;  %v3893_v57 = vsub.f32 %v9570_v37, %v9678_v25 }
 0xaa5   : > { %v3827_v59 = vpop.xlane.xlu1 %3826  ;;  %v3765_v1 = vpop.xlane.xlu0 %3764 }
 0xaa6   : > { %v3909_v33 = vadd.f32 1e-05, %v3877_v45  ;;  %v3846_v4 = vmul.f32 0.0078125, %v3827_v59  ;;  %v3783_v19 = vmul.f32 0.0078125, %v3765_v1 }
 0xaa8   : > { %7137 = vrsqrt.f32 %v3909_v33  ;;  %v3878_v36 = vsub.f32 %v3846_v4, %v3862_v18  ;;  %v3863_v10 = vmul.f32 %v3783_v19, %v3783_v19  ;;  %v3894_v33 = vsub.f32 %v9576_v43, %v9684_v13 }
 0xaa9   : > { %v7132_v40 = vpop.eup %7131  ;;  %v3767_v53 = vpop.xlane.xlu1 %3766 }
 0xaaa   : > { %v3829_v9 = vpop.xlane.xlu0 %3828  ;;  %v3910_v31 = vadd.f32 1e-05, %v3878_v36  ;;  %v3784_v6 = vmul.f32 0.0078125, %v3767_v53  ;;  %v3938_v27 = vmul.f32 %v7132_v40, %v3890_v14  ;;  %v3895_v14 = vsub.f32 %v9582_v56, %v3783_v19 }
 0xaab   : > { %v3847_v21 = vmul.f32 0.0078125, %v3829_v9 }
 0xaac   : > { %7139 = vrsqrt.f32 %v3910_v31  ;;  %v3864_v28 = vmul.f32 %v3784_v6, %v3784_v6  ;;  %v3960_v47 = vmul.f32 %v9620_v51, %v3938_v27 }
 0xaad   : > { %v3879_v26 = vsub.f32 %v3847_v21, %v3863_v10  ;;  %v7134_v20 = vpop.eup %7133  ;;  %v3831_v38 = vpop.xlane.xlu1 %3830  ;;  %v3896_v10 = vsub.f32 %v9588_v8, %v3784_v6 }
 0xaae   : > { %v3769_v50 = vpop.xlane.xlu0 %3768  ;;  %v3848_v11 = vmul.f32 0.0078125, %v3831_v38  ;;  %v3939_v60 = vmul.f32 %v7134_v20, %v3891_v16  ;;  %v3982_v2 = vadd.f32 %v9631_v41, %v3960_v47 }
 0xaaf   : > { %v3911_v52 = vadd.f32 1e-05, %v3879_v26  ;;  %v3785_v54 = vmul.f32 0.0078125, %v3769_v50 }
 0xab0   : > { %v3880_v32 = vsub.f32 %v3848_v11, %v3864_v28  ;;  %v3961_v39 = vmul.f32 %v9620_v51, %v3939_v60 }
 0xab1   : > { %7141 = vrsqrt.f32 %v3911_v52  ;;  %v7136_v34 = vpop.eup %7135  ;;  %v3865_v23 = vmul.f32 %v3785_v54, %v3785_v54  ;;  %v3897_v20 = vsub.f32 %v9594_v22, %v3785_v54  ;;  %v6801_v54 = vld [vmem:[#allocation13 + $0xf0] sm:$0xff]  }
 0xab2   : > { %v3833_v0 = vpop.xlane.xlu0 %3832  ;;  %v3912_v7 = vadd.f32 1e-05, %v3880_v32  ;;  %v3940_v42 = vmul.f32 %v7136_v34, %v3892_v5  ;;  %v3983_v63 = vadd.f32 %v9631_v41, %v3961_v39  ;;  %v6800_v5 = vld [vmem:[#allocation13 + $0x30] sm:$0xff]   ;;  %6123 = vmatprep.subr.bf16.mxu1 %v6801_v54  ;;  %v6803_v34 = vld [vmem:[#allocation13 + $0x68] sm:$0xff]  }
 0xab3   : > { %v3849_v62 = vmul.f32 0.0078125, %v3833_v0  ;;  %v6802_v32 = vld [vmem:[#allocation13 + $0xb0] sm:$0xff]   ;;  %6060 = vmatpush3.bf16.msra.mxu0 %v6800_v5  ;;  %v6805_v0 = vld [vmem:[#allocation13 + $0xe8] sm:$0xff]  }
 0xab4   : > { %7143 = vrsqrt.f32 %v3912_v7  ;;  %v3994_v35 = vpack.c.bf16 %v3983_v63, %v3982_v2  ;;  %v3962_v1 = vmul.f32 %v9620_v51, %v3940_v42  ;;  %6124 = vmatpush3.bf16.msra.mxu1 %v6802_v32  ;;  %6061 = vmatprep.subr.bf16.mxu0 %v6803_v34  ;;  %v6804_v39 = vld [vmem:[#allocation13 + $0x28] sm:$0xff]   ;;  %v6808_v7 = vld [vmem:[#allocation13 + $0x20] sm:$0xff]   ;;  %v6813_v42 = vld [vmem:[#allocation13 + $0xd8] sm:$0xff]  }
 0xab5   : > { %v3881_v55 = vsub.f32 %v3849_v62, %v3865_v23  ;;  %v7138_v3 = vpop.eup %7137  ;;  %6125 = vmatprep.subr.bf16.mxu1 %v6805_v0  ;;  %v6810_v23 = vld [vmem:[#allocation13 + $0xa0] sm:$0xff]   ;;  %v6811_v62 = vld [vmem:[#allocation13 + $0x58] sm:$0xff]  }
 0xab6   : > { %v3941_v59 = vmul.f32 %v7138_v3, %v3893_v57  ;;  %4285 = vmatmul.mubr.bf16.gmra.mxu0 %v3994_v35  ;;  %4398 = vmatmul.mubr.bf16.gmra.mxu1 %v3994_v35  ;;  %v3984_v4 = vadd.f32 %v9631_v41, %v3962_v1  ;;  %v6812_v2 = vld [vmem:[#allocation13 + $0x18] sm:$0xff]   ;;  %v6815_v57 = vld [vmem:[#allocation13 + $0x50] sm:$0xff]   ;;  %v6821_v1 = vld [vmem:[#allocation13 + $0x8] sm:$0xff]  }
 0xab7   : > { %v3913_v45 = vadd.f32 1e-05, %v3881_v55  ;;  %4294 = vmatprep.mubr.bf16.mxu0 %v10817_v29  ;;  %4407 = vmatprep.mubr.bf16.mxu1 %v10817_v29  ;;  %v6814_v63 = vld [vmem:[#allocation13 + $0x98] sm:$0xff]   ;;  %v6816_v55 = vld [vmem:[#allocation13 + $0xd0] sm:$0xff]  }
 0xab8   : > { %v3963_v25 = vmul.f32 %v9620_v51, %v3941_v59  ;;  %6062 = vmatpush3.bf16.msra.mxu0 %v6804_v39  ;;  %v6817_v3 = vld [vmem:[#allocation13 + $0x10] sm:$0xff]   ;;  %v6820_v59 = vld [vmem:[#allocation13 + $0xc8] sm:$0xff]  }
 0xab9   : > { %7145 = vrsqrt.f32 %v3913_v45  ;;  %v7140_v18 = vpop.eup %7139  ;;  %v6818_v35 = vld [vmem:[#allocation13 + $0x90] sm:$0xff]   ;;  %v6819_v45 = vld [vmem:[#allocation13 + $0x48] sm:$0xff]  }
 0xaba   : > { %v3985_v36 = vadd.f32 %v9631_v41, %v3963_v25  ;;  %v3942_v40 = vmul.f32 %v7140_v18, %v3894_v33  ;;  %v6822_v33 = vld [vmem:[#allocation13 + $0x88] sm:$0xff]   ;;  %v6823_v25 = vld [vmem:[#allocation13 + $0x40] sm:$0xff]  }
 0xabb   : > { %v6824_v18 = vld [vmem:[#allocation13 + $0xc0] sm:$0xff]  }
 0xabc   : > { %v3995_v53 = vpack.c.bf16 %v3985_v36, %v3984_v4  ;;  %v3964_v13 = vmul.f32 %v9620_v51, %v3942_v40  ;;  %v6825_v4 = vld [vmem:[#allocation13] sm:$0xff]   ;;  %v4030_v40 = vld [vmem:[%s10623_s10] sm:$0xf] }
 0xabd   : > { %v6826_v36 = vld [vmem:[#allocation13 + $0x80] sm:$0xff]  }
 0xabe   : > { %v7142_v9 = vpop.eup %7141  ;;  %4295 = vmatmul.mubr.bf16.gmra.mxu0 %v3995_v53  ;;  %4408 = vmatmul.mubr.bf16.gmra.mxu1 %v3995_v53  ;;  %v3986_v16 = vadd.f32 %v9631_v41, %v3964_v13 }
 0xabf   : > { %v3943_v31 = vmul.f32 %v7142_v9, %v3895_v14  ;;  %4304 = vmatprep.mubr.bf16.mxu0 %v10817_v29  ;;  %4417 = vmatprep.mubr.bf16.mxu1 %v10817_v29  ;;  %v10861_v14 = vld [vmem:[#allocation21_spill] sm:$0xff] }
 0xac0   : > { %v10862_v53 = vsub.s32 0, %v10861_v14  ;;  %v10864_v32 = vsub.s32 1, %v10861_v14  ;;  %v4046_v0 = vsub.s32 3, %v10861_v14 }
 0xac1   : > { %v3965_v21 = vmul.f32 %v9620_v51, %v3943_v31  ;;  %v7144_v27 = vpop.eup %7143  ;;  %v10863_v31 = vsub.s32 2, %v10861_v14 }
 0xac2   : > { %v3944_v26 = vmul.f32 %v7144_v27, %v3896_v10  ;;  %v9728_v9 = vrot.slane %v4030_v40, %v10862_v53  ;;  %v9744_v34 = vrot.slane %v4030_v40, %v10864_v32 }
 0xac3   : > { %v3987_v19 = vadd.f32 %v9631_v41, %v3965_v21  ;;  %v9732_v13 = vrot.slane %v4030_v40, %v10863_v31 }
 0xac4   : > { %v3966_v52 = vmul.f32 %v9620_v51, %v3944_v26 }
 0xac5   : > { %v3996_v28 = vpack.c.bf16 %v3987_v19, %v3986_v16 }
 0xac6   : > { %v7146_v38 = vpop.eup %7145  ;;  %v3988_v11 = vadd.f32 %v9631_v41, %v3966_v52 }
 0xac7   : > { %v3945_v50 = vmul.f32 %v7146_v38, %v3897_v20  ;;  %4305 = vmatmul.mubr.bf16.gmra.mxu0 %v3996_v28  ;;  %4418 = vmatmul.mubr.bf16.gmra.mxu1 %v3996_v28 }
 0xac8   : > { %4314 = vmatprep.mubr.bf16.mxu0 %v10817_v29  ;;  %4427 = vmatprep.mubr.bf16.mxu1 %v10817_v29  ;;  %v6806_v29 = vld [vmem:[#allocation13 + $0xa8] sm:$0xff]  }
 0xac9   : > { %v3967_v6 = vmul.f32 %v9620_v51, %v3945_v50  ;;  %6126 = vmatpush3.bf16.msra.mxu1 %v6806_v29  ;;  %v6807_v51 = vld [vmem:[#allocation13 + $0x60] sm:$0xff]  }
 0xaca   : > { %6063 = vmatprep.subr.bf16.mxu0 %v6807_v51 }
 0xacb   : > { %v3989_v60 = vadd.f32 %v9631_v41, %v3967_v6  ;;  %v6809_v41 = vld [vmem:[#allocation13 + $0xe0] sm:$0xff]   ;;  %6064 = vmatpush3.bf16.msra.mxu0 %v6808_v7 }
 0xacc   : > { %6127 = vmatprep.subr.bf16.mxu1 %v6809_v41  ;;  %6065 = vmatprep.subr.bf16.mxu0 %v6811_v62 }
 0xacd   : > { %v3997_v47 = vpack.c.bf16 %v3989_v60, %v3988_v11  ;;  %6128 = vmatpush3.bf16.msra.mxu1 %v6810_v23 }
 0xace   : > { %6129 = vmatprep.subr.bf16.mxu1 %v6813_v42 }
 0xacf   : > { %4315 = vmatmul.mubr.bf16.gmra.mxu0 %v3997_v47  ;;  %4428 = vmatmul.mubr.bf16.gmra.mxu1 %v3997_v47 }
 0xad0   : > { %6066 = vmatpush3.bf16.msra.mxu0 %v6812_v2 }
 0xad1   : > { %6130 = vmatpush3.bf16.msra.mxu1 %v6814_v63  ;;  %6067 = vmatprep.subr.bf16.mxu0 %v6815_v57 }
 0xad2   : > { %6131 = vmatprep.subr.bf16.mxu1 %v6816_v55  ;;  %v9754_v55 = vrot.slane %v4030_v40, %v4046_v0 }
 0xad4   : > { %6068 = vmatpush3.bf16.msra.mxu0 %v6817_v3 }
 0xad5   : > { %6132 = vmatpush3.bf16.msra.mxu1 %v6818_v35  ;;  %6069 = vmatprep.subr.bf16.mxu0 %v6819_v45 }
 0xad6   : > { %6133 = vmatprep.subr.bf16.mxu1 %v6820_v59 }
 0xad8   : > { %6070 = vmatpush3.bf16.msra.mxu0 %v6821_v1 }
 0xad9   : > { %6134 = vmatpush3.bf16.msra.mxu1 %v6822_v33  ;;  %6071 = vmatprep.subr.bf16.mxu0 %v6823_v25 }
 0xada   : > { %6135 = vmatprep.subr.bf16.mxu1 %v6824_v18 }
 0xadc   : > { %6072 = vmatpush3.bf16.msra.mxu0 %v6825_v4 }
 0xadd   : > { %6136 = vmatpush3.bf16.msra.mxu1 %v6826_v36 }
 0xb47   : > { %v4246_v10 = vpop.f32.mrf.mxu0  ;;  %v4359_v21 = vpop.f32.mrf.mxu1 }
 0xb48   : > { %v4247_v27 = vadd.f32 %v4246_v10, %v9728_v9  ;;  %v4360_v16 = vadd.f32 %v4359_v21, %v9732_v13 }
 0xb49   : > { %v4248_v19 = vpop.f32.mrf.mxu0  ;;  %v4361_v26 = vpop.f32.mrf.mxu1 }
 0xb4a   : > { %v4502_v20 = vmul.f32 0.044715, %v4247_v27  ;;  %v4504_v28 = vmul.f32 0.044715, %v4360_v16  ;;  %v9752_v57 = vadd.f32 %v4248_v19, %v9744_v34  ;;  %v9766_v53 = vmul.f32 0.5, %v4247_v27 }
 0xb4b   : > { %v4250_v38 = vpop.f32.mrf.mxu0  ;;  %v4363_v50 = vpop.f32.mrf.mxu1  ;;  %v9769_v31 = vadd.f32 %v4361_v26, %v9754_v55  ;;  %v9773_v19 = vmul.f32 0.5, %v4360_v16 }
 0xb4c   : > { %v4566_v52 = vmul.f32 %v4502_v20, %v4247_v27  ;;  %v4568_v6 = vmul.f32 %v4504_v28, %v4360_v16  ;;  %v9737_v11 = vadd.f32 %v4250_v38, %v9728_v9  ;;  %v9740_v60 = vadd.f32 %v4363_v50, %v9732_v13 }
 0xb4d   : > { %v4252_v47 = vpop.f32.mrf.mxu0  ;;  %v4365_v54 = vpop.f32.mrf.mxu1  ;;  %v4503_v28 = vmul.f32 0.044715, %v9752_v57  ;;  %v4505_v0 = vmul.f32 0.044715, %v9769_v31 }
 0xb4e   : > { %v4630_v5 = vmul.f32 %v4566_v52, %v4247_v27  ;;  %v4506_v39 = vmul.f32 0.044715, %v9737_v11  ;;  %v4632_v29 = vmul.f32 %v4568_v6, %v4360_v16  ;;  %v4508_v51 = vmul.f32 0.044715, %v9740_v60 }
 0xb4f   : > { %v4256_v41 = vpop.f32.mrf.mxu0  ;;  %v4369_v7 = vpop.f32.mrf.mxu1  ;;  %v9777_v38 = vadd.f32 %v4252_v47, %v9744_v34 }
 0xb50   : > { %v4694_v23 = vadd.f32 %v4630_v5, %v4247_v27  ;;  %v4570_v62 = vmul.f32 %v4506_v39, %v9737_v11  ;;  %v4572_v42 = vmul.f32 %v4508_v51, %v9740_v60  ;;  %v4696_v35 = vadd.f32 %v4632_v29, %v4360_v16 }
 0xb51   : > { %v4258_v2 = vpop.f32.mrf.mxu0  ;;  %v4371_v63 = vpop.f32.mrf.mxu1  ;;  %v9759_v59 = vadd.f32 %v4256_v41, %v9728_v9  ;;  %v9762_v1 = vadd.f32 %v4369_v7, %v9732_v13  ;;  %v9780_v27 = vadd.f32 %v4365_v54, %v9754_v55  ;;  %v4507_v41 = vmul.f32 0.044715, %v9777_v38 }
 0xb52   : > { %v4634_v3 = vmul.f32 %v4570_v62, %v9737_v11  ;;  %v4636_v45 = vmul.f32 %v4572_v42, %v9740_v60  ;;  %v4758_v18 = vmul.f32 0.7978846, %v4694_v23  ;;  %v4760_v20 = vmul.f32 0.7978846, %v4696_v35 }
 0xb53   : > { %v4260_v33 = vpop.f32.mrf.mxu0  ;;  %v4373_v25 = vpop.f32.mrf.mxu1  ;;  %v4510_v36 = vmul.f32 0.044715, %v9759_v59  ;;  %v4512_v21 = vmul.f32 0.044715, %v9762_v1  ;;  %v9788_v32 = vadd.f32 %v4258_v2, %v9744_v34  ;;  %v9795_v54 = vadd.f32 %v4371_v63, %v9754_v55 }
 0xb54   : > { %v4698_v4 = vadd.f32 %v4634_v3, %v9737_v11  ;;  %v4700_v10 = vadd.f32 %v4636_v45, %v9740_v60  ;;  %7147 = vtanh.f32 %v4758_v18  ;;  %v9784_v6 = vadd.f32 %v4260_v33, %v9728_v9 }
 0xb55   : > { %v4262_v40 = vpop.f32.mrf.mxu0  ;;  %v4375_v14 = vpop.f32.mrf.mxu1  ;;  %v4574_v26 = vmul.f32 %v4510_v36, %v9759_v59  ;;  %v4576_v16 = vmul.f32 %v4512_v21, %v9762_v1  ;;  %v9791_v47 = vadd.f32 %v4373_v25, %v9732_v13  ;;  %7149 = vtanh.f32 %v4760_v20 }
 0xb56   : > { %v4762_v5 = vmul.f32 0.7978846, %v4698_v4  ;;  %v4764_v39 = vmul.f32 0.7978846, %v4700_v10  ;;  %v4514_v29 = vmul.f32 0.044715, %v9784_v6  ;;  %v9814_v33 = vadd.f32 %v4262_v40, %v9744_v34 }
 0xb57   : > { %v9800_v23 = vmul.f32 0.5, %v9752_v57  ;;  %v9803_v62 = vmul.f32 0.5, %v9769_v31  ;;  %v4509_v42 = vmul.f32 0.044715, %v9780_v27  ;;  %v4638_v2 = vmul.f32 %v4574_v26, %v9759_v59 }
 0xb58   : > { %v4266_v50 = vpop.f32.mrf.mxu0  ;;  %v4379_v52 = vpop.f32.mrf.mxu1  ;;  %v4516_v63 = vmul.f32 0.044715, %v9791_v47  ;;  %7151 = vtanh.f32 %v4762_v5  ;;  %v4640_v35 = vmul.f32 %v4576_v16, %v9762_v1  ;;  %v4511_v45 = vmul.f32 0.044715, %v9788_v32 }
 0xb59   : > { %v9809_v3 = vadd.f32 %v4266_v50, %v9728_v9  ;;  %v4567_v25 = vmul.f32 %v4503_v28, %v9752_v57  ;;  %7153 = vtanh.f32 %v4764_v39  ;;  %v4513_v18 = vmul.f32 0.044715, %v9795_v54 }
 0xb5a   : > { %v4268_v51 = vpop.f32.mrf.mxu0  ;;  %v4381_v7 = vpop.f32.mrf.mxu1  ;;  %v4578_v4 = vmul.f32 %v4514_v29, %v9784_v6  ;;  %v4569_v10 = vmul.f32 %v4505_v0, %v9769_v31  ;;  %v9821_v21 = vadd.f32 %v4375_v14, %v9754_v55  ;;  %v9825_v50 = vadd.f32 %v4379_v52, %v9732_v13 }
 0xb5b   : > { %10865 = vst [vmem:[#allocation47_spill] sm:$0xff] %v9809_v3  ;;  %v4518_v20 = vmul.f32 0.044715, %v9809_v3  ;;  %v9828_v26 = vmul.f32 0.5, %v9737_v11  ;;  %v4571_v28 = vmul.f32 %v4507_v41, %v9777_v38  ;;  %v4702_v5 = vadd.f32 %v4638_v2, %v9759_v59 }
 0xb5c   : > { %v4270_v36 = vpop.f32.mrf.mxu0  ;;  %10866 = vst [vmem:[#allocation49_spill] sm:$0xff] %v9825_v50  ;;  %v4383_v40 = vpop.f32.mrf.mxu1  ;;  %v4580_v16 = vmul.f32 %v4516_v63, %v9791_v47  ;;  %v4573_v0 = vmul.f32 %v4509_v42, %v9780_v27  ;;  %v4704_v14 = vadd.f32 %v4640_v35, %v9762_v1  ;;  %v4575_v39 = vmul.f32 %v4511_v45, %v9788_v32 }
 0xb5d   : > { %v4515_v29 = vmul.f32 0.044715, %v9814_v33  ;;  %v9838_v52 = vmul.f32 0.5, %v9740_v60  ;;  %v4577_v11 = vmul.f32 %v4513_v18, %v9795_v54  ;;  %v4642_v22 = vmul.f32 %v4578_v4, %v9784_v6 }
 0xb5e   : > { %v4520_v41 = vmul.f32 0.044715, %v9825_v50  ;;  %v4272_v2 = vpop.f32.mrf.mxu0  ;;  %v9844_v63 = vmul.f32 %v4567_v25, %v9752_v57  ;;  %v9847_v42 = vmul.f32 %v4569_v10, %v9769_v31  ;;  %v4517_v35 = vmul.f32 0.044715, %v9821_v21  ;;  %v4385_v8 = vpop.f32.mrf.mxu1 }
 0xb5f   : > { %v4582_v45 = vmul.f32 %v4518_v20, %v9809_v3  ;;  %v9852_v60 = vmul.f32 %v4571_v28, %v9777_v38  ;;  %v4766_v18 = vmul.f32 0.7978846, %v4702_v5  ;;  %v4644_v4 = vmul.f32 %v4580_v16, %v9791_v47 }
 0xb60   : > { %v9856_v56 = vadd.f32 %v4268_v51, %v9744_v34  ;;  %v9859_v25 = vmul.f32 %v4573_v0, %v9780_v27  ;;  %v4768_v10 = vmul.f32 0.7978846, %v4704_v14  ;;  %v9862_v37 = vmul.f32 %v4575_v39, %v9788_v32  ;;  %v4276_v16 = vpop.f32.mrf.mxu0 }
 0xb61   : > { %v7148_v43 = vpop.eup %7147  ;;  %v4579_v20 = vmul.f32 %v4515_v29, %v9814_v33  ;;  %v9866_v44 = vmul.f32 %v4577_v11, %v9795_v54  ;;  %v4706_v28 = vadd.f32 %v4642_v22, %v9784_v6  ;;  %v4584_v5 = vmul.f32 %v4520_v41, %v9825_v50  ;;  %v4389_v11 = vpop.f32.mrf.mxu1 }
 0xb62   : > { %v9871_v51 = vadd.f32 %v4270_v36, %v9728_v9  ;;  %v4581_v0 = vmul.f32 %v4517_v35, %v9821_v21  ;;  %v4646_v14 = vmul.f32 %v4582_v45, %v9809_v3  ;;  %v9876_v39 = vadd.f32 %v4381_v7, %v9754_v55  ;;  %v7150_v49 = vpop.eup %7149 }
 0xb63   : > { %v9879_v29 = vadd.f32 %v4383_v40, %v9732_v13  ;;  %7155 = vtanh.f32 %v4766_v18  ;;  %v4708_v22 = vadd.f32 %v4644_v4, %v9791_v47  ;;  %v4519_v41 = vmul.f32 0.044715, %v9856_v56  ;;  %v4278_v4 = vpop.f32.mrf.mxu0  ;;  %v4391_v58 = vpop.f32.mrf.mxu1 }
 0xb64   : > { %10867 = vst [vmem:[#allocation50_spill] sm:$0xff] %v9871_v51  ;;  %v4522_v36 = vmul.f32 0.044715, %v9871_v51  ;;  %v4886_v24 = vadd.f32 1.0, %v7148_v43  ;;  %7157 = vtanh.f32 %v4768_v10  ;;  %v9885_v35 = vmul.f32 %v4579_v20, %v9814_v33 }
 0xb65   : > { %10868 = vst [vmem:[#allocation34_spill] sm:$0xff] %v9879_v29  ;;  %v4524_v7 = vmul.f32 0.044715, %v9879_v29  ;;  %v7152_v45 = vpop.eup %7151  ;;  %v4770_v17 = vmul.f32 0.7978846, %v4706_v28  ;;  %v4648_v40 = vmul.f32 %v4584_v5, %v9825_v50  ;;  %v9891_v18 = vadd.f32 %v4276_v16, %v9728_v9  ;;  %v4280_v46 = vpop.f32.mrf.mxu0 }
 0xb66   : > { %v4586_v30 = vmul.f32 %v4522_v36, %v9871_v51  ;;  %v7154_v12 = vpop.eup %7153  ;;  %v4888_v15 = vadd.f32 1.0, %v7150_v49  ;;  %v9894_v43 = vmul.f32 %v4581_v0, %v9821_v21  ;;  %v4710_v10 = vadd.f32 %v4646_v14, %v9809_v3 }
 0xb67   : > { %10869 = vst [vmem:[#allocation28_spill] sm:$0xff] %v9891_v18  ;;  %v4521_v20 = vmul.f32 0.044715, %v9876_v39  ;;  %v4772_v48 = vmul.f32 0.7978846, %v4708_v22  ;;  %v4583_v28 = vmul.f32 %v4519_v41, %v9856_v56  ;;  %v9900_v5 = vadd.f32 %v4272_v2, %v9744_v34 }
 0xb68   : > { %v9903_v16 = vadd.f32 %v4389_v11, %v9732_v13  ;;  %v9906_v36 = vmul.f32 %v4886_v24, %v9766_v53  ;;  %v4890_v49 = vadd.f32 1.0, %v7152_v45  ;;  %v4588_v0 = vmul.f32 %v4524_v7, %v9879_v29  ;;  %v4393_v53 = vpop.f32.mrf.mxu1 }
 0xb69   : > { %v4526_v14 = vmul.f32 0.044715, %v9891_v18  ;;  %v4892_v61 = vadd.f32 1.0, %v7154_v12  ;;  %7159 = vtanh.f32 %v4770_v17  ;;  %v4712_v22 = vadd.f32 %v4648_v40, %v9825_v50 }
 0xb6a   : > { %10870 = vst [vmem:[#allocation22_spill] sm:$0xff] %v9903_v16  ;;  %v4650_v41 = vmul.f32 %v4586_v30, %v9871_v51  ;;  %v9913_v2 = vmul.f32 %v4888_v15, %v9773_v19  ;;  %v4774_v11 = vmul.f32 0.7978846, %v4710_v10  ;;  %v4585_v3 = vmul.f32 %v4521_v20, %v9876_v39 }
 0xb6b   : > { %v4528_v24 = vmul.f32 0.044715, %v9903_v16  ;;  %7161 = vtanh.f32 %v4772_v48  ;;  %v9918_v7 = vmul.f32 %v4583_v28, %v9856_v56  ;;  %v4523_v12 = vmul.f32 0.044715, %v9900_v5 }
 0xb6c   : > { %v9922_v17 = vadd.f32 %v4385_v8, %v9754_v55  ;;  %v9925_v30 = vmul.f32 %v4890_v49, %v9828_v26  ;;  %v4652_v15 = vmul.f32 %v4588_v0, %v9879_v29  ;;  %v4590_v19 = vmul.f32 %v4526_v14, %v9891_v18 }
 0xb6d   : > { %v9930_v45 = vadd.f32 %v4280_v46, %v9728_v9  ;;  %v9933_v48 = vmul.f32 %v4892_v61, %v9838_v52  ;;  %v4776_v40 = vmul.f32 0.7978846, %v4712_v22  ;;  %v4714_v10 = vadd.f32 %v4650_v41, %v9871_v51 }
 0xb6e   : > { %v9937_v20 = vadd.f32 %v4393_v53, %v9732_v13  ;;  %7163 = vtanh.f32 %v4774_v11  ;;  %v9940_v8 = vmul.f32 %v4585_v3, %v9876_v39  ;;  %v4592_v26 = vmul.f32 %v4528_v24, %v9903_v16 }
 0xb6f   : > { %10871 = vst [vmem:[#allocation23_spill] sm:$0xff] %v9930_v45  ;;  %v4530_v28 = vmul.f32 0.044715, %v9930_v45  ;;  %v4587_v46 = vmul.f32 %v4523_v12, %v9900_v5  ;;  %v4525_v49 = vmul.f32 0.044715, %v9922_v17  ;;  %v9947_v61 = vadd.f32 %v4278_v4, %v9744_v34  ;;  %v4282_v12 = vpop.f32.mrf.mxu0 }
 0xb70   : > { %10872 = vst [vmem:[#allocation26_spill] sm:$0xff] %v9937_v20  ;;  %10873 = vst [vmem:[#allocation33_spill] sm:$0xff] %v9940_v8  ;;  %v4532_v52 = vmul.f32 0.044715, %v9937_v20  ;;  %v9950_v0 = vpop.eup %7155  ;;  %v4716_v3 = vadd.f32 %v4652_v15, %v9879_v29  ;;  %v4654_v22 = vmul.f32 %v4590_v19, %v9891_v18  ;;  %v4695_v41 = vadd.f32 %v9844_v63, %v9752_v57  ;;  %v4395_v29 = vpop.f32.mrf.mxu1 }
 0xb71   : > { %v9958_v11 = vpop.eup %7157  ;;  %7165 = vtanh.f32 %v4776_v40  ;;  %v4778_v24 = vmul.f32 0.7978846, %v4714_v10  ;;  %v9963_v53 = vadd.f32 %v4391_v58, %v9754_v55  ;;  %v4656_v14 = vmul.f32 %v4592_v26, %v9903_v16 }
 0xb72   : > { %v4594_v15 = vmul.f32 %v4530_v28, %v9930_v45  ;;  %v4699_v19 = vadd.f32 %v9852_v60, %v9777_v38  ;;  %v4759_v57 = vmul.f32 0.7978846, %v4695_v41  ;;  %v9970_v63 = vmul.f32 %v4587_v46, %v9900_v5 }
 0xb73   : > { %v4589_v4 = vmul.f32 %v4525_v49, %v9922_v17  ;;  %v4527_v40 = vmul.f32 0.044715, %v9947_v61  ;;  %v4596_v58 = vmul.f32 %v4532_v52, %v9937_v20  ;;  %v4780_v50 = vmul.f32 0.7978846, %v4716_v3 }
 0xb74   : > { %v4718_v26 = vadd.f32 %v4654_v22, %v9891_v18  ;;  %v4763_v51 = vmul.f32 0.7978846, %v4699_v19  ;;  %7167 = vtanh.f32 %v4759_v57  ;;  %v4529_v60 = vmul.f32 0.044715, %v9963_v53 }
 0xb75   : > { %7169 = vtanh.f32 %v4778_v24  ;;  %v4697_v46 = vadd.f32 %v9847_v42, %v9769_v31  ;;  %v4701_v49 = vadd.f32 %v9859_v25, %v9780_v27  ;;  %v4720_v52 = vadd.f32 %v4656_v14, %v9903_v16 }
 0xb76   : > { %v4286_v10 = vpop.f32.mrf.mxu0  ;;  %v4399_v28 = vpop.f32.mrf.mxu1  ;;  %v4658_v3 = vmul.f32 %v4594_v15, %v9930_v45  ;;  %7171 = vtanh.f32 %v4763_v51  ;;  %v4660_v24 = vmul.f32 %v4596_v58, %v9937_v20  ;;  %v4782_v42 = vmul.f32 0.7978846, %v4718_v26 }
 0xb77   : > { %v9981_v41 = vpop.eup %7159  ;;  %v9986_v22 = vadd.f32 %v4286_v10, %v9728_v9  ;;  %v4761_v19 = vmul.f32 0.7978846, %v4697_v46  ;;  %v4765_v57 = vmul.f32 0.7978846, %v4701_v49  ;;  %v9990_v18 = vadd.f32 %v4399_v28, %v9732_v13 }
 0xb78   : > { %v9992_v31 = vpop.eup %7161  ;;  %7173 = vtanh.f32 %v4780_v50  ;;  %v9995_v25 = vadd.f32 %v4282_v12, %v9744_v34  ;;  %v9998_v51 = vpop.f32.mrf.mxu0  ;;  %v10001_v15 = vadd.f32 %v4395_v29, %v9754_v55  ;;  %v4703_v10 = vadd.f32 %v9862_v37, %v9788_v32 }
 0xb79   : > { %10874 = vst [vmem:[#allocation36_spill] sm:$0xff] %v9986_v22  ;;  %10875 = vst [vmem:[#allocation35_spill] sm:$0xff] %v9990_v18  ;;  %v4534_v14 = vmul.f32 0.044715, %v9986_v22  ;;  %v4536_v58 = vmul.f32 0.044715, %v9990_v18  ;;  %v4707_v28 = vadd.f32 %v9885_v35, %v9814_v33  ;;  %v4722_v26 = vadd.f32 %v4658_v3, %v9930_v45 }
 0xb7a   : > { %v4784_v50 = vmul.f32 0.7978846, %v4720_v52  ;;  %7175 = vtanh.f32 %v4761_v19  ;;  %v4724_v49 = vadd.f32 %v4660_v24, %v9937_v20  ;;  %v4767_v29 = vmul.f32 0.7978846, %v4703_v10  ;;  %v4290_v52 = vpop.f32.mrf.mxu0  ;;  %v10023_v10 = vpop.f32.mrf.mxu1 }
 0xb7b   : > { %v4598_v12 = vmul.f32 %v4534_v14, %v9986_v22  ;;  %v10010_v46 = vpop.eup %7163  ;;  %7177 = vtanh.f32 %v4765_v57  ;;  %v4771_v16 = vmul.f32 0.7978846, %v4707_v28  ;;  %v4600_v8 = vmul.f32 %v4536_v58, %v9990_v18 }
 0xb7c   : > { %10876 = vst [vmem:[#allocation51_spill] sm:$0xff] %v10010_v46  ;;  %7179 = vtanh.f32 %v4782_v42  ;;  %v4705_v37 = vadd.f32 %v9866_v44, %v9795_v54  ;;  %v4709_v35 = vadd.f32 %v9894_v43, %v9821_v21  ;;  %v4531_v3 = vmul.f32 0.044715, %v9995_v25 }
 0xb7d   : > { %v4533_v19 = vmul.f32 0.044715, %v10001_v15  ;;  %v4662_v14 = vmul.f32 %v4598_v12, %v9986_v22  ;;  %7181 = vtanh.f32 %v4767_v29  ;;  %v4786_v57 = vmul.f32 0.7978846, %v4722_v26 }
 0xb7e   : > { %v10021_v24 = vpop.eup %7165  ;;  %7183 = vtanh.f32 %v4771_v16  ;;  %v4769_v42 = vmul.f32 0.7978846, %v4705_v37  ;;  %v4773_v58 = vmul.f32 0.7978846, %v4709_v35  ;;  %v10026_v44 = vmul.f32 %v4589_v4, %v9922_v17  ;;  %v10036_v16 = vpop.f32.mrf.mxu0 }
 0xb7f   : > { %10877 = vst [vmem:[#allocation53_spill] sm:$0xff] %v10021_v24  ;;  %7185 = vtanh.f32 %v4784_v50  ;;  %v10029_v43 = vmul.f32 %v4527_v40, %v9947_v61  ;;  %v4788_v28 = vmul.f32 0.7978846, %v4724_v49  ;;  %v10032_v20 = vmul.f32 %v4529_v60, %v9963_v53  ;;  %v4403_v49 = vpop.f32.mrf.mxu1 }
 0xb80   : > { %v4443_v12 = vmul.f32 0.5, %v9777_v38  ;;  %v4664_v26 = vmul.f32 %v4600_v8, %v9990_v18  ;;  %7187 = vtanh.f32 %v4769_v42  ;;  %v10039_v37 = vmul.f32 %v4531_v3, %v9995_v25 }
 0xb81   : > { %v7168_v29 = vpop.eup %7167  ;;  %v4445_v4 = vmul.f32 0.5, %v9780_v27  ;;  %v4726_v40 = vadd.f32 %v4662_v14, %v9986_v22  ;;  %7189 = vtanh.f32 %v4773_v58  ;;  %v10046_v60 = vmul.f32 %v4533_v19, %v10001_v15 }
 0xb82   : > { %v10043_v50 = vpop.eup %7169  ;;  %7191 = vtanh.f32 %v4786_v57  ;;  %v4887_v38 = vadd.f32 1.0, %v7168_v29  ;;  %v4447_v8 = vmul.f32 0.5, %v9788_v32  ;;  %v4451_v3 = vmul.f32 0.5, %v9814_v33  ;;  %v4296_v32 = vpop.f32.mrf.mxu0 }
 0xb83   : > { %v7172_v35 = vpop.eup %7171  ;;  %7193 = vtanh.f32 %v4788_v28  ;;  %v10051_v42 = vmul.f32 0.5, %v9795_v54  ;;  %v4894_v27 = vadd.f32 1.0, %v9950_v0  ;;  %v4728_v58 = vadd.f32 %v4664_v26, %v9990_v18 }
 0xb84   : > { %v4891_v14 = vadd.f32 1.0, %v7172_v35  ;;  %v10056_v57 = vmul.f32 0.5, %v9821_v21  ;;  %v10059_v19 = vadd.f32 %v4290_v52, %v9728_v9  ;;  %v4790_v28 = vmul.f32 0.7978846, %v4726_v40  ;;  %v10071_v52 = vpop.f32.mrf.mxu1 }
 0xb85   : > { %v10061_v29 = vpop.eup %7173  ;;  %v4446_v33 = vmul.f32 0.5, %v9759_v59  ;;  %v4898_v54 = vadd.f32 1.0, %v9981_v41  ;;  %v10066_v22 = vadd.f32 %v4403_v49, %v9732_v13  ;;  %v4951_v0 = vmul.f32 %v4887_v38, %v9800_v23 }
 0xb86   : > { %10878 = vst [vmem:[#allocation31_spill] sm:$0xff] %v10059_v19  ;;  %10879 = vst [vmem:[#allocation32_spill] sm:$0xff] %v10061_v29  ;;  %v4955_v26 = vmul.f32 %v4891_v14, %v4443_v12  ;;  %v4896_v21 = vadd.f32 1.0, %v9958_v11  ;;  %v4538_v35 = vmul.f32 0.044715, %v10059_v19  ;;  %v4450_v45 = vmul.f32 0.5, %v9784_v6 }
 0xb87   : > { %10880 = vst [vmem:[#allocation52_spill] sm:$0xff] %v10066_v22  ;;  %v7176_v18 = vpop.eup %7175  ;;  %v10074_v40 = vmul.f32 %v4894_v27, %v4446_v33  ;;  %v4540_v59 = vmul.f32 0.044715, %v10066_v22  ;;  %v10078_v41 = vadd.f32 %v4296_v32, %v9728_v9  ;;  %v4792_v12 = vmul.f32 0.7978846, %v4728_v58  ;;  %v4409_v58 = vpop.f32.mrf.mxu1 }
 0xb88   : > { %v7178_v49 = vpop.eup %7177  ;;  %v5015_v24 = vpack.c.bf16 %v4955_v26, %v4951_v0  ;;  %v4889_v23 = vadd.f32 1.0, %v7176_v18  ;;  %v4448_v11 = vmul.f32 0.5, %v9762_v1  ;;  %v4962_v29 = vmul.f32 %v4898_v54, %v4450_v45 }
 0xb89   : > { %10881 = vst [vmem:[#allocation21_spill] sm:$0xff] %v10078_v41  ;;  %v10081_v38 = vpop.eup %7179  ;;  %v4893_v14 = vadd.f32 1.0, %v7178_v49  ;;  %v4452_v46 = vmul.f32 0.5, %v9791_v47  ;;  %v4602_v6 = vmul.f32 %v4538_v35, %v10059_v19  ;;  %7195 = vtanh.f32 %v4790_v28 }
 0xb8a   : > { %v7182_v27 = vpop.eup %7181  ;;  %5341 = vmatprep.mubr.bf16.mxu0 %v5015_v24  ;;  %v4900_v32 = vadd.f32 1.0, %v9992_v31  ;;  %v10086_v33 = vmul.f32 %v4896_v21, %v4448_v11  ;;  %v4604_v18 = vmul.f32 %v4540_v59, %v10066_v22  ;;  %v4953_v1 = vmul.f32 %v4889_v23, %v9803_v62  ;;  %v10112_v11 = vpop.f32.mrf.mxu0 }
 0xb8b   : > { %v7184_v0 = vpop.eup %7183  ;;  %v4957_v26 = vmul.f32 %v4893_v14, %v4445_v4  ;;  %v10882_v45 = vpack.c.bf16 %v9925_v30, %v9906_v36  ;;  %v4895_v47 = vadd.f32 1.0, %v7182_v27  ;;  %v4542_v54 = vmul.f32 0.044715, %v10078_v41 }
 0xb8c   : > { %v10094_v24 = vpop.eup %7185  ;;  %7197 = vtanh.f32 %v4792_v12  ;;  %v4899_v31 = vadd.f32 1.0, %v7184_v0  ;;  %v10098_v28 = vadd.f32 %v9998_v51, %v9744_v34  ;;  %v10102_v21 = vadd.f32 %v10023_v10, %v9754_v55 }
 0xb8d   : > { %5342 = vmatmul.mubr.bf16.vlgmr.msra.gmra.mxu0 %v10882_v45  ;;  %v7188_v62 = vpop.eup %7187  ;;  %v5017_v4 = vpack.c.bf16 %v4957_v26, %v4953_v1  ;;  %v4666_v36 = vmul.f32 %v4602_v6, %v10059_v19  ;;  %v10107_v30 = vadd.f32 %v10036_v16, %v9744_v34  ;;  %v10110_v35 = vadd.f32 %v4409_v58, %v9732_v13  ;;  %v10127_v1 = vpop.f32.mrf.mxu1 }
 0xb8e   : > { %10883 = vst [vmem:[#allocation54_spill] sm:$0xff] %v10102_v21  ;;  %v7190_v59 = vpop.eup %7189  ;;  %v4959_v49 = vmul.f32 %v4895_v47, %v4447_v8  ;;  %v4963_v23 = vmul.f32 %v4899_v31, %v4451_v3  ;;  %v4897_v51 = vadd.f32 1.0, %v7188_v62  ;;  %v4964_v12 = vmul.f32 %v4900_v32, %v4452_v46 }
 0xb8f   : > { %10884 = vst [vmem:[#allocation55_spill] sm:$0xff] %v10110_v35  ;;  %v10114_v10 = vpop.eup %7191  ;;  %5438 = vmatprep.mubr.bf16.mxu1 %v5017_v4  ;;  %v4901_v14 = vadd.f32 1.0, %v7190_v59  ;;  %v4668_v6 = vmul.f32 %v4604_v18, %v10066_v22  ;;  %v4606_v27 = vmul.f32 %v4542_v54, %v10078_v41  ;;  %v4544_v16 = vmul.f32 0.044715, %v10110_v35  ;;  %v4413_v59 = vpop.f32.mrf.mxu1 }
 0xb90   : > { %v10119_v0 = vpop.eup %7193  ;;  %v10885_v8 = vpack.c.bf16 %v9933_v48, %v9913_v2  ;;  %v5019_v3 = vpack.c.bf16 %v4963_v23, %v4959_v49  ;;  %v5018_v46 = vpack.c.bf16 %v4962_v29, %v10074_v40  ;;  %v4535_v32 = vmul.f32 0.044715, %v10098_v28 }
 0xb91   : > { %v4537_v58 = vmul.f32 0.044715, %v10102_v21  ;;  %v4961_v18 = vmul.f32 %v4897_v51, %v10051_v42  ;;  %v4965_v26 = vmul.f32 %v4901_v14, %v10056_v57  ;;  %v4730_v45 = vadd.f32 %v4666_v36, %v10059_v19  ;;  %v4300_v42 = vpop.f32.mrf.mxu0 }
 0xb92   : > { %5439 = vmatmul.mubr.bf16.vlgmr.msra.gmra.mxu1 %v10885_v8  ;;  %v4539_v47 = vmul.f32 0.044715, %v10107_v30  ;;  %5349 = vmatprep.mubr.bf16.mxu0 %v5019_v3  ;;  %v5020_v2 = vpack.c.bf16 %v4964_v12, %v10086_v33  ;;  %v10136_v48 = vadd.f32 %v10071_v52, %v9754_v55  ;;  %v4711_v29 = vadd.f32 %v9918_v7, %v9856_v56  ;;  %v10886_v52 = vld [vmem:[#allocation33_spill] sm:$0xff] }
 0xb93   : > { %v4715_v40 = vadd.f32 %v9970_v63, %v9900_v5  ;;  %v5021_v54 = vpack.c.bf16 %v4965_v26, %v4961_v18  ;;  %v4732_v57 = vadd.f32 %v4668_v6, %v10066_v22  ;;  %v4670_v31 = vmul.f32 %v4606_v27, %v10078_v41  ;;  %v4302_v27 = vpop.f32.mrf.mxu0  ;;  %v10165_v18 = vpop.f32.mrf.mxu1 }
 0xb94   : > { %v4608_v62 = vmul.f32 %v4544_v16, %v10110_v35  ;;  %v4775_v33 = vmul.f32 0.7978846, %v4711_v29  ;;  %v4713_v36 = vadd.f32 %v10886_v52, %v9876_v39  ;;  %v4717_v7 = vadd.f32 %v10026_v44, %v9922_v17 }
 0xb95   : > { %5350 = vmatmul.mubr.bf16.gmra.mxu0 %v5018_v46  ;;  %v4779_v4 = vmul.f32 0.7978846, %v4715_v40  ;;  %5446 = vmatprep.mubr.bf16.mxu1 %v5021_v54  ;;  %v4599_v63 = vmul.f32 %v4535_v32, %v10098_v28  ;;  %v4601_v49 = vmul.f32 %v4537_v58, %v10102_v21  ;;  %v4794_v23 = vmul.f32 0.7978846, %v4730_v45  ;;  %v4306_v29 = vpop.f32.mrf.mxu0  ;;  %v4419_v52 = vpop.f32.mrf.mxu1 }
 0xb96   : > { %v4603_v51 = vmul.f32 %v4539_v47, %v10107_v30  ;;  %v4541_v12 = vmul.f32 0.044715, %v10136_v48  ;;  %7199 = vtanh.f32 %v4775_v33  ;;  %v4777_v14 = vmul.f32 0.7978846, %v4713_v36  ;;  %v10153_v16 = vpop.eup %7195  ;;  %v10891_v36 = vld [vmem:[#allocation50_spill] sm:$0xff] }
 0xb97   : > { %v4781_v6 = vmul.f32 0.7978846, %v4717_v7  ;;  %10887 = vst [vmem:[#allocation33_spill] sm:$0xff] %v10153_v16  ;;  %v4655_v44 = vmul.f32 %v10029_v43, %v9947_v61  ;;  %v10159_v8 = vmul.f32 %v10032_v20, %v9963_v53  ;;  %v4796_v3 = vmul.f32 0.7978846, %v4732_v57 }
 0xb98   : > { %7201 = vtanh.f32 %v4779_v4  ;;  %v4659_v46 = vmul.f32 %v10039_v37, %v9995_v25  ;;  %v4734_v32 = vadd.f32 %v4670_v31, %v10078_v41  ;;  %v4672_v58 = vmul.f32 %v4608_v62, %v10110_v35  ;;  %v10890_v62 = vld [vmem:[#allocation51_spill] sm:$0xff] }
 0xb99   : > { %7203 = vtanh.f32 %v4777_v14  ;;  %v10167_v26 = vpop.eup %7197  ;;  %v10171_v43 = vmul.f32 %v10046_v60, %v10001_v15  ;;  %v10174_v20 = vmul.f32 %v4599_v63, %v10098_v28  ;;  %v10177_v45 = vmul.f32 %v4601_v49, %v10102_v21  ;;  %v10892_v49 = vld [vmem:[#allocation47_spill] sm:$0xff] }
 0xb9a   : > { %5447 = vmatmul.mubr.bf16.gmra.mxu1 %v5020_v2  ;;  %10888 = vst [vmem:[#allocation56_spill] sm:$0xff] %v10167_v26  ;;  %7205 = vtanh.f32 %v4794_v23  ;;  %v10180_v37 = vmul.f32 %v4603_v51, %v10107_v30  ;;  %v10183_v47 = vmul.f32 %v4541_v12, %v10136_v48  ;;  %v10186_v2 = vadd.f32 %v4300_v42, %v9728_v9 }
 0xb9b   : > { %10889 = vst [vmem:[#allocation57_spill] sm:$0xff] %v10177_v45  ;;  %7207 = vtanh.f32 %v4781_v6  ;;  %v4455_v60 = vmul.f32 0.5, %v9856_v56  ;;  %v4906_v40 = vadd.f32 1.0, %v10043_v50  ;;  %v10191_v54 = vadd.f32 %v4413_v59, %v9732_v13 }
 0xb9c   : > { %7209 = vtanh.f32 %v4796_v3  ;;  %v4798_v57 = vmul.f32 0.7978846, %v4734_v32  ;;  %v4736_v31 = vadd.f32 %v4672_v58, %v10110_v35  ;;  %v4902_v33 = vadd.f32 1.0, %v10890_v62  ;;  %v10894_v62 = vld [vmem:[#allocation49_spill] sm:$0xff] }
 0xb9d   : > { %v4546_v4 = vmul.f32 0.044715, %v10186_v2  ;;  %v4459_v42 = vmul.f32 0.5, %v9900_v5  ;;  %v4458_v7 = vmul.f32 0.5, %v10891_v36  ;;  %v4548_v63 = vmul.f32 0.044715, %v10191_v54 }
 0xb9e   : > { %v10200_v56 = vadd.f32 %v4306_v29, %v9728_v9  ;;  %v4457_v50 = vmul.f32 0.5, %v9876_v39  ;;  %v4461_v59 = vmul.f32 0.5, %v9922_v17  ;;  %v4454_v23 = vmul.f32 0.5, %v10892_v49  ;;  %v10893_v17 = vld [vmem:[#allocation32_spill] sm:$0xff] }
 0xb9f   : > { %v10207_v51 = vadd.f32 %v10112_v11, %v9744_v34  ;;  %v10209_v12 = vmul.f32 %v4906_v40, %v4458_v7  ;;  %v4610_v5 = vmul.f32 %v4546_v4, %v10186_v2  ;;  %v10214_v6 = vadd.f32 %v4419_v52, %v9732_v13  ;;  %v10895_v52 = vld [vmem:[#allocation34_spill] sm:$0xff] }
 0xba0   : > { %v4550_v14 = vmul.f32 0.044715, %v10200_v56  ;;  %7211 = vtanh.f32 %v4798_v57  ;;  %v10216_v3 = vmul.f32 0.7978846, %v4736_v31  ;;  %v4966_v39 = vmul.f32 %v4902_v33, %v4454_v23  ;;  %v10896_v57 = vld [vmem:[#allocation53_spill] sm:$0xff] }
 0xba1   : > { %v4908_v32 = vadd.f32 1.0, %v10893_v17  ;;  %v10221_v58 = vadd.f32 %v10127_v1, %v9754_v55  ;;  %v4612_v11 = vmul.f32 %v4548_v63, %v10191_v54  ;;  %v4552_v40 = vmul.f32 0.044715, %v10214_v6 }
 0xba2   : > { %v4614_v29 = vmul.f32 %v4550_v14, %v10200_v56  ;;  %v4456_v4 = vmul.f32 0.5, %v10894_v62  ;;  %v4460_v36 = vmul.f32 0.5, %v10895_v52  ;;  %v4904_v31 = vadd.f32 1.0, %v10896_v57  ;;  %v10236_v14 = vpop.f32.mrf.mxu0 }
 0xba3   : > { %v4543_v33 = vmul.f32 0.044715, %v10207_v51  ;;  %v7200_v7 = vpop.eup %7199  ;;  %v5022_v49 = vpack.c.bf16 %v10209_v12, %v4966_v39  ;;  %v4674_v1 = vmul.f32 %v4610_v5, %v10186_v2  ;;  %v10233_v23 = vadd.f32 %v4302_v27, %v9744_v34  ;;  %v10243_v39 = vpop.f32.mrf.mxu1 }
 0xba4   : > { %v4719_v63 = vadd.f32 %v4655_v44, %v9947_v61  ;;  %v4903_v62 = vadd.f32 1.0, %v7200_v7  ;;  %v4972_v35 = vmul.f32 %v4908_v32, %v4460_v36  ;;  %v4616_v52 = vmul.f32 %v4552_v40, %v10214_v6 }
 0xba5   : > { %v7202_v17 = vpop.eup %7201  ;;  %v4723_v57 = vadd.f32 %v4659_v46, %v9995_v25  ;;  %v4545_v12 = vmul.f32 0.044715, %v10221_v58  ;;  %v4676_v5 = vmul.f32 %v4612_v11, %v10191_v54  ;;  %v4678_v27 = vmul.f32 %v4614_v29, %v10200_v56  ;;  %v4310_v29 = vpop.f32.mrf.mxu0 }
 0xba6   : > { %v7204_v41 = vpop.eup %7203  ;;  %v4907_v26 = vadd.f32 1.0, %v7202_v17  ;;  %v4607_v7 = vmul.f32 %v4543_v33, %v10207_v51  ;;  %v10250_v32 = vadd.f32 %v10165_v18, %v9754_v55  ;;  %v4783_v46 = vmul.f32 0.7978846, %v4719_v63 }
 0xba7   : > { %v10245_v44 = vpop.eup %7205  ;;  %v4905_v22 = vadd.f32 1.0, %v7204_v41  ;;  %v4967_v36 = vmul.f32 %v4903_v62, %v4455_v60  ;;  %v4738_v19 = vadd.f32 %v4674_v1, %v10186_v2  ;;  %v4547_v11 = vmul.f32 0.044715, %v10233_v23  ;;  %v4423_v60 = vpop.f32.mrf.mxu1 }
 0xba8   : > { %10897 = vst [vmem:[#allocation51_spill] sm:$0xff] %v10245_v44  ;;  %v7208_v40 = vpop.eup %7207  ;;  %v4971_v17 = vmul.f32 %v4907_v26, %v4459_v42  ;;  %v4680_v41 = vmul.f32 %v4616_v52, %v10214_v6  ;;  %v4787_v44 = vmul.f32 0.7978846, %v4723_v57  ;;  %7213 = vtanh.f32 %v4783_v46 }
 0xba9   : > { %v10254_v16 = vpop.eup %7209  ;;  %v4909_v45 = vadd.f32 1.0, %v7208_v40  ;;  %v4969_v21 = vmul.f32 %v4905_v22, %v4457_v50  ;;  %v4740_v18 = vadd.f32 %v4676_v5, %v10191_v54  ;;  %v4742_v63 = vadd.f32 %v4678_v27, %v10200_v56  ;;  %v10265_v50 = vpop.f32.mrf.mxu0 }
 0xbaa   : > { %v5023_v33 = vpack.c.bf16 %v4971_v17, %v4967_v36  ;;  %7215 = vtanh.f32 %v4787_v44  ;;  %v4721_v42 = vadd.f32 %v10159_v8, %v9963_v53  ;;  %v4725_v1 = vadd.f32 %v10171_v43, %v10001_v15 }
 0xbab   : > { %v4973_v26 = vmul.f32 %v4909_v45, %v4461_v59  ;;  %v4968_v62 = vmul.f32 %v4904_v31, %v4456_v4  ;;  %v4609_v52 = vmul.f32 %v4545_v12, %v10221_v58  ;;  %v4802_v57 = vmul.f32 0.7978846, %v4738_v19  ;;  %v4425_v31 = vpop.f32.mrf.mxu1  ;;  %v4316_v46 = vpop.f32.mrf.mxu0 }
 0xbac   : > { %5357 = vmatprep.mubr.bf16.mxu0 %v5023_v33  ;;  %v4549_v22 = vmul.f32 0.044715, %v10250_v32  ;;  %v4744_v45 = vadd.f32 %v4680_v41, %v10214_v6  ;;  %v4785_v59 = vmul.f32 0.7978846, %v4721_v42  ;;  %v4789_v27 = vmul.f32 0.7978846, %v4725_v1 }
 0xbad   : > { %v5025_v5 = vpack.c.bf16 %v4973_v26, %v4969_v21  ;;  %5358 = vmatmul.mubr.bf16.gmra.mxu0 %v5022_v49  ;;  %v10268_v44 = vpop.eup %7211  ;;  %7217 = vtanh.f32 %v10216_v3  ;;  %v5024_v8 = vpack.c.bf16 %v4972_v35, %v4968_v62  ;;  %v4804_v43 = vmul.f32 0.7978846, %v4740_v18  ;;  %v4429_v41 = vpop.f32.mrf.mxu1 }
 0xbae   : > { %v4611_v4 = vmul.f32 %v4547_v11, %v10233_v23  ;;  %v10274_v19 = vmul.f32 %v10183_v47, %v10136_v48  ;;  %v10277_v21 = vmul.f32 %v4607_v7, %v10207_v51  ;;  %v4806_v49 = vmul.f32 0.7978846, %v4742_v63  ;;  %v4318_v26 = vpop.f32.mrf.mxu0 }
 0xbaf   : > { %5454 = vmatprep.mubr.bf16.mxu1 %v5025_v5  ;;  %7219 = vtanh.f32 %v4785_v59  ;;  %v10280_v12 = vmul.f32 %v4609_v52, %v10221_v58  ;;  %v10283_v35 = vmul.f32 %v4549_v22, %v10250_v32  ;;  %v10286_v3 = vadd.f32 %v4310_v29, %v9728_v9  ;;  %v10899_v52 = vld [vmem:[#allocation23_spill] sm:$0xff] }
 0xbb0   : > { %5455 = vmatmul.mubr.bf16.gmra.mxu1 %v5024_v8  ;;  %7221 = vtanh.f32 %v4789_v27  ;;  %v4808_v47 = vmul.f32 0.7978846, %v4744_v45  ;;  %v4463_v40 = vmul.f32 0.5, %v9947_v61  ;;  %v10290_v7 = vadd.f32 %v4423_v60, %v9732_v13  ;;  %v10901_v45 = vld [vmem:[#allocation28_spill] sm:$0xff] }
 0xbb1   : > { %7223 = vtanh.f32 %v4802_v57  ;;  %v10293_v36 = vmul.f32 %v4611_v4, %v10233_v23  ;;  %v4467_v17 = vmul.f32 0.5, %v9995_v25  ;;  %v4554_v11 = vmul.f32 0.044715, %v10286_v3  ;;  %v10900_v57 = vld [vmem:[#allocation26_spill] sm:$0xff] }
 0xbb2   : > { %7225 = vtanh.f32 %v4804_v43  ;;  %v10298_v29 = vmul.f32 0.5, %v9963_v53  ;;  %v4556_v33 = vmul.f32 0.044715, %v10290_v7  ;;  %v10302_v61 = vadd.f32 %v4316_v46, %v9728_v9 }
 0xbb3   : > { %7227 = vtanh.f32 %v4806_v49  ;;  %v4469_v18 = vmul.f32 0.5, %v10001_v15  ;;  %v4914_v63 = vadd.f32 1.0, %v10114_v10  ;;  %v4916_v60 = vadd.f32 1.0, %v10119_v0 }
 0xbb4   : > { %v4618_v25 = vmul.f32 %v4554_v11, %v10286_v3  ;;  %7229 = vtanh.f32 %v4808_v47  ;;  %v4910_v42 = vadd.f32 1.0, %v10081_v38  ;;  %v10311_v53 = vadd.f32 %v10236_v14, %v9744_v34  ;;  %v10902_v38 = vld [vmem:[#allocation22_spill] sm:$0xff]  ;;  %v4320_v47 = vpop.f32.mrf.mxu0 }
 0xbb5   : > { %v10314_v1 = vadd.f32 %v4429_v41, %v9732_v13  ;;  %v7214_v62 = vpop.eup %7213  ;;  %v4466_v15 = vmul.f32 0.5, %v10899_v52  ;;  %v4468_v10 = vmul.f32 0.5, %v10900_v57  ;;  %v4912_v0 = vadd.f32 1.0, %v10094_v24  ;;  %v4431_v24 = vpop.f32.mrf.mxu1 }
 0xbb6   : > { %v4620_v22 = vmul.f32 %v4556_v33, %v10290_v7  ;;  %v4911_v5 = vadd.f32 1.0, %v7214_v62  ;;  %v4462_v59 = vmul.f32 0.5, %v10901_v45  ;;  %v4464_v27 = vmul.f32 0.5, %v10902_v38 }
 0xbb7   : > { %10898 = vst [vmem:[#allocation50_spill] sm:$0xff] %v10314_v1  ;;  %v4558_v14 = vmul.f32 0.044715, %v10302_v61  ;;  %v7216_v8 = vpop.eup %7215  ;;  %v4978_v43 = vmul.f32 %v4914_v63, %v4466_v15  ;;  %v10323_v4 = vmul.f32 %v4916_v60, %v4468_v10  ;;  %v10327_v49 = vadd.f32 %v10243_v39, %v9754_v55  ;;  %v4433_v38 = vpop.f32.mrf.mxu1 }
 0xbb8   : > { %v4682_v46 = vmul.f32 %v4618_v25, %v10286_v3  ;;  %v4915_v11 = vadd.f32 1.0, %v7216_v8  ;;  %v4974_v41 = vmul.f32 %v4910_v42, %v4462_v59  ;;  %v4551_v33 = vmul.f32 0.044715, %v10311_v53 }
 0xbb9   : > { %v4560_v62 = vmul.f32 0.044715, %v10314_v1  ;;  %v4976_v52 = vmul.f32 %v4912_v0, %v4464_v27  ;;  %v4684_v57 = vmul.f32 %v4620_v22, %v10290_v7  ;;  %v10335_v63 = vadd.f32 %v10265_v50, %v9744_v34 }
 0xbba   : > { %v10338_v39 = vadd.f32 %v4425_v31, %v9754_v55  ;;  %v10340_v60 = vpop.eup %7217  ;;  %v4975_v25 = vmul.f32 %v4911_v5, %v4463_v40  ;;  %v4979_v15 = vmul.f32 %v4915_v11, %v4467_v17  ;;  %v4622_v42 = vmul.f32 %v4558_v14, %v10302_v61 }
 0xbbb   : > { %v10344_v10 = vadd.f32 %v4320_v47, %v9728_v9  ;;  %v5026_v0 = vpack.c.bf16 %v4978_v43, %v4974_v41  ;;  %v5028_v22 = vpack.c.bf16 %v10323_v4, %v4976_v52  ;;  %v4553_v59 = vmul.f32 0.044715, %v10327_v49 }
 0xbbc   : > { %v7220_v45 = vpop.eup %7219  ;;  %v4746_v50 = vadd.f32 %v4682_v46, %v10286_v3  ;;  %v5027_v27 = vpack.c.bf16 %v4979_v15, %v4975_v25  ;;  %v4615_v40 = vmul.f32 %v4551_v33, %v10311_v53  ;;  %v4624_v17 = vmul.f32 %v4560_v62, %v10314_v1 }
 0xbbd   : > { %v7222_v31 = vpop.eup %7221  ;;  %v4913_v8 = vadd.f32 1.0, %v7220_v45  ;;  %v4555_v14 = vmul.f32 0.044715, %v10335_v63  ;;  %v4557_v43 = vmul.f32 0.044715, %v10338_v39  ;;  %v10356_v4 = vadd.f32 %v4318_v26, %v9744_v34 }
 0xbbe   : > { %v10351_v5 = vpop.eup %7223  ;;  %v4917_v9 = vadd.f32 1.0, %v7222_v31  ;;  %5365 = vmatprep.mubr.bf16.mxu0 %v5027_v27  ;;  %v4748_v46 = vadd.f32 %v4684_v57, %v10290_v7  ;;  %v4686_v11 = vmul.f32 %v4622_v42, %v10302_v61  ;;  %v4562_v41 = vmul.f32 0.044715, %v10344_v10 }
 0xbbf   : > { %v10358_v47 = vpop.eup %7225  ;;  %v10364_v33 = vadd.f32 %v4433_v38, %v9732_v13  ;;  %v4977_v52 = vmul.f32 %v4913_v8, %v10298_v29  ;;  %5366 = vmatmul.mubr.bf16.gmra.mxu0 %v5026_v0  ;;  %v4810_v26 = vmul.f32 0.7978846, %v4746_v50  ;;  %v10370_v15 = vadd.f32 %v4431_v24, %v9754_v55  ;;  %v4322_v0 = vpop.f32.mrf.mxu0 }
 0xbc0   : > { %v10366_v62 = vpop.eup %7227  ;;  %v4981_v25 = vmul.f32 %v4917_v9, %v4469_v18  ;;  %v4617_v45 = vmul.f32 %v4553_v59, %v10327_v49  ;;  %v4688_v57 = vmul.f32 %v4624_v17, %v10314_v1  ;;  %v4626_v42 = vmul.f32 %v4562_v41, %v10344_v10  ;;  %v4435_v8 = vpop.f32.mrf.mxu1 }
 0xbc1   : > { %v4564_v31 = vmul.f32 0.044715, %v10364_v33  ;;  %v10376_v13 = vpop.eup %7229  ;;  %v4619_v27 = vmul.f32 %v4555_v14, %v10335_v63  ;;  %v4621_v29 = vmul.f32 %v4557_v43, %v10338_v39  ;;  %v4559_v18 = vmul.f32 0.044715, %v10356_v4 }
 0xbc2   : > { %v5029_v38 = vpack.c.bf16 %v4981_v25, %v4977_v52  ;;  %v4750_v24 = vadd.f32 %v4686_v11, %v10302_v61  ;;  %v4690_v59 = vmul.f32 %v4626_v42, %v10344_v10  ;;  %v4727_v17 = vadd.f32 %v10174_v20, %v10098_v28 }
 0xbc3   : > { %v4628_v50 = vmul.f32 %v4564_v31, %v10364_v33  ;;  %7231 = vtanh.f32 %v4810_v26  ;;  %v4812_v9 = vmul.f32 0.7978846, %v4748_v46  ;;  %v4561_v14 = vmul.f32 0.044715, %v10370_v15  ;;  %v10903_v26 = vld [vmem:[#allocation54_spill] sm:$0xff]  ;;  %v10904_v46 = vld [vmem:[#allocation57_spill] sm:$0xff] }
 0xbc4   : > { %5462 = vmatprep.mubr.bf16.mxu1 %v5029_v38  ;;  %v4731_v43 = vadd.f32 %v10180_v37, %v10107_v30  ;;  %v4752_v41 = vadd.f32 %v4688_v57, %v10314_v1  ;;  %v10392_v52 = vadd.f32 %v4322_v0, %v9744_v34  ;;  %v4791_v25 = vmul.f32 0.7978846, %v4727_v17 }
 0xbc5   : > { %5463 = vmatmul.mubr.bf16.gmra.mxu1 %v5028_v22  ;;  %v4692_v11 = vmul.f32 %v4628_v50, %v10364_v33  ;;  %v10395_v42 = vadd.f32 %v4435_v8, %v9754_v55  ;;  %v4729_v31 = vadd.f32 %v10904_v46, %v10903_v26  ;;  %v4733_v38 = vadd.f32 %v10274_v19, %v10136_v48 }
 0xbc6   : > { %v4795_v20 = vmul.f32 0.7978846, %v4731_v43  ;;  %v4814_v37 = vmul.f32 0.7978846, %v4750_v24  ;;  %v4623_v22 = vmul.f32 %v4559_v18, %v10356_v4  ;;  %v4754_v57 = vadd.f32 %v4690_v59, %v10344_v10 }
 0xbc7   : > { %7233 = vtanh.f32 %v4791_v25  ;;  %v4756_v34 = vadd.f32 %v4692_v11, %v10364_v33  ;;  %v4793_v0 = vmul.f32 0.7978846, %v4729_v31  ;;  %v4797_v50 = vmul.f32 0.7978846, %v4733_v38 }
 0xbc8   : > { %7235 = vtanh.f32 %v4795_v20  ;;  %v4677_v55 = vmul.f32 %v10283_v35, %v10250_v32  ;;  %v4679_v8 = vmul.f32 %v4615_v40, %v10311_v53  ;;  %v4625_v17 = vmul.f32 %v4561_v14, %v10370_v15 }
 0xbc9   : > { %7237 = vtanh.f32 %v4812_v9  ;;  %v4816_v19 = vmul.f32 0.7978846, %v4752_v41  ;;  %v4563_v24 = vmul.f32 0.044715, %v10392_v52  ;;  %v4565_v18 = vmul.f32 0.044715, %v10395_v42 }
 0xbca   : > { %7239 = vtanh.f32 %v4793_v0  ;;  %v4681_v59 = vmul.f32 %v4617_v45, %v10327_v49  ;;  %v4683_v43 = vmul.f32 %v4619_v27, %v10335_v63  ;;  %v4818_v11 = vmul.f32 0.7978846, %v4754_v57 }
 0xbcb   : > { %7241 = vtanh.f32 %v4814_v37  ;;  %v4685_v25 = vmul.f32 %v4621_v29, %v10338_v39  ;;  %v10414_v35 = vmul.f32 %v4623_v22, %v10356_v4  ;;  %v4820_v40 = vmul.f32 0.7978846, %v4756_v34 }
 0xbcc   : > { %7243 = vtanh.f32 %v4797_v50  ;;  %v10417_v9 = vmul.f32 %v4625_v17, %v10370_v15  ;;  %v4471_v14 = vmul.f32 0.5, %v10098_v28  ;;  %v4735_v41 = vadd.f32 %v10277_v21, %v10207_v51  ;;  %v10905_v21 = vld [vmem:[#allocation33_spill] sm:$0xff]  ;;  %v10906_v50 = vld [vmem:[#allocation36_spill] sm:$0xff] }
 0xbcd   : > { %v4739_v45 = vadd.f32 %v10293_v36, %v10233_v23  ;;  %7245 = vtanh.f32 %v4816_v19  ;;  %v4627_v27 = vmul.f32 %v4563_v24, %v10392_v52  ;;  %v4629_v29 = vmul.f32 %v4565_v18, %v10395_v42  ;;  %v10908_v24 = vld [vmem:[#allocation31_spill] sm:$0xff] }
 0xbce   : > { %v4737_v20 = vadd.f32 %v10280_v12, %v10221_v58  ;;  %7247 = vtanh.f32 %v4818_v11  ;;  %v4799_v46 = vmul.f32 0.7978846, %v4735_v41  ;;  %v4741_v38 = vadd.f32 %v4677_v55, %v10250_v32  ;;  %v10907_v55 = vld [vmem:[#allocation51_spill] sm:$0xff]  ;;  %v10910_v41 = vld [vmem:[#allocation52_spill] sm:$0xff] }
 0xbcf   : > { %v4803_v31 = vmul.f32 0.7978846, %v4739_v45  ;;  %7249 = vtanh.f32 %v4820_v40  ;;  %v4475_v28 = vmul.f32 0.5, %v10107_v30  ;;  %v4918_v37 = vadd.f32 1.0, %v10905_v21  ;;  %v10909_v11 = vld [vmem:[#allocation35_spill] sm:$0xff] }
 0xbd0   : > { %v4801_v22 = vmul.f32 0.7978846, %v4737_v20  ;;  %v10431_v36 = vpop.eup %7231  ;;  %v4473_v57 = vmul.f32 0.5, %v10903_v26  ;;  %v4477_v34 = vmul.f32 0.5, %v10136_v48  ;;  %7251 = vtanh.f32 %v4799_v46 }
 0xbd1   : > { %v4805_v0 = vmul.f32 0.7978846, %v4741_v38  ;;  %v10436_v12 = vmul.f32 %v4627_v27, %v10392_v52  ;;  %v4470_v17 = vmul.f32 0.5, %v10906_v50  ;;  %v4922_v19 = vadd.f32 1.0, %v10907_v55  ;;  %v10911_v38 = vld [vmem:[#allocation56_spill] sm:$0xff] }
 0xbd2   : > { %7253 = vtanh.f32 %v4803_v31  ;;  %v10441_v30 = vmul.f32 %v4629_v29, %v10395_v42  ;;  %v4474_v18 = vmul.f32 0.5, %v10908_v24  ;;  %v4472_v40 = vmul.f32 0.5, %v10909_v11 }
 0xbd3   : > { %7255 = vtanh.f32 %v4801_v22  ;;  %v4982_v48 = vmul.f32 %v4918_v37, %v4470_v17  ;;  %v4476_v45 = vmul.f32 0.5, %v10910_v41  ;;  %v4743_v27 = vadd.f32 %v4679_v8, %v10311_v53 }
 0xbd4   : > { %v7234_v26 = vpop.eup %7233  ;;  %7257 = vtanh.f32 %v4805_v0  ;;  %v4920_v21 = vadd.f32 1.0, %v10911_v38  ;;  %v4924_v31 = vadd.f32 1.0, %v10254_v16  ;;  %v4747_v29 = vadd.f32 %v4683_v43, %v10335_v63 }
 0xbd5   : > { %v7236_v20 = vpop.eup %7235  ;;  %v4919_v46 = vadd.f32 1.0, %v7234_v26  ;;  %v4986_v24 = vmul.f32 %v4922_v19, %v4474_v18  ;;  %v4479_v22 = vmul.f32 0.5, %v10207_v51  ;;  %v4807_v37 = vmul.f32 0.7978846, %v4743_v27 }
 0xbd6   : > { %v10450_v50 = vpop.eup %7237  ;;  %v4923_v55 = vadd.f32 1.0, %v7236_v20  ;;  %v4483_v0 = vmul.f32 0.5, %v10233_v23  ;;  %v4811_v8 = vmul.f32 0.7978846, %v4747_v29  ;;  %v4745_v26 = vadd.f32 %v4681_v59, %v10327_v49 }
 0xbd7   : > { %v7240_v17 = vpop.eup %7239  ;;  %v4983_v11 = vmul.f32 %v4919_v46, %v4471_v14  ;;  %7259 = vtanh.f32 %v4807_v37  ;;  %v4749_v43 = vadd.f32 %v4685_v25, %v10338_v39  ;;  %v4984_v20 = vmul.f32 %v4920_v21, %v4472_v40 }
 0xbd8   : > { %v10455_v41 = vpop.eup %7241  ;;  %v4987_v38 = vmul.f32 %v4923_v55, %v4475_v28  ;;  %v4921_v16 = vadd.f32 1.0, %v7240_v17  ;;  %v4988_v19 = vmul.f32 %v4924_v31, %v4476_v45  ;;  %7261 = vtanh.f32 %v4811_v8  ;;  %v10912_v28 = vld [vmem:[#allocation21_spill] sm:$0xff] }
 0xbd9   : > { %v7244_v1 = vpop.eup %7243  ;;  %v4809_v51 = vmul.f32 0.7978846, %v4745_v26  ;;  %v4926_v14 = vadd.f32 1.0, %v10268_v44  ;;  %v4813_v23 = vmul.f32 0.7978846, %v4749_v43  ;;  %v5030_v59 = vpack.c.bf16 %v4986_v24, %v4982_v48 }
 0xbda   : > { %v5031_v18 = vpack.c.bf16 %v4987_v38, %v4983_v11  ;;  %v4925_v27 = vadd.f32 1.0, %v7244_v1  ;;  %v10459_v46 = vpop.eup %7245  ;;  %v4481_v29 = vmul.f32 0.5, %v10221_v58  ;;  %v4478_v55 = vmul.f32 0.5, %v10912_v28  ;;  %v10913_v11 = vld [vmem:[#allocation55_spill] sm:$0xff] }
 0xbdb   : > { %7263 = vtanh.f32 %v4809_v51  ;;  %v10463_v37 = vpop.eup %7247  ;;  %v4985_v25 = vmul.f32 %v4921_v16, %v4473_v57  ;;  %v4930_v45 = vadd.f32 1.0, %v10351_v5  ;;  %v5032_v44 = vpack.c.bf16 %v4988_v19, %v4984_v20 }
 0xbdc   : > { %5373 = vmatprep.mubr.bf16.mxu0 %v5031_v18  ;;  %v4989_v40 = vmul.f32 %v4925_v27, %v4477_v34  ;;  %7265 = vtanh.f32 %v4813_v23  ;;  %v10466_v1 = vpop.eup %7249  ;;  %v4485_v21 = vmul.f32 0.5, %v10250_v32  ;;  %v4482_v48 = vmul.f32 0.5, %v10186_v2 }
 0xbdd   : > { %5374 = vmatmul.mubr.bf16.gmra.mxu0 %v5030_v59  ;;  %v4932_v58 = vadd.f32 1.0, %v10358_v47  ;;  %v7252_v31 = vpop.eup %7251  ;;  %v4990_v17 = vmul.f32 %v4926_v14, %v4478_v55  ;;  %v4480_v8 = vmul.f32 0.5, %v10913_v11  ;;  %v4751_v57 = vadd.f32 %v10414_v35, %v10356_v4 }
 0xbde   : > { %v5033_v24 = vpack.c.bf16 %v4989_v40, %v4985_v25  ;;  %v4927_v34 = vadd.f32 1.0, %v7252_v31  ;;  %v4484_v26 = vmul.f32 0.5, %v10191_v54  ;;  %v4928_v38 = vadd.f32 1.0, %v10340_v60 }
 0xbdf   : > { %v7254_v5 = vpop.eup %7253  ;;  %v4755_v32 = vadd.f32 %v10436_v12, %v10392_v52  ;;  %v4994_v16 = vmul.f32 %v4930_v45, %v4482_v48  ;;  %v4487_v43 = vmul.f32 0.5, %v10311_v53  ;;  %v4815_v20 = vmul.f32 0.7978846, %v4751_v57 }
 0xbe0   : > { %v7256_v2 = vpop.eup %7255  ;;  %5470 = vmatprep.mubr.bf16.mxu1 %v5033_v24  ;;  %v4931_v47 = vadd.f32 1.0, %v7254_v5  ;;  %v4991_v51 = vmul.f32 %v4927_v34, %v4479_v22  ;;  %v4996_v18 = vmul.f32 %v4932_v58, %v4484_v26  ;;  %v4753_v60 = vadd.f32 %v10417_v9, %v10370_v15 }
 0xbe1   : > { %v7258_v19 = vpop.eup %7257  ;;  %5471 = vmatmul.mubr.bf16.gmra.mxu1 %v5032_v44  ;;  %v4929_v35 = vadd.f32 1.0, %v7256_v2  ;;  %v4819_v27 = vmul.f32 0.7978846, %v4755_v32  ;;  %7267 = vtanh.f32 %v4815_v20  ;;  %v4992_v12 = vmul.f32 %v4928_v38, %v4480_v8 }
 0xbe2   : > { %v4995_v14 = vmul.f32 %v4931_v47, %v4483_v0  ;;  %v4933_v54 = vadd.f32 1.0, %v7258_v19  ;;  %v4491_v23 = vmul.f32 0.5, %v10335_v63  ;;  %v4757_v53 = vadd.f32 %v10441_v30, %v10395_v42 }
 0xbe3   : > { %7269 = vtanh.f32 %v4819_v27  ;;  %v4993_v28 = vmul.f32 %v4929_v35, %v4481_v29  ;;  %v4817_v22 = vmul.f32 0.7978846, %v4753_v60  ;;  %v5034_v40 = vpack.c.bf16 %v4994_v16, %v4990_v17 }
 0xbe4   : > { %v5035_v59 = vpack.c.bf16 %v4995_v14, %v4991_v51  ;;  %v4997_v55 = vmul.f32 %v4933_v54, %v4485_v21  ;;  %v7260_v25 = vpop.eup %7259  ;;  %v5036_v45 = vpack.c.bf16 %v4996_v18, %v4992_v12  ;;  %v4938_v0 = vadd.f32 1.0, %v10431_v36 }
 0xbe5   : > { %v4821_v44 = vmul.f32 0.7978846, %v4757_v53  ;;  %v7262_v48 = vpop.eup %7261  ;;  %v4935_v58 = vadd.f32 1.0, %v7260_v25  ;;  %v4490_v63 = vmul.f32 0.5, %v10286_v3  ;;  %7271 = vtanh.f32 %v4817_v22  ;;  %v10914_v25 = vld [vmem:[#allocation50_spill] sm:$0xff] }
 0xbe6   : > { %5381 = vmatprep.mubr.bf16.mxu0 %v5035_v59  ;;  %v5037_v9 = vpack.c.bf16 %v4997_v55, %v4993_v28  ;;  %v4939_v31 = vadd.f32 1.0, %v7262_v48  ;;  %v4934_v30 = vadd.f32 1.0, %v10366_v62  ;;  %v4940_v29 = vadd.f32 1.0, %v10450_v50 }
 0xbe7   : > { %5382 = vmatmul.mubr.bf16.gmra.mxu0 %v5034_v40  ;;  %7273 = vtanh.f32 %v4821_v44  ;;  %v4486_v24 = vmul.f32 0.5, %v10200_v56  ;;  %v4492_v36 = vmul.f32 0.5, %v10290_v7  ;;  %v4936_v17 = vadd.f32 1.0, %v10376_v13 }
 0xbe8   : > { %v7264_v21 = vpop.eup %7263  ;;  %5478 = vmatprep.mubr.bf16.mxu1 %v5037_v9  ;;  %v4999_v8 = vmul.f32 %v4935_v58, %v4487_v43  ;;  %v5003_v3 = vmul.f32 %v4939_v31, %v4491_v23  ;;  %v5002_v5 = vmul.f32 %v4938_v0, %v4490_v63  ;;  %v4489_v34 = vmul.f32 0.5, %v10327_v49 }
 0xbe9   : > { %v7266_v11 = vpop.eup %7265  ;;  %5479 = vmatmul.mubr.bf16.gmra.mxu1 %v5036_v45  ;;  %v4937_v57 = vadd.f32 1.0, %v7264_v21  ;;  %v4493_v62 = vmul.f32 0.5, %v10338_v39  ;;  %v4998_v38 = vmul.f32 %v4934_v30, %v4486_v24  ;;  %v4488_v32 = vmul.f32 0.5, %v10214_v6 }
 0xbea   : > { %v4941_v50 = vadd.f32 1.0, %v7266_v11  ;;  %v5039_v26 = vpack.c.bf16 %v5003_v3, %v4999_v8  ;;  %v5004_v56 = vmul.f32 %v4940_v29, %v4492_v36  ;;  %v4946_v43 = vadd.f32 1.0, %v10463_v37 }
 0xbeb   : > { %v5001_v2 = vmul.f32 %v4937_v57, %v4489_v34  ;;  %v5038_v13 = vpack.c.bf16 %v5002_v5, %v4998_v38  ;;  %v5000_v47 = vmul.f32 %v4936_v17, %v4488_v32  ;;  %v4498_v51 = vmul.f32 0.5, %v10344_v10  ;;  %v10915_v34 = vld [vmem:[#allocation25_spill] sm:$0xff] }
 0xbec   : > { %v5005_v7 = vmul.f32 %v4941_v50, %v4493_v62  ;;  %5389 = vmatprep.mubr.bf16.mxu0 %v5039_v26  ;;  %v4942_v35 = vadd.f32 1.0, %v10455_v41  ;;  %v4495_v6 = vmul.f32 0.5, %v10356_v4  ;;  %v4499_v18 = vmul.f32 0.5, %v10392_v52 }
 0xbed   : > { %v5040_v19 = vpack.c.bf16 %v5004_v56, %v5000_v47  ;;  %v4494_v14 = vmul.f32 0.5, %v10302_v61  ;;  %v5010_v54 = vmul.f32 %v4946_v43, %v4498_v51  ;;  %v4948_v37 = vadd.f32 1.0, %v10466_v1  ;;  %v10916_v47 = vld [vmem:[#allocation29_spill] sm:$0xff]  ;;  %v10917_v51 = vld [vmem:[#allocation30_spill] sm:$0xff] }
 0xbee   : > { %v5041_v16 = vpack.c.bf16 %v5005_v7, %v5001_v2  ;;  %v7268_v20 = vpop.eup %7267  ;;  %v4500_v10 = vmul.f32 0.5, %v10364_v33  ;;  %v4944_v41 = vadd.f32 1.0, %v10459_v46  ;;  %v4497_v4 = vmul.f32 0.5, %v10370_v15  ;;  %v10509_v15 = vld [vmem:[%s10625_s12] ss:$0 sm:$0xff] }
 0xbef   : > { %5390 = vmatmul.mubr.bf16.gmra.mxu0 %v5038_v13  ;;  %v4943_v39 = vadd.f32 1.0, %v7268_v20  ;;  %v5006_v28 = vmul.f32 %v4942_v35, %v4494_v14  ;;  %v4501_v52 = vmul.f32 0.5, %v10395_v42  ;;  %v4496_v40 = vmul.f32 0.5, %v10914_v25 }
 0xbf0   : > { %v7270_v49 = vpop.eup %7269  ;;  %5486 = vmatprep.mubr.bf16.mxu1 %v5041_v16  ;;  %v5012_v1 = vmul.f32 %v4948_v37, %v4500_v10 }
 0xbf1   : > { %5487 = vmatmul.mubr.bf16.gmra.mxu1 %v5040_v19  ;;  %v4947_v27 = vadd.f32 1.0, %v7270_v49  ;;  %v5007_v12 = vmul.f32 %v4943_v39, %v4495_v6  ;;  %v5042_v61 = vpack.c.bf16 %v5010_v54, %v5006_v28  ;;  %v5008_v44 = vmul.f32 %v4944_v41, %v4496_v40 }
 0xbf2   : > { %v7272_v60 = vpop.eup %7271 }
 0xbf3   : > { %v5011_v23 = vmul.f32 %v4947_v27, %v4499_v18  ;;  %v4945_v59 = vadd.f32 1.0, %v7272_v60  ;;  %v5044_v9 = vpack.c.bf16 %v5012_v1, %v5008_v44  ;;  %v10918_v27 = vld [vmem:[#allocation24_spill] sm:$0xff] }
 0xbf4   : > { %v7274_v53 = vpop.eup %7273 }
 0xbf5   : > { %v5043_v55 = vpack.c.bf16 %v5011_v23, %v5007_v12  ;;  %v4949_v22 = vadd.f32 1.0, %v7274_v53  ;;  %v5009_v45 = vmul.f32 %v4945_v59, %v4497_v4 }
 0xbf7   : > { %5397 = vmatprep.mubr.bf16.mxu0 %v5043_v55  ;;  %v5013_v0 = vmul.f32 %v4949_v22, %v4501_v52 }
 0xbf8   : > { %5398 = vmatmul.mubr.bf16.gmra.mxu0 %v5042_v61  ;;  %v10919_v61 = vld [vmem:[#allocation27_spill] sm:$0xff] }
 0xbf9   : > { %v5045_v48 = vpack.c.bf16 %v5013_v0, %v5009_v45  ;;  %v10920_v45 = vld [vmem:[#allocation37_spill] sm:$0xff] }
 0xbfb   : > { %5494 = vmatprep.mubr.bf16.mxu1 %v5045_v48 }
 0xbfc   : > { %5495 = vmatmul.mubr.bf16.gmra.mxu1 %v5044_v9 }
 0xc4d   : > { %v6073_v33 = vpop.f32.mrf.mxu0 }
 0xc4f   : > { %v6074_v46 = vpop.f32.mrf.mxu0 }
 0xc50   : > { %v6075_v42 = vadd.f32 %v6074_v46, %v6073_v33 }
 0xc51   : > { %v6076_v58 = vpop.f32.mrf.mxu0 }
 0xc52   : > { %v6137_v63 = vpop.f32.mrf.mxu1  ;;  %v5344_v31 = vadd.f32 %v6075_v42, %v10509_v15 }
 0xc53   : > { %v6077_v30 = vpop.f32.mrf.mxu0 }
 0xc54   : > { %v6138_v29 = vpop.f32.mrf.mxu1  ;;  %v6078_v21 = vadd.f32 %v6077_v30, %v6076_v58 }
 0xc55   : > { %v6139_v24 = vadd.f32 %v6138_v29, %v6137_v63  ;;  %v6079_v36 = vpop.f32.mrf.mxu0 }
 0xc56   : > { %v6140_v17 = vpop.f32.mrf.mxu1  ;;  %v5347_v8 = vadd.f32 %v6078_v21, %v10509_v15 }
 0xc57   : > { %v5441_v11 = vadd.f32 %v6139_v24, %v5344_v31  ;;  %v6080_v3 = vpop.f32.mrf.mxu0 }
 0xc58   : > { %v6141_v57 = vpop.f32.mrf.mxu1  ;;  %v6081_v5 = vadd.f32 %v6080_v3, %v6079_v36 }
 0xc59   : > { %v5503_v62 = vadd.f32 %v5441_v11, %v10915_v34  ;;  %v6142_v50 = vadd.f32 %v6141_v57, %v6140_v17  ;;  %v6082_v26 = vpop.f32.mrf.mxu0  ;;  %v10921_v17 = vld [vmem:[#allocation39_spill] sm:$0xff]  ;;  %v10922_v57 = vld [vmem:[#allocation38_spill] sm:$0xff] }
 0xc5a   : > { %v6143_v38 = vpop.f32.mrf.mxu1  ;;  %v5352_v56 = vadd.f32 %v6081_v5, %v10509_v15 }
 0xc5b   : > { %5519 = vst [vmem:[%s10516_s3] sm:$0xff] %v5503_v62  ;;  %v5444_v32 = vadd.f32 %v6142_v50, %v5347_v8  ;;  %v6083_v2 = vpop.f32.mrf.mxu0 }
 0xc5c   : > { %v6144_v7 = vpop.f32.mrf.mxu1  ;;  %v6084_v13 = vadd.f32 %v6083_v2, %v6082_v26 }
 0xc5d   : > { %v5504_v16 = vadd.f32 %v5444_v32, %v10916_v47  ;;  %v6145_v43 = vadd.f32 %v6144_v7, %v6143_v38 }
 0xc5e   : > { %v6146_v20 = vpop.f32.mrf.mxu1  ;;  %v5355_v49 = vadd.f32 %v6084_v13, %v10509_v15 }
 0xc5f   : > { %5520 = vst [vmem:[%s10516_s3 + $0x8] sm:$0xff] %v5504_v16  ;;  %v5449_v19 = vadd.f32 %v6145_v43, %v5352_v56 }
 0xc60   : > { %v6147_v39 = vpop.f32.mrf.mxu1 }
 0xc61   : > { %v5505_v35 = vadd.f32 %v5449_v19, %v10917_v51  ;;  %v6148_v6 = vadd.f32 %v6147_v39, %v6146_v20 }
 0xc63   : > { %5521 = vst [vmem:[%s10516_s3 + $0x10] sm:$0xff] %v5505_v35  ;;  %v5452_v18 = vadd.f32 %v6148_v6, %v5355_v49  ;;  %v10923_v49 = vld [vmem:[#allocation41_spill] sm:$0xff] }
 0xc65   : > { %v5506_v14 = vadd.f32 %v5452_v18, %v10918_v27 }
 0xc67   : > { %5522 = vst [vmem:[%s10516_s3 + $0x18] sm:$0xff] %v5506_v14 }
 0xc6d   : > { %v6085_v54 = vpop.f32.mrf.mxu0 }
 0xc6f   : > { %v6086_v37 = vpop.f32.mrf.mxu0 }
 0xc70   : > { %v6149_v60 = vpop.f32.mrf.mxu1  ;;  %v6087_v12 = vadd.f32 %v6086_v37, %v6085_v54  ;;  %v10924_v37 = vld [vmem:[#allocation40_spill] sm:$0xff] }
 0xc71   : > { %v6088_v23 = vpop.f32.mrf.mxu0 }
 0xc72   : > { %v5360_v53 = vadd.f32 %v6087_v12, %v10509_v15  ;;  %v6150_v59 = vpop.f32.mrf.mxu1 }
 0xc73   : > { %v6151_v28 = vadd.f32 %v6150_v59, %v6149_v60  ;;  %v6089_v10 = vpop.f32.mrf.mxu0 }
 0xc74   : > { %v6152_v41 = vpop.f32.mrf.mxu1  ;;  %v6090_v55 = vadd.f32 %v6089_v10, %v6088_v23 }
 0xc75   : > { %v5457_v4 = vadd.f32 %v6151_v28, %v5360_v53 }
 0xc76   : > { %v5363_v52 = vadd.f32 %v6090_v55, %v10509_v15  ;;  %v6153_v22 = vpop.f32.mrf.mxu1 }
 0xc77   : > { %v5507_v25 = vadd.f32 %v5457_v4, %v10919_v61  ;;  %v6154_v40 = vadd.f32 %v6153_v22, %v6152_v41  ;;  %v10925_v4 = vld [vmem:[#allocation44_spill] sm:$0xff] }
 0xc79   : > { %5523 = vst [vmem:[%s10516_s3 + $0x20] sm:$0xff] %v5507_v25  ;;  %v5460_v1 = vadd.f32 %v6154_v40, %v5363_v52 }
 0xc7b   : > { %v5508_v0 = vadd.f32 %v5460_v1, %v10920_v45 }
 0xc7d   : > { %5524 = vst [vmem:[%s10516_s3 + $0x28] sm:$0xff] %v5508_v0 }
 0xc7f   : > { %v6091_v44 = vpop.f32.mrf.mxu0 }
 0xc81   : > { %v6092_v48 = vpop.f32.mrf.mxu0 }
 0xc82   : > { %v6093_v9 = vadd.f32 %v6092_v48, %v6091_v44  ;;  %v10926_v48 = vld [vmem:[#allocation43_spill] sm:$0xff] }
 0xc83   : > { %v6094_v33 = vpop.f32.mrf.mxu0 }
 0xc84   : > { %v5368_v42 = vadd.f32 %v6093_v9, %v10509_v15 }
 0xc85   : > { %v6155_v46 = vpop.f32.mrf.mxu1  ;;  %v6095_v58 = vpop.f32.mrf.mxu0 }
 0xc86   : > { %v6096_v31 = vadd.f32 %v6095_v58, %v6094_v33 }
 0xc87   : > { %v6156_v63 = vpop.f32.mrf.mxu1 }
 0xc88   : > { %v6157_v30 = vadd.f32 %v6156_v63, %v6155_v46  ;;  %v5371_v24 = vadd.f32 %v6096_v31, %v10509_v15 }
 0xc89   : > { %v6158_v29 = vpop.f32.mrf.mxu1 }
 0xc8a   : > { %v5465_v21 = vadd.f32 %v6157_v30, %v5368_v42 }
 0xc8b   : > { %v6159_v36 = vpop.f32.mrf.mxu1 }
 0xc8c   : > { %v5509_v11 = vadd.f32 %v5465_v21, %v10921_v17  ;;  %v6160_v8 = vadd.f32 %v6159_v36, %v6158_v29  ;;  %v10927_v29 = vld [vmem:[#allocation42_spill] sm:$0xff] }
 0xc8e   : > { %5525 = vst [vmem:[%s10516_s3 + $0x30] sm:$0xff] %v5509_v11  ;;  %v5468_v3 = vadd.f32 %v6160_v8, %v5371_v24 }
 0xc90   : > { %v5510_v5 = vadd.f32 %v5468_v3, %v10922_v57  ;;  %v10928_v57 = vld [vmem:[#allocation45_spill] sm:$0xff] }
 0xc92   : > { %5526 = vst [vmem:[%s10516_s3 + $0x38] sm:$0xff] %v5510_v5 }
 0xc9d   : > { %v6097_v34 = vpop.f32.mrf.mxu0 }
 0xc9f   : > { %v6098_v62 = vpop.f32.mrf.mxu0 }
 0xca0   : > { %v6099_v50 = vadd.f32 %v6098_v62, %v6097_v34 }
 0xca1   : > { %v6161_v26 = vpop.f32.mrf.mxu1  ;;  %v6100_v38 = vpop.f32.mrf.mxu0 }
 0xca2   : > { %v5376_v32 = vadd.f32 %v6099_v50, %v10509_v15 }
 0xca3   : > { %v6162_v56 = vpop.f32.mrf.mxu1  ;;  %v6101_v2 = vpop.f32.mrf.mxu0 }
 0xca4   : > { %v6163_v7 = vadd.f32 %v6162_v56, %v6161_v26  ;;  %v6102_v13 = vadd.f32 %v6101_v2, %v6100_v38 }
 0xca5   : > { %v6164_v47 = vpop.f32.mrf.mxu1 }
 0xca6   : > { %v5473_v16 = vadd.f32 %v6163_v7, %v5376_v32  ;;  %v5379_v43 = vadd.f32 %v6102_v13, %v10509_v15 }
 0xca7   : > { %v6165_v20 = vpop.f32.mrf.mxu1  ;;  %v6103_v19 = vpop.f32.mrf.mxu0 }
 0xca8   : > { %v5511_v39 = vadd.f32 %v5473_v16, %v10923_v49  ;;  %v6166_v51 = vadd.f32 %v6165_v20, %v6164_v47  ;;  %v10929_v16 = vld [vmem:[#allocation46_spill] sm:$0xff]  ;;  %v10930_v49 = vld [vmem:[#allocation48_spill] sm:$0xff] }
 0xca9   : > { %v6167_v35 = vpop.f32.mrf.mxu1  ;;  %v6104_v6 = vpop.f32.mrf.mxu0 }
 0xcaa   : > { %5527 = vst [vmem:[%s10516_s3 + $0x40] sm:$0xff] %v5511_v39  ;;  %v5476_v18 = vadd.f32 %v6166_v51, %v5379_v43  ;;  %v6105_v27 = vadd.f32 %v6104_v6, %v6103_v19 }
 0xcab   : > { %v6168_v14 = vpop.f32.mrf.mxu1  ;;  %v6106_v54 = vpop.f32.mrf.mxu0 }
 0xcac   : > { %v5512_v60 = vadd.f32 %v5476_v18, %v10924_v37  ;;  %v5384_v12 = vadd.f32 %v6105_v27, %v10509_v15  ;;  %v6169_v23 = vadd.f32 %v6168_v14, %v6167_v35 }
 0xcad   : > { %v6170_v53 = vpop.f32.mrf.mxu1  ;;  %v6107_v59 = vpop.f32.mrf.mxu0 }
 0xcae   : > { %5528 = vst [vmem:[%s10516_s3 + $0x48] sm:$0xff] %v5512_v60  ;;  %v5481_v28 = vadd.f32 %v6169_v23, %v5384_v12  ;;  %v6108_v10 = vadd.f32 %v6107_v59, %v6106_v54 }
 0xcaf   : > { %v6171_v41 = vpop.f32.mrf.mxu1  ;;  %v6109_v55 = vpop.f32.mrf.mxu0 }
 0xcb0   : > { %v5513_v52 = vadd.f32 %v5481_v28, %v10925_v4  ;;  %v5387_v22 = vadd.f32 %v6108_v10, %v10509_v15  ;;  %v6172_v61 = vadd.f32 %v6171_v41, %v6170_v53 }
 0xcb1   : > { %v6173_v25 = vpop.f32.mrf.mxu1  ;;  %v6110_v40 = vpop.f32.mrf.mxu0 }
 0xcb2   : > { %5529 = vst [vmem:[%s10516_s3 + $0x50] sm:$0xff] %v5513_v52  ;;  %v5484_v1 = vadd.f32 %v6172_v61, %v5387_v22  ;;  %v6111_v45 = vadd.f32 %v6110_v40, %v6109_v55 }
 0xcb3   : > { %v6174_v0 = vpop.f32.mrf.mxu1  ;;  %v6112_v44 = vpop.f32.mrf.mxu0 }
 0xcb4   : > { %v5514_v9 = vadd.f32 %v5484_v1, %v10926_v48  ;;  %v5392_v33 = vadd.f32 %v6111_v45, %v10509_v15  ;;  %v6175_v46 = vadd.f32 %v6174_v0, %v6173_v25 }
 0xcb5   : > { %v6176_v42 = vpop.f32.mrf.mxu1  ;;  %v6113_v58 = vpop.f32.mrf.mxu0 }
 0xcb6   : > { %5530 = vst [vmem:[%s10516_s3 + $0x58] sm:$0xff] %v5514_v9  ;;  %v5489_v63 = vadd.f32 %v6175_v46, %v5392_v33  ;;  %v6114_v31 = vadd.f32 %v6113_v58, %v6112_v44 }
 0xcb7   : > { %v6177_v30 = vpop.f32.mrf.mxu1 }
 0xcb8   : > { %v5515_v21 = vadd.f32 %v5489_v63, %v10927_v29  ;;  %v5395_v24 = vadd.f32 %v6114_v31, %v10509_v15  ;;  %v6178_v36 = vadd.f32 %v6177_v30, %v6176_v42  ;;  %v6115_v17 = vpop.f32.mrf.mxu0 }
 0xcba   : > { %5531 = vst [vmem:[%s10516_s3 + $0x60] sm:$0xff] %v5515_v21  ;;  %v5492_v11 = vadd.f32 %v6178_v36, %v5395_v24  ;;  %v6116_v8 = vpop.f32.mrf.mxu0 }
 0xcbb   : > { %v6117_v3 = vadd.f32 %v6116_v8, %v6115_v17 }
 0xcbc   : > { %v5516_v5 = vadd.f32 %v5492_v11, %v10928_v57  ;;  %v6179_v34 = vpop.f32.mrf.mxu1  ;;  %v6118_v62 = vpop.f32.mrf.mxu0 }
 0xcbd   : > { %v5400_v50 = vadd.f32 %v6117_v3, %v10509_v15 }
 0xcbe   : > { %5532 = vst [vmem:[%s10516_s3 + $0x68] sm:$0xff] %v5516_v5  ;;  %v6180_v26 = vpop.f32.mrf.mxu1  ;;  %v6119_v38 = vpop.f32.mrf.mxu0 }
 0xcbf   : > { %v6181_v32 = vadd.f32 %v6180_v26, %v6179_v34  ;;  %v6120_v56 = vadd.f32 %v6119_v38, %v6118_v62 }
 0xcc0   : > { %v6182_v2 = vpop.f32.mrf.mxu1 }
 0xcc1   : > { %v5497_v7 = vadd.f32 %v6181_v32, %v5400_v50  ;;  %v5403_v13 = vadd.f32 %v6120_v56, %v10509_v15 }
 0xcc2   : > { %v6183_v47 = vpop.f32.mrf.mxu1 }
 0xcc3   : > { %v5517_v43 = vadd.f32 %v5497_v7, %v10929_v16  ;;  %v6184_v20 = vadd.f32 %v6183_v47, %v6182_v2 }
 0xcc5   : > { %5533 = vst [vmem:[%s10516_s3 + $0x70] sm:$0xff] %v5517_v43  ;;  %v5500_v19 = vadd.f32 %v6184_v20, %v5403_v13 }
 0xcc7   : > { %v5518_v15 = vadd.f32 %v5500_v19, %v10930_v49 }
 0xcc9   : > { %5534 = vst [vmem:[%s10516_s3 + $0x78] sm:$0xff] %v5518_v15 }
 0xcca   : > { %7489 = shalt.err (!%p7486_p6)
}
 0xccb   : > { %s7490_s2 = scalar_lea.hbm %s10566_s1, 2048  ;;  %s7494_s15 = scalar_lea.hbm %s10626_s13, 4096 }
 0xccc   : > { %p7491_p4 = scmp.ne.s32.totalorder %s10566_s1, %s7490_s2  ;;  %p7495_p9 = scmp.lt.s32.totalorder %s10566_s1, %s10626_s13 }
 0xccd   : > { %p7496_p11 = scmp.lt.s32.totalorder %s7494_s15, %s7490_s2 }
 0xcce   : > { %p7492_p1 = pnand %p7491_p4, %p10931_p13 }
 0xccf   : > { %p7497_p10 = por %p7496_p11, %p7495_p9 }
 0xcd0   : > { %p7493_p3 = pneg %p7492_p1 }
 0xcd2   : > { %p7498_p12 = pnand %p7497_p10, %p7493_p3 }
 0xcd4   : > { %7501 = shalt.err (!%p7498_p12)
}
 0xcd5   : > { %s7575_s17 = smov 128   ;;  %s7576_s16 = smov 8  }
 0xcd6   : > { %6611 = dma.vmem_to_hbm [thread:$0]  (%p10931_p13), %s10568_s29, 2048, %s10566_s1, %s5536_s11, %s7575_s17, %s7575_s17, %s7576_s16  }
 0xcd7 PF: > { %s5564_s20 = sand.u32 1, %s7540_s25   ;;  %p10932_p0 = scmp.ne.s32.totalorder %s10739_s22, 0 }
 0xcd8   : > { %p10933_p2 = scmp.ge.s32.totalorder %s7552_s28, 2  ;;  %s5565_s14 = scalar_lea.sflag [#allocation4], %s5564_s20 }
 0xcda   : > { %p6637_p5 = pnand %p10933_p2, %p10932_p0 }
 0xcdc   : > { %p6638_p8 = pneg %p6637_p5 }
 0xcde   : > { %7535 = dma.done.wait (%p6638_p8), %s5565_s14, 2048  }
 0xcdf   : > { %7537 = vsyncadd (%p6638_p8), %s5565_s14, 4294965248  ;;  %s10934_s23 = sld [smem:[#allocation20_spill]]  ;;  %p29_p7 = scmp.ge.s32.totalorder %s7750_s18, 4  }
 0xce0   : > { %s10935_s25 = smov %s7544_s26  ;;  %s10936_s26 = smov %s7548_s27 }
 0xce1   : > { %s10938_s28 = smov %s7750_s18  ;;  %31 = sbr.rel (!%p29_p7) target bundleno = 15 (0xf), region = 141 }
 0xce5   : > { %s10937_s27 = smov %s10934_s23 }
 0xce6   :  { %5570 = vsyncpa [#allocation3], 1 }
 0xce7   :  { %5572 = vsyncpa [#allocation3 + $0x1], 1 }
 0xce8   :  { %5573 = vsyncpa [#allocation6], 1 }
 0xce9   :  { %5574 = vsyncpa [#allocation9], 1 }
 0xcea   :  { %5575 = vsyncpa [#allocation12], 1 }
 0xceb   :  { %5576 = vsyncpa [#allocation4], 1 }
 0xcec   :  { %5578 = vsyncpa [#allocation4 + $0x1], 1 }

</bundles_post_ra>
